<compile_context>
chip_gen: v5e
topology: v5e:2x2
jax: 0.10.0
libtpu: 0.0.40
codegen_flags: <defaults>
</compile_context>

<pallas_src>
import functools
from math import sqrt

import jax
import jax.numpy as jnp
from jax.experimental import pallas as pl
from jax.experimental.pallas import tpu as pltpu

LN_EPS = 1e-5        # PyTorch nn.LayerNorm default
N_LOGITS = 29
LOGITS_PAD = 128     # lane-dense padded logits width written by the kernel


def _layernorm(v, w, b):
    # One-pass variance: E[x^2] - mu^2 (one cross-lane reduction instead of two).
    mu = jnp.mean(v, axis=-1, keepdims=True)
    var = jnp.mean(v * v, axis=-1, keepdims=True) - mu * mu
    return (v - mu) * jax.lax.rsqrt(var + LN_EPS) * w + b


def _bf16(x):
    return x.astype(jnp.bfloat16)


def _dot(a, b):
    # bf16 MXU inputs, f32 accumulation.
    return jnp.dot(_bf16(a), _bf16(b), preferred_element_type=jnp.float32)


def _dot_nt(a, b):
    # a @ b.T without materializing the transpose (contract last dims).
    return jax.lax.dot_general(_bf16(a), _bf16(b),
                               (((1,), (1,)), ((), ())),
                               preferred_element_type=jnp.float32)


def _fused_kernel(x_ref,
                  ln1w_ref, ln1b_ref, wq_ref, bq_ref, wk_ref, bk_ref,
                  wv_ref, bv_ref, wo_ref, bo_ref, ln2w_ref, ln2b_ref,
                  wa_ref, ba_ref, wg_ref, bg_ref, w2_ref, b2_ref,
                  nw_ref, nb_ref, wl_ref, bl_ref,
                  o_ref, *, nblocks, nheads, batch, seqlen):
    x = x_ref[...]                                   # [B*L, D] f32
    _, d_model = x.shape
    hd = d_model // nheads
    scale = 1.0 / sqrt(hd)

    for li in range(nblocks):                        # static layer loop (fully fused)
        # ---------------- attention sub-block (pre-norm) ----------------
        h = _layernorm(x, ln1w_ref[li], ln1b_ref[li])
        hb = _bf16(h)
        q = (_dot(hb, wq_ref[li]) + bq_ref[li]) * scale   # scale folded into q once
        k = _dot(hb, wk_ref[li]) + bk_ref[li]
        v = _dot(hb, wv_ref[li]) + bv_ref[li]
        wo = wo_ref[li]                              # [D, D] f32 (cast at the dot)

        per_batch = []
        for b in range(batch):                       # static; L==8 rows are tile-aligned
            rs = slice(b * seqlen, (b + 1) * seqlen)
            ob = jnp.zeros((seqlen, d_model), jnp.float32)
            for hh in range(nheads):                 # static head loop
                cs = slice(hh * hd, (hh + 1) * hd)
                qh, kh, vh = q[rs, cs], k[rs, cs], v[rs, cs]
                s = _dot_nt(qh, kh)                  # [L, L] f32 scores
                s = s - jnp.max(s, axis=-1, keepdims=True)
                e = jnp.exp(s)
                p = e * pl.reciprocal(jnp.sum(e, axis=-1, keepdims=True),
                                      approx=True)
                pv = _dot(p, vh)                     # [L, hd]
                # Accumulate through the matching rows of Wo: no head concat.
                ob = ob + _dot(pv, wo[cs, :])
            per_batch.append(ob)
        attn = jnp.concatenate(per_batch, axis=0) + bo_ref[li]
        x = x + attn

        # ---------------- SwiGLU feed-forward sub-block (pre-norm) ----------------
        h = _layernorm(x, ln2w_ref[li], ln2b_ref[li])
        hb = _bf16(h)
        a = _dot(hb, wa_ref[li]) + ba_ref[li]        # [B*L, 4D]
        g = _dot(hb, wg_ref[li]) + bg_ref[li]        # [B*L, 4D]
        ff = a * (g * jax.nn.sigmoid(g))             # a * silu(g), f32
        x = x + (_dot(ff, w2_ref[li]) + b2_ref[li])

    # ---------------- final LayerNorm + lane-padded logits ----------------
    h = _layernorm(x, nw_ref[...], nb_ref[...])
    o_ref[...] = _dot(h, wl_ref[...]) + bl_ref[...]  # [B*L, 128], unmasked store


def fixed_positional_embedding(dim, max_seq_len):
    inv_freq = 1.0 / (10000.0 ** (jnp.arange(0, dim, 2, dtype=jnp.float32) / dim))
    position = jnp.arange(0, max_seq_len, dtype=jnp.float32)
    sinusoid = jnp.einsum('i,j->ij', position, inv_freq)
    return jnp.concatenate([jnp.sin(sinusoid), jnp.cos(sinusoid)], axis=-1)


def init_params(key, width, nblocks):
    """PyTorch-style init; weights are [in, out] so kernels compute x @ W + b."""
    keys = jax.random.split(key, nblocks + 2)
    embed = 0.02 * jax.random.normal(keys[0], (22, width), jnp.float32)

    def lin(k, din, dout):
        w = (1.0 / sqrt(din)) * jax.random.normal(k, (din, dout), jnp.float32)
        b = jnp.zeros((1, dout), jnp.float32)
        return w, b

    blocks = []
    for i in range(nblocks):
        bks = jax.random.split(keys[1 + i], 6)
        wq, bq = lin(bks[0], width, width)
        wk, bk = lin(bks[1], width, width)
        wv, bv = lin(bks[2], width, width)
        wo, bo = lin(bks[3], width, width)
        w1, b1 = lin(bks[4], width, 8 * width)   # fused Linear(d, 8d) as in the reference
        w2, b2 = lin(bks[5], 4 * width, width)
        blocks.append(dict(
            ln1_w=jnp.ones((1, width), jnp.float32),
            ln1_b=jnp.zeros((1, width), jnp.float32),
            wq=wq, bq=bq, wk=wk, bk=bk, wv=wv, bv=bv, wo=wo, bo=bo,
            ln2_w=jnp.ones((1, width), jnp.float32),
            ln2_b=jnp.zeros((1, width), jnp.float32),
            w1=w1, b1=b1, w2=w2, b2=b2))

    seq_norm = (jnp.ones((1, width), jnp.float32),
                jnp.zeros((1, width), jnp.float32))
    logits_fc = lin(keys[-1], width, N_LOGITS)
    return embed, blocks, seq_norm, logits_fc


def pack_params(blocks, seq_norm, logits_fc, width):
    """Stack per-layer params on a leading axis, split the SwiGLU weight into
    (Wa, Wg), cast MXU weights to bf16, and lane-pad the logits projection."""
    def stack(name):
        return jnp.stack([blk[name] for blk in blocks], axis=0)

    bf = lambda t: t.astype(jnp.bfloat16)
    w1 = stack('w1')                                       # [nblocks, D, 8D]
    b1 = stack('b1')                                       # [nblocks, 1, 8D]
    wa, wg = w1[:, :, :4 * width], w1[:, :, 4 * width:]    # SwiGLU chunk(2, dim=-1)
    ba, bg = b1[:, :, :4 * width], b1[:, :, 4 * width:]

    nw, nb = seq_norm
    wl, bl = logits_fc
    wl_pad = jnp.zeros((width, LOGITS_PAD), jnp.float32).at[:, :N_LOGITS].set(wl)
    bl_pad = jnp.zeros((1, LOGITS_PAD), jnp.float32).at[:, :N_LOGITS].set(bl)

    # wo is kept f32 so the per-head row slices stay tile-aligned; it is cast to
    # bf16 at the dot, so the MXU still sees bf16 inputs.
    return (stack('ln1_w'), stack('ln1_b'),
            bf(stack('wq')), stack('bq'), bf(stack('wk')), stack('bk'),
            bf(stack('wv')), stack('bv'), stack('wo'), stack('bo'),
            stack('ln2_w'), stack('ln2_b'),
            bf(wa), ba, bf(wg), bg, bf(stack('w2')), stack('b2'),
            nw, nb, bf(wl_pad), bl_pad)


@functools.partial(jax.jit, static_argnames=("nblocks", "nheads"))
def seq_transformer_forward(tokens, residx, embed, pos_table, packed,
                            nblocks, nheads):
    # att_mask = tokens <= 20   # computed in the reference module but never used
    B, L = tokens.shape
    D = embed.shape[1]
    x = (embed[tokens] + pos_table[residx]).reshape(B * L, D)   # glue: gathers

    kernel = functools.partial(_fused_kernel, nblocks=nblocks, nheads=nheads,
                               batch=B, seqlen=L)
    out = pl.pallas_call(
        kernel,
        out_shape=jax.ShapeDtypeStruct((B * L, LOGITS_PAD), jnp.float32),
        in_specs=[pl.BlockSpec(memory_space=pltpu.MemorySpace.VMEM)]
                 * (1 + len(packed)),
        out_specs=pl.BlockSpec(memory_space=pltpu.MemorySpace.VMEM),
    )(x, *packed)
    return out.reshape(B, L, LOGITS_PAD)[:, :, :N_LOGITS]


if __name__ == "__main__":
    B, L = 2, 8
    width, nblocks, nheads = 32, 2, 4

    key = jax.random.PRNGKey(0)
    kp, kt = jax.random.split(key)

    embed, blocks, seq_norm, logits_fc = init_params(kp, width, nblocks)
    packed = pack_params(blocks, seq_norm, logits_fc, width)
    pos_table = fixed_positional_embedding(width, 3000)   # [3000, width]

    tokens = jax.random.randint(kt, (B, L), 0, 22, dtype=jnp.int32)
    residx = jnp.broadcast_to(jnp.arange(L, dtype=jnp.int32), (B, L))

    out = seq_transformer_forward(tokens, residx, embed, pos_table, packed,
                                  nblocks=nblocks, nheads=nheads)
    out = jax.block_until_ready(out)
    assert out.shape == (B, L, N_LOGITS) and out.dtype == jnp.float32
    assert bool(jnp.all(jnp.isfinite(out)))
    print("KERNEL_OK")
</pallas_src>

<mosaic_0001>
module attributes {stable_mosaic.version = 11 : i64} {
  func.func @_fused_kernel(%arg0: memref<16x32xf32, #tpu.memory_space<vmem>>, %arg1: memref<2x1x32xf32, #tpu.memory_space<vmem>>, %arg2: memref<2x1x32xf32, #tpu.memory_space<vmem>>, %arg3: memref<2x32x32xbf16, #tpu.memory_space<vmem>>, %arg4: memref<2x1x32xf32, #tpu.memory_space<vmem>>, %arg5: memref<2x32x32xbf16, #tpu.memory_space<vmem>>, %arg6: memref<2x1x32xf32, #tpu.memory_space<vmem>>, %arg7: memref<2x32x32xbf16, #tpu.memory_space<vmem>>, %arg8: memref<2x1x32xf32, #tpu.memory_space<vmem>>, %arg9: memref<2x32x32xf32, #tpu.memory_space<vmem>>, %arg10: memref<2x1x32xf32, #tpu.memory_space<vmem>>, %arg11: memref<2x1x32xf32, #tpu.memory_space<vmem>>, %arg12: memref<2x1x32xf32, #tpu.memory_space<vmem>>, %arg13: memref<2x32x128xbf16, #tpu.memory_space<vmem>>, %arg14: memref<2x1x128xf32, #tpu.memory_space<vmem>>, %arg15: memref<2x32x128xbf16, #tpu.memory_space<vmem>>, %arg16: memref<2x1x128xf32, #tpu.memory_space<vmem>>, %arg17: memref<2x128x32xbf16, #tpu.memory_space<vmem>>, %arg18: memref<2x1x32xf32, #tpu.memory_space<vmem>>, %arg19: memref<1x32xf32, #tpu.memory_space<vmem>>, %arg20: memref<1x32xf32, #tpu.memory_space<vmem>>, %arg21: memref<32x128xbf16, #tpu.memory_space<vmem>>, %arg22: memref<1x128xf32, #tpu.memory_space<vmem>>, %arg23: memref<16x128xf32, #tpu.memory_space<vmem>>) attributes {dimension_semantics = [], scalar_prefetch = 0 : i64, scratch_operands = 0 : i64, tpu.core_type = #tpu.core_type<tc>} {
    %c0 = arith.constant 0 : index
    %c0_0 = arith.constant 0 : index
    %0 = vector.load %arg0[%c0, %c0_0] : memref<16x32xf32, #tpu.memory_space<vmem>>, vector<16x32xf32>
    %c0_1 = arith.constant 0 : index
    %c0_2 = arith.constant 0 : index
    %c0_3 = arith.constant 0 : index
    %1 = vector.load %arg1[%c0_1, %c0_2, %c0_3] : memref<2x1x32xf32, #tpu.memory_space<vmem>>, vector<1x1x32xf32>
    %2 = vector.shape_cast %1 : vector<1x1x32xf32> to vector<1x32xf32>
    %c0_4 = arith.constant 0 : index
    %c0_5 = arith.constant 0 : index
    %c0_6 = arith.constant 0 : index
    %3 = vector.load %arg2[%c0_4, %c0_5, %c0_6] : memref<2x1x32xf32, #tpu.memory_space<vmem>>, vector<1x1x32xf32>
    %4 = vector.shape_cast %3 : vector<1x1x32xf32> to vector<1x32xf32>
    %cst = arith.constant dense<0.000000e+00> : vector<16xf32>
    %5 = vector.multi_reduction <add>, %0, %cst [1] : vector<16x32xf32> to vector<16xf32>
    %6 = vector.shape_cast %5 : vector<16xf32> to vector<16x1xf32>
    %cst_7 = arith.constant 3.200000e+01 : f32
    %7 = vector.broadcast %cst_7 : f32 to vector<16x1xf32>
    %8 = arith.divf %6, %7 : vector<16x1xf32>
    %9 = arith.mulf %0, %0 : vector<16x32xf32>
    %cst_8 = arith.constant dense<0.000000e+00> : vector<16xf32>
    %10 = vector.multi_reduction <add>, %9, %cst_8 [1] : vector<16x32xf32> to vector<16xf32>
    %11 = vector.shape_cast %10 : vector<16xf32> to vector<16x1xf32>
    %cst_9 = arith.constant 3.200000e+01 : f32
    %12 = vector.broadcast %cst_9 : f32 to vector<16x1xf32>
    %13 = arith.divf %11, %12 : vector<16x1xf32>
    %14 = arith.mulf %8, %8 : vector<16x1xf32>
    %15 = arith.subf %13, %14 : vector<16x1xf32>
    %16 = vector.broadcast %8 : vector<16x1xf32> to vector<16x32xf32>
    %17 = arith.subf %0, %16 : vector<16x32xf32>
    %cst_10 = arith.constant 9.99999974E-6 : f32
    %18 = vector.broadcast %cst_10 : f32 to vector<16x1xf32>
    %19 = arith.addf %15, %18 : vector<16x1xf32>
    %20 = math.rsqrt %19 : vector<16x1xf32>
    %21 = vector.broadcast %20 : vector<16x1xf32> to vector<16x32xf32>
    %22 = arith.mulf %17, %21 : vector<16x32xf32>
    %23 = vector.broadcast %2 : vector<1x32xf32> to vector<16x32xf32>
    %24 = arith.mulf %22, %23 : vector<16x32xf32>
    %25 = vector.broadcast %4 : vector<1x32xf32> to vector<16x32xf32>
    %26 = arith.addf %24, %25 : vector<16x32xf32>
    %27 = arith.truncf %26 : vector<16x32xf32> to vector<16x32xbf16>
    %c0_11 = arith.constant 0 : index
    %c0_12 = arith.constant 0 : index
    %c0_13 = arith.constant 0 : index
    %28 = vector.load %arg3[%c0_11, %c0_12, %c0_13] : memref<2x32x32xbf16, #tpu.memory_space<vmem>>, vector<1x32x32xbf16>
    %29 = vector.shape_cast %28 : vector<1x32x32xbf16> to vector<32x32xbf16>
    %cst_14 = arith.constant dense<0.000000e+00> : vector<16x32xf32>
    %30 = tpu.matmul %27, %29, %cst_14 {dimension_numbers = #tpu.dot_dimension_numbers<[1], [0], [0], [1], [0, 0, 1, 1], [], []>} : vector<16x32xbf16>, vector<32x32xbf16>, vector<16x32xf32> -> vector<16x32xf32>
    %c0_15 = arith.constant 0 : index
    %c0_16 = arith.constant 0 : index
    %c0_17 = arith.constant 0 : index
    %31 = vector.load %arg4[%c0_15, %c0_16, %c0_17] : memref<2x1x32xf32, #tpu.memory_space<vmem>>, vector<1x1x32xf32>
    %32 = vector.shape_cast %31 : vector<1x1x32xf32> to vector<1x32xf32>
    %33 = vector.broadcast %32 : vector<1x32xf32> to vector<16x32xf32>
    %34 = arith.addf %30, %33 : vector<16x32xf32>
    %cst_18 = arith.constant 0.353553385 : f32
    %35 = vector.broadcast %cst_18 : f32 to vector<16x32xf32>
    %36 = arith.mulf %34, %35 : vector<16x32xf32>
    %c0_19 = arith.constant 0 : index
    %c0_20 = arith.constant 0 : index
    %c0_21 = arith.constant 0 : index
    %37 = vector.load %arg5[%c0_19, %c0_20, %c0_21] : memref<2x32x32xbf16, #tpu.memory_space<vmem>>, vector<1x32x32xbf16>
    %38 = vector.shape_cast %37 : vector<1x32x32xbf16> to vector<32x32xbf16>
    %cst_22 = arith.constant dense<0.000000e+00> : vector<16x32xf32>
    %39 = tpu.matmul %27, %38, %cst_22 {dimension_numbers = #tpu.dot_dimension_numbers<[1], [0], [0], [1], [0, 0, 1, 1], [], []>} : vector<16x32xbf16>, vector<32x32xbf16>, vector<16x32xf32> -> vector<16x32xf32>
    %c0_23 = arith.constant 0 : index
    %c0_24 = arith.constant 0 : index
    %c0_25 = arith.constant 0 : index
    %40 = vector.load %arg6[%c0_23, %c0_24, %c0_25] : memref<2x1x32xf32, #tpu.memory_space<vmem>>, vector<1x1x32xf32>
    %41 = vector.shape_cast %40 : vector<1x1x32xf32> to vector<1x32xf32>
    %42 = vector.broadcast %41 : vector<1x32xf32> to vector<16x32xf32>
    %43 = arith.addf %39, %42 : vector<16x32xf32>
    %c0_26 = arith.constant 0 : index
    %c0_27 = arith.constant 0 : index
    %c0_28 = arith.constant 0 : index
    %44 = vector.load %arg7[%c0_26, %c0_27, %c0_28] : memref<2x32x32xbf16, #tpu.memory_space<vmem>>, vector<1x32x32xbf16>
    %45 = vector.shape_cast %44 : vector<1x32x32xbf16> to vector<32x32xbf16>
    %cst_29 = arith.constant dense<0.000000e+00> : vector<16x32xf32>
    %46 = tpu.matmul %27, %45, %cst_29 {dimension_numbers = #tpu.dot_dimension_numbers<[1], [0], [0], [1], [0, 0, 1, 1], [], []>} : vector<16x32xbf16>, vector<32x32xbf16>, vector<16x32xf32> -> vector<16x32xf32>
    %c0_30 = arith.constant 0 : index
    %c0_31 = arith.constant 0 : index
    %c0_32 = arith.constant 0 : index
    %47 = vector.load %arg8[%c0_30, %c0_31, %c0_32] : memref<2x1x32xf32, #tpu.memory_space<vmem>>, vector<1x1x32xf32>
    %48 = vector.shape_cast %47 : vector<1x1x32xf32> to vector<1x32xf32>
    %49 = vector.broadcast %48 : vector<1x32xf32> to vector<16x32xf32>
    %50 = arith.addf %46, %49 : vector<16x32xf32>
    %c0_33 = arith.constant 0 : index
    %c0_34 = arith.constant 0 : index
    %c0_35 = arith.constant 0 : index
    %51 = vector.load %arg9[%c0_33, %c0_34, %c0_35] : memref<2x32x32xf32, #tpu.memory_space<vmem>>, vector<1x32x32xf32>
    %52 = vector.shape_cast %51 : vector<1x32x32xf32> to vector<32x32xf32>
    %cst_36 = arith.constant 0.000000e+00 : f32
    %53 = vector.broadcast %cst_36 : f32 to vector<8x32xf32>
    %54 = vector.extract_strided_slice %36 {offsets = [0, 0], sizes = [8, 8], strides = [1, 1]} : vector<16x32xf32> to vector<8x8xf32>
    %55 = vector.extract_strided_slice %43 {offsets = [0, 0], sizes = [8, 8], strides = [1, 1]} : vector<16x32xf32> to vector<8x8xf32>
    %56 = vector.extract_strided_slice %50 {offsets = [0, 0], sizes = [8, 8], strides = [1, 1]} : vector<16x32xf32> to vector<8x8xf32>
    %57 = arith.truncf %54 : vector<8x8xf32> to vector<8x8xbf16>
    %58 = arith.truncf %55 : vector<8x8xf32> to vector<8x8xbf16>
    %cst_37 = arith.constant dense<0.000000e+00> : vector<8x8xf32>
    %59 = tpu.matmul %57, %58, %cst_37 {dimension_numbers = #tpu.dot_dimension_numbers<[1], [1], [0], [0], [0, 0, 1, 0], [], []>} : vector<8x8xbf16>, vector<8x8xbf16>, vector<8x8xf32> -> vector<8x8xf32>
    %cst_38 = arith.constant dense<0xFF800000> : vector<8xf32>
    %60 = vector.multi_reduction <maximumf>, %59, %cst_38 [1] : vector<8x8xf32> to vector<8xf32>
    %61 = vector.shape_cast %60 : vector<8xf32> to vector<8x1xf32>
    %62 = vector.broadcast %61 : vector<8x1xf32> to vector<8x8xf32>
    %63 = arith.subf %59, %62 : vector<8x8xf32>
    %64 = math.exp %63 : vector<8x8xf32>
    %cst_39 = arith.constant dense<0.000000e+00> : vector<8xf32>
    %65 = vector.multi_reduction <add>, %64, %cst_39 [1] : vector<8x8xf32> to vector<8xf32>
    %66 = vector.shape_cast %65 : vector<8xf32> to vector<8x1xf32>
    %67 = tpu.reciprocal %66 {approx = true} : vector<8x1xf32> -> vector<8x1xf32>
    %68 = vector.broadcast %67 : vector<8x1xf32> to vector<8x8xf32>
    %69 = arith.mulf %64, %68 : vector<8x8xf32>
    %70 = arith.truncf %69 : vector<8x8xf32> to vector<8x8xbf16>
    %71 = arith.truncf %56 : vector<8x8xf32> to vector<8x8xbf16>
    %cst_40 = arith.constant dense<0.000000e+00> : vector<8x8xf32>
    %72 = tpu.matmul %70, %71, %cst_40 {dimension_numbers = #tpu.dot_dimension_numbers<[1], [0], [0], [1], [0, 0, 1, 1], [], []>} : vector<8x8xbf16>, vector<8x8xbf16>, vector<8x8xf32> -> vector<8x8xf32>
    %73 = vector.extract_strided_slice %52 {offsets = [0, 0], sizes = [8, 32], strides = [1, 1]} : vector<32x32xf32> to vector<8x32xf32>
    %74 = arith.truncf %72 : vector<8x8xf32> to vector<8x8xbf16>
    %75 = arith.truncf %73 : vector<8x32xf32> to vector<8x32xbf16>
    %cst_41 = arith.constant dense<0.000000e+00> : vector<8x32xf32>
    %76 = tpu.matmul %74, %75, %cst_41 {dimension_numbers = #tpu.dot_dimension_numbers<[1], [0], [0], [1], [0, 0, 1, 1], [], []>} : vector<8x8xbf16>, vector<8x32xbf16>, vector<8x32xf32> -> vector<8x32xf32>
    %77 = arith.addf %53, %76 : vector<8x32xf32>
    %78 = vector.extract_strided_slice %36 {offsets = [0, 8], sizes = [8, 8], strides = [1, 1]} : vector<16x32xf32> to vector<8x8xf32>
    %79 = vector.extract_strided_slice %43 {offsets = [0, 8], sizes = [8, 8], strides = [1, 1]} : vector<16x32xf32> to vector<8x8xf32>
    %80 = vector.extract_strided_slice %50 {offsets = [0, 8], sizes = [8, 8], strides = [1, 1]} : vector<16x32xf32> to vector<8x8xf32>
    %81 = arith.truncf %78 : vector<8x8xf32> to vector<8x8xbf16>
    %82 = arith.truncf %79 : vector<8x8xf32> to vector<8x8xbf16>
    %cst_42 = arith.constant dense<0.000000e+00> : vector<8x8xf32>
    %83 = tpu.matmul %81, %82, %cst_42 {dimension_numbers = #tpu.dot_dimension_numbers<[1], [1], [0], [0], [0, 0, 1, 0], [], []>} : vector<8x8xbf16>, vector<8x8xbf16>, vector<8x8xf32> -> vector<8x8xf32>
    %cst_43 = arith.constant dense<0xFF800000> : vector<8xf32>
    %84 = vector.multi_reduction <maximumf>, %83, %cst_43 [1] : vector<8x8xf32> to vector<8xf32>
    %85 = vector.shape_cast %84 : vector<8xf32> to vector<8x1xf32>
    %86 = vector.broadcast %85 : vector<8x1xf32> to vector<8x8xf32>
    %87 = arith.subf %83, %86 : vector<8x8xf32>
    %88 = math.exp %87 : vector<8x8xf32>
    %cst_44 = arith.constant dense<0.000000e+00> : vector<8xf32>
    %89 = vector.multi_reduction <add>, %88, %cst_44 [1] : vector<8x8xf32> to vector<8xf32>
    %90 = vector.shape_cast %89 : vector<8xf32> to vector<8x1xf32>
    %91 = tpu.reciprocal %90 {approx = true} : vector<8x1xf32> -> vector<8x1xf32>
    %92 = vector.broadcast %91 : vector<8x1xf32> to vector<8x8xf32>
    %93 = arith.mulf %88, %92 : vector<8x8xf32>
    %94 = arith.truncf %93 : vector<8x8xf32> to vector<8x8xbf16>
    %95 = arith.truncf %80 : vector<8x8xf32> to vector<8x8xbf16>
    %cst_45 = arith.constant dense<0.000000e+00> : vector<8x8xf32>
    %96 = tpu.matmul %94, %95, %cst_45 {dimension_numbers = #tpu.dot_dimension_numbers<[1], [0], [0], [1], [0, 0, 1, 1], [], []>} : vector<8x8xbf16>, vector<8x8xbf16>, vector<8x8xf32> -> vector<8x8xf32>
    %97 = vector.extract_strided_slice %52 {offsets = [8, 0], sizes = [8, 32], strides = [1, 1]} : vector<32x32xf32> to vector<8x32xf32>
    %98 = arith.truncf %96 : vector<8x8xf32> to vector<8x8xbf16>
    %99 = arith.truncf %97 : vector<8x32xf32> to vector<8x32xbf16>
    %cst_46 = arith.constant dense<0.000000e+00> : vector<8x32xf32>
    %100 = tpu.matmul %98, %99, %cst_46 {dimension_numbers = #tpu.dot_dimension_numbers<[1], [0], [0], [1], [0, 0, 1, 1], [], []>} : vector<8x8xbf16>, vector<8x32xbf16>, vector<8x32xf32> -> vector<8x32xf32>
    %101 = arith.addf %77, %100 : vector<8x32xf32>
    %102 = vector.extract_strided_slice %36 {offsets = [0, 16], sizes = [8, 8], strides = [1, 1]} : vector<16x32xf32> to vector<8x8xf32>
    %103 = vector.extract_strided_slice %43 {offsets = [0, 16], sizes = [8, 8], strides = [1, 1]} : vector<16x32xf32> to vector<8x8xf32>
    %104 = vector.extract_strided_slice %50 {offsets = [0, 16], sizes = [8, 8], strides = [1, 1]} : vector<16x32xf32> to vector<8x8xf32>
    %105 = arith.truncf %102 : vector<8x8xf32> to vector<8x8xbf16>
    %106 = arith.truncf %103 : vector<8x8xf32> to vector<8x8xbf16>
    %cst_47 = arith.constant dense<0.000000e+00> : vector<8x8xf32>
    %107 = tpu.matmul %105, %106, %cst_47 {dimension_numbers = #tpu.dot_dimension_numbers<[1], [1], [0], [0], [0, 0, 1, 0], [], []>} : vector<8x8xbf16>, vector<8x8xbf16>, vector<8x8xf32> -> vector<8x8xf32>
    %cst_48 = arith.constant dense<0xFF800000> : vector<8xf32>
    %108 = vector.multi_reduction <maximumf>, %107, %cst_48 [1] : vector<8x8xf32> to vector<8xf32>
    %109 = vector.shape_cast %108 : vector<8xf32> to vector<8x1xf32>
    %110 = vector.broadcast %109 : vector<8x1xf32> to vector<8x8xf32>
    %111 = arith.subf %107, %110 : vector<8x8xf32>
    %112 = math.exp %111 : vector<8x8xf32>
    %cst_49 = arith.constant dense<0.000000e+00> : vector<8xf32>
    %113 = vector.multi_reduction <add>, %112, %cst_49 [1] : vector<8x8xf32> to vector<8xf32>
    %114 = vector.shape_cast %113 : vector<8xf32> to vector<8x1xf32>
    %115 = tpu.reciprocal %114 {approx = true} : vector<8x1xf32> -> vector<8x1xf32>
    %116 = vector.broadcast %115 : vector<8x1xf32> to vector<8x8xf32>
    %117 = arith.mulf %112, %116 : vector<8x8xf32>
    %118 = arith.truncf %117 : vector<8x8xf32> to vector<8x8xbf16>
    %119 = arith.truncf %104 : vector<8x8xf32> to vector<8x8xbf16>
    %cst_50 = arith.constant dense<0.000000e+00> : vector<8x8xf32>
    %120 = tpu.matmul %118, %119, %cst_50 {dimension_numbers = #tpu.dot_dimension_numbers<[1], [0], [0], [1], [0, 0, 1, 1], [], []>} : vector<8x8xbf16>, vector<8x8xbf16>, vector<8x8xf32> -> vector<8x8xf32>
    %121 = vector.extract_strided_slice %52 {offsets = [16, 0], sizes = [8, 32], strides = [1, 1]} : vector<32x32xf32> to vector<8x32xf32>
    %122 = arith.truncf %120 : vector<8x8xf32> to vector<8x8xbf16>
    %123 = arith.truncf %121 : vector<8x32xf32> to vector<8x32xbf16>
    %cst_51 = arith.constant dense<0.000000e+00> : vector<8x32xf32>
    %124 = tpu.matmul %122, %123, %cst_51 {dimension_numbers = #tpu.dot_dimension_numbers<[1], [0], [0], [1], [0, 0, 1, 1], [], []>} : vector<8x8xbf16>, vector<8x32xbf16>, vector<8x32xf32> -> vector<8x32xf32>
    %125 = arith.addf %101, %124 : vector<8x32xf32>
    %126 = vector.extract_strided_slice %36 {offsets = [0, 24], sizes = [8, 8], strides = [1, 1]} : vector<16x32xf32> to vector<8x8xf32>
    %127 = vector.extract_strided_slice %43 {offsets = [0, 24], sizes = [8, 8], strides = [1, 1]} : vector<16x32xf32> to vector<8x8xf32>
    %128 = vector.extract_strided_slice %50 {offsets = [0, 24], sizes = [8, 8], strides = [1, 1]} : vector<16x32xf32> to vector<8x8xf32>
    %129 = arith.truncf %126 : vector<8x8xf32> to vector<8x8xbf16>
    %130 = arith.truncf %127 : vector<8x8xf32> to vector<8x8xbf16>
    %cst_52 = arith.constant dense<0.000000e+00> : vector<8x8xf32>
    %131 = tpu.matmul %129, %130, %cst_52 {dimension_numbers = #tpu.dot_dimension_numbers<[1], [1], [0], [0], [0, 0, 1, 0], [], []>} : vector<8x8xbf16>, vector<8x8xbf16>, vector<8x8xf32> -> vector<8x8xf32>
    %cst_53 = arith.constant dense<0xFF800000> : vector<8xf32>
    %132 = vector.multi_reduction <maximumf>, %131, %cst_53 [1] : vector<8x8xf32> to vector<8xf32>
    %133 = vector.shape_cast %132 : vector<8xf32> to vector<8x1xf32>
    %134 = vector.broadcast %133 : vector<8x1xf32> to vector<8x8xf32>
    %135 = arith.subf %131, %134 : vector<8x8xf32>
    %136 = math.exp %135 : vector<8x8xf32>
    %cst_54 = arith.constant dense<0.000000e+00> : vector<8xf32>
    %137 = vector.multi_reduction <add>, %136, %cst_54 [1] : vector<8x8xf32> to vector<8xf32>
    %138 = vector.shape_cast %137 : vector<8xf32> to vector<8x1xf32>
    %139 = tpu.reciprocal %138 {approx = true} : vector<8x1xf32> -> vector<8x1xf32>
    %140 = vector.broadcast %139 : vector<8x1xf32> to vector<8x8xf32>
    %141 = arith.mulf %136, %140 : vector<8x8xf32>
    %142 = arith.truncf %141 : vector<8x8xf32> to vector<8x8xbf16>
    %143 = arith.truncf %128 : vector<8x8xf32> to vector<8x8xbf16>
    %cst_55 = arith.constant dense<0.000000e+00> : vector<8x8xf32>
    %144 = tpu.matmul %142, %143, %cst_55 {dimension_numbers = #tpu.dot_dimension_numbers<[1], [0], [0], [1], [0, 0, 1, 1], [], []>} : vector<8x8xbf16>, vector<8x8xbf16>, vector<8x8xf32> -> vector<8x8xf32>
    %145 = vector.extract_strided_slice %52 {offsets = [24, 0], sizes = [8, 32], strides = [1, 1]} : vector<32x32xf32> to vector<8x32xf32>
    %146 = arith.truncf %144 : vector<8x8xf32> to vector<8x8xbf16>
    %147 = arith.truncf %145 : vector<8x32xf32> to vector<8x32xbf16>
    %cst_56 = arith.constant dense<0.000000e+00> : vector<8x32xf32>
    %148 = tpu.matmul %146, %147, %cst_56 {dimension_numbers = #tpu.dot_dimension_numbers<[1], [0], [0], [1], [0, 0, 1, 1], [], []>} : vector<8x8xbf16>, vector<8x32xbf16>, vector<8x32xf32> -> vector<8x32xf32>
    %149 = arith.addf %125, %148 : vector<8x32xf32>
    %cst_57 = arith.constant 0.000000e+00 : f32
    %150 = vector.broadcast %cst_57 : f32 to vector<8x32xf32>
    %151 = vector.extract_strided_slice %36 {offsets = [8, 0], sizes = [8, 8], strides = [1, 1]} : vector<16x32xf32> to vector<8x8xf32>
    %152 = vector.extract_strided_slice %43 {offsets = [8, 0], sizes = [8, 8], strides = [1, 1]} : vector<16x32xf32> to vector<8x8xf32>
    %153 = vector.extract_strided_slice %50 {offsets = [8, 0], sizes = [8, 8], strides = [1, 1]} : vector<16x32xf32> to vector<8x8xf32>
    %154 = arith.truncf %151 : vector<8x8xf32> to vector<8x8xbf16>
    %155 = arith.truncf %152 : vector<8x8xf32> to vector<8x8xbf16>
    %cst_58 = arith.constant dense<0.000000e+00> : vector<8x8xf32>
    %156 = tpu.matmul %154, %155, %cst_58 {dimension_numbers = #tpu.dot_dimension_numbers<[1], [1], [0], [0], [0, 0, 1, 0], [], []>} : vector<8x8xbf16>, vector<8x8xbf16>, vector<8x8xf32> -> vector<8x8xf32>
    %cst_59 = arith.constant dense<0xFF800000> : vector<8xf32>
    %157 = vector.multi_reduction <maximumf>, %156, %cst_59 [1] : vector<8x8xf32> to vector<8xf32>
    %158 = vector.shape_cast %157 : vector<8xf32> to vector<8x1xf32>
    %159 = vector.broadcast %158 : vector<8x1xf32> to vector<8x8xf32>
    %160 = arith.subf %156, %159 : vector<8x8xf32>
    %161 = math.exp %160 : vector<8x8xf32>
    %cst_60 = arith.constant dense<0.000000e+00> : vector<8xf32>
    %162 = vector.multi_reduction <add>, %161, %cst_60 [1] : vector<8x8xf32> to vector<8xf32>
    %163 = vector.shape_cast %162 : vector<8xf32> to vector<8x1xf32>
    %164 = tpu.reciprocal %163 {approx = true} : vector<8x1xf32> -> vector<8x1xf32>
    %165 = vector.broadcast %164 : vector<8x1xf32> to vector<8x8xf32>
    %166 = arith.mulf %161, %165 : vector<8x8xf32>
    %167 = arith.truncf %166 : vector<8x8xf32> to vector<8x8xbf16>
    %168 = arith.truncf %153 : vector<8x8xf32> to vector<8x8xbf16>
    %cst_61 = arith.constant dense<0.000000e+00> : vector<8x8xf32>
    %169 = tpu.matmul %167, %168, %cst_61 {dimension_numbers = #tpu.dot_dimension_numbers<[1], [0], [0], [1], [0, 0, 1, 1], [], []>} : vector<8x8xbf16>, vector<8x8xbf16>, vector<8x8xf32> -> vector<8x8xf32>
    %170 = vector.extract_strided_slice %52 {offsets = [0, 0], sizes = [8, 32], strides = [1, 1]} : vector<32x32xf32> to vector<8x32xf32>
    %171 = arith.truncf %169 : vector<8x8xf32> to vector<8x8xbf16>
    %172 = arith.truncf %170 : vector<8x32xf32> to vector<8x32xbf16>
    %cst_62 = arith.constant dense<0.000000e+00> : vector<8x32xf32>
    %173 = tpu.matmul %171, %172, %cst_62 {dimension_numbers = #tpu.dot_dimension_numbers<[1], [0], [0], [1], [0, 0, 1, 1], [], []>} : vector<8x8xbf16>, vector<8x32xbf16>, vector<8x32xf32> -> vector<8x32xf32>
    %174 = arith.addf %150, %173 : vector<8x32xf32>
    %175 = vector.extract_strided_slice %36 {offsets = [8, 8], sizes = [8, 8], strides = [1, 1]} : vector<16x32xf32> to vector<8x8xf32>
    %176 = vector.extract_strided_slice %43 {offsets = [8, 8], sizes = [8, 8], strides = [1, 1]} : vector<16x32xf32> to vector<8x8xf32>
    %177 = vector.extract_strided_slice %50 {offsets = [8, 8], sizes = [8, 8], strides = [1, 1]} : vector<16x32xf32> to vector<8x8xf32>
    %178 = arith.truncf %175 : vector<8x8xf32> to vector<8x8xbf16>
    %179 = arith.truncf %176 : vector<8x8xf32> to vector<8x8xbf16>
    %cst_63 = arith.constant dense<0.000000e+00> : vector<8x8xf32>
    %180 = tpu.matmul %178, %179, %cst_63 {dimension_numbers = #tpu.dot_dimension_numbers<[1], [1], [0], [0], [0, 0, 1, 0], [], []>} : vector<8x8xbf16>, vector<8x8xbf16>, vector<8x8xf32> -> vector<8x8xf32>
    %cst_64 = arith.constant dense<0xFF800000> : vector<8xf32>
    %181 = vector.multi_reduction <maximumf>, %180, %cst_64 [1] : vector<8x8xf32> to vector<8xf32>
    %182 = vector.shape_cast %181 : vector<8xf32> to vector<8x1xf32>
    %183 = vector.broadcast %182 : vector<8x1xf32> to vector<8x8xf32>
    %184 = arith.subf %180, %183 : vector<8x8xf32>
    %185 = math.exp %184 : vector<8x8xf32>
    %cst_65 = arith.constant dense<0.000000e+00> : vector<8xf32>
    %186 = vector.multi_reduction <add>, %185, %cst_65 [1] : vector<8x8xf32> to vector<8xf32>
    %187 = vector.shape_cast %186 : vector<8xf32> to vector<8x1xf32>
    %188 = tpu.reciprocal %187 {approx = true} : vector<8x1xf32> -> vector<8x1xf32>
    %189 = vector.broadcast %188 : vector<8x1xf32> to vector<8x8xf32>
    %190 = arith.mulf %185, %189 : vector<8x8xf32>
    %191 = arith.truncf %190 : vector<8x8xf32> to vector<8x8xbf16>
    %192 = arith.truncf %177 : vector<8x8xf32> to vector<8x8xbf16>
    %cst_66 = arith.constant dense<0.000000e+00> : vector<8x8xf32>
    %193 = tpu.matmul %191, %192, %cst_66 {dimension_numbers = #tpu.dot_dimension_numbers<[1], [0], [0], [1], [0, 0, 1, 1], [], []>} : vector<8x8xbf16>, vector<8x8xbf16>, vector<8x8xf32> -> vector<8x8xf32>
    %194 = vector.extract_strided_slice %52 {offsets = [8, 0], sizes = [8, 32], strides = [1, 1]} : vector<32x32xf32> to vector<8x32xf32>
    %195 = arith.truncf %193 : vector<8x8xf32> to vector<8x8xbf16>
    %196 = arith.truncf %194 : vector<8x32xf32> to vector<8x32xbf16>
    %cst_67 = arith.constant dense<0.000000e+00> : vector<8x32xf32>
    %197 = tpu.matmul %195, %196, %cst_67 {dimension_numbers = #tpu.dot_dimension_numbers<[1], [0], [0], [1], [0, 0, 1, 1], [], []>} : vector<8x8xbf16>, vector<8x32xbf16>, vector<8x32xf32> -> vector<8x32xf32>
    %198 = arith.addf %174, %197 : vector<8x32xf32>
    %199 = vector.extract_strided_slice %36 {offsets = [8, 16], sizes = [8, 8], strides = [1, 1]} : vector<16x32xf32> to vector<8x8xf32>
    %200 = vector.extract_strided_slice %43 {offsets = [8, 16], sizes = [8, 8], strides = [1, 1]} : vector<16x32xf32> to vector<8x8xf32>
    %201 = vector.extract_strided_slice %50 {offsets = [8, 16], sizes = [8, 8], strides = [1, 1]} : vector<16x32xf32> to vector<8x8xf32>
    %202 = arith.truncf %199 : vector<8x8xf32> to vector<8x8xbf16>
    %203 = arith.truncf %200 : vector<8x8xf32> to vector<8x8xbf16>
    %cst_68 = arith.constant dense<0.000000e+00> : vector<8x8xf32>
    %204 = tpu.matmul %202, %203, %cst_68 {dimension_numbers = #tpu.dot_dimension_numbers<[1], [1], [0], [0], [0, 0, 1, 0], [], []>} : vector<8x8xbf16>, vector<8x8xbf16>, vector<8x8xf32> -> vector<8x8xf32>
    %cst_69 = arith.constant dense<0xFF800000> : vector<8xf32>
    %205 = vector.multi_reduction <maximumf>, %204, %cst_69 [1] : vector<8x8xf32> to vector<8xf32>
    %206 = vector.shape_cast %205 : vector<8xf32> to vector<8x1xf32>
    %207 = vector.broadcast %206 : vector<8x1xf32> to vector<8x8xf32>
    %208 = arith.subf %204, %207 : vector<8x8xf32>
    %209 = math.exp %208 : vector<8x8xf32>
    %cst_70 = arith.constant dense<0.000000e+00> : vector<8xf32>
    %210 = vector.multi_reduction <add>, %209, %cst_70 [1] : vector<8x8xf32> to vector<8xf32>
    %211 = vector.shape_cast %210 : vector<8xf32> to vector<8x1xf32>
    %212 = tpu.reciprocal %211 {approx = true} : vector<8x1xf32> -> vector<8x1xf32>
    %213 = vector.broadcast %212 : vector<8x1xf32> to vector<8x8xf32>
    %214 = arith.mulf %209, %213 : vector<8x8xf32>
    %215 = arith.truncf %214 : vector<8x8xf32> to vector<8x8xbf16>
    %216 = arith.truncf %201 : vector<8x8xf32> to vector<8x8xbf16>
    %cst_71 = arith.constant dense<0.000000e+00> : vector<8x8xf32>
    %217 = tpu.matmul %215, %216, %cst_71 {dimension_numbers = #tpu.dot_dimension_numbers<[1], [0], [0], [1], [0, 0, 1, 1], [], []>} : vector<8x8xbf16>, vector<8x8xbf16>, vector<8x8xf32> -> vector<8x8xf32>
    %218 = vector.extract_strided_slice %52 {offsets = [16, 0], sizes = [8, 32], strides = [1, 1]} : vector<32x32xf32> to vector<8x32xf32>
    %219 = arith.truncf %217 : vector<8x8xf32> to vector<8x8xbf16>
    %220 = arith.truncf %218 : vector<8x32xf32> to vector<8x32xbf16>
    %cst_72 = arith.constant dense<0.000000e+00> : vector<8x32xf32>
    %221 = tpu.matmul %219, %220, %cst_72 {dimension_numbers = #tpu.dot_dimension_numbers<[1], [0], [0], [1], [0, 0, 1, 1], [], []>} : vector<8x8xbf16>, vector<8x32xbf16>, vector<8x32xf32> -> vector<8x32xf32>
    %222 = arith.addf %198, %221 : vector<8x32xf32>
    %223 = vector.extract_strided_slice %36 {offsets = [8, 24], sizes = [8, 8], strides = [1, 1]} : vector<16x32xf32> to vector<8x8xf32>
    %224 = vector.extract_strided_slice %43 {offsets = [8, 24], sizes = [8, 8], strides = [1, 1]} : vector<16x32xf32> to vector<8x8xf32>
    %225 = vector.extract_strided_slice %50 {offsets = [8, 24], sizes = [8, 8], strides = [1, 1]} : vector<16x32xf32> to vector<8x8xf32>
    %226 = arith.truncf %223 : vector<8x8xf32> to vector<8x8xbf16>
    %227 = arith.truncf %224 : vector<8x8xf32> to vector<8x8xbf16>
    %cst_73 = arith.constant dense<0.000000e+00> : vector<8x8xf32>
    %228 = tpu.matmul %226, %227, %cst_73 {dimension_numbers = #tpu.dot_dimension_numbers<[1], [1], [0], [0], [0, 0, 1, 0], [], []>} : vector<8x8xbf16>, vector<8x8xbf16>, vector<8x8xf32> -> vector<8x8xf32>
    %cst_74 = arith.constant dense<0xFF800000> : vector<8xf32>
    %229 = vector.multi_reduction <maximumf>, %228, %cst_74 [1] : vector<8x8xf32> to vector<8xf32>
    %230 = vector.shape_cast %229 : vector<8xf32> to vector<8x1xf32>
    %231 = vector.broadcast %230 : vector<8x1xf32> to vector<8x8xf32>
    %232 = arith.subf %228, %231 : vector<8x8xf32>
    %233 = math.exp %232 : vector<8x8xf32>
    %cst_75 = arith.constant dense<0.000000e+00> : vector<8xf32>
    %234 = vector.multi_reduction <add>, %233, %cst_75 [1] : vector<8x8xf32> to vector<8xf32>
    %235 = vector.shape_cast %234 : vector<8xf32> to vector<8x1xf32>
    %236 = tpu.reciprocal %235 {approx = true} : vector<8x1xf32> -> vector<8x1xf32>
    %237 = vector.broadcast %236 : vector<8x1xf32> to vector<8x8xf32>
    %238 = arith.mulf %233, %237 : vector<8x8xf32>
    %239 = arith.truncf %238 : vector<8x8xf32> to vector<8x8xbf16>
    %240 = arith.truncf %225 : vector<8x8xf32> to vector<8x8xbf16>
    %cst_76 = arith.constant dense<0.000000e+00> : vector<8x8xf32>
    %241 = tpu.matmul %239, %240, %cst_76 {dimension_numbers = #tpu.dot_dimension_numbers<[1], [0], [0], [1], [0, 0, 1, 1], [], []>} : vector<8x8xbf16>, vector<8x8xbf16>, vector<8x8xf32> -> vector<8x8xf32>
    %242 = vector.extract_strided_slice %52 {offsets = [24, 0], sizes = [8, 32], strides = [1, 1]} : vector<32x32xf32> to vector<8x32xf32>
    %243 = arith.truncf %241 : vector<8x8xf32> to vector<8x8xbf16>
    %244 = arith.truncf %242 : vector<8x32xf32> to vector<8x32xbf16>
    %cst_77 = arith.constant dense<0.000000e+00> : vector<8x32xf32>
    %245 = tpu.matmul %243, %244, %cst_77 {dimension_numbers = #tpu.dot_dimension_numbers<[1], [0], [0], [1], [0, 0, 1, 1], [], []>} : vector<8x8xbf16>, vector<8x32xbf16>, vector<8x32xf32> -> vector<8x32xf32>
    %246 = arith.addf %222, %245 : vector<8x32xf32>
    %247 = tpu.concatenate %149, %246 in 0 : vector<8x32xf32>, vector<8x32xf32> -> vector<16x32xf32>
    %c0_78 = arith.constant 0 : index
    %c0_79 = arith.constant 0 : index
    %c0_80 = arith.constant 0 : index
    %248 = vector.load %arg10[%c0_78, %c0_79, %c0_80] : memref<2x1x32xf32, #tpu.memory_space<vmem>>, vector<1x1x32xf32>
    %249 = vector.shape_cast %248 : vector<1x1x32xf32> to vector<1x32xf32>
    %250 = vector.broadcast %249 : vector<1x32xf32> to vector<16x32xf32>
    %251 = arith.addf %247, %250 : vector<16x32xf32>
    %252 = arith.addf %0, %251 : vector<16x32xf32>
    %c0_81 = arith.constant 0 : index
    %c0_82 = arith.constant 0 : index
    %c0_83 = arith.constant 0 : index
    %253 = vector.load %arg11[%c0_81, %c0_82, %c0_83] : memref<2x1x32xf32, #tpu.memory_space<vmem>>, vector<1x1x32xf32>
    %254 = vector.shape_cast %253 : vector<1x1x32xf32> to vector<1x32xf32>
    %c0_84 = arith.constant 0 : index
    %c0_85 = arith.constant 0 : index
    %c0_86 = arith.constant 0 : index
    %255 = vector.load %arg12[%c0_84, %c0_85, %c0_86] : memref<2x1x32xf32, #tpu.memory_space<vmem>>, vector<1x1x32xf32>
    %256 = vector.shape_cast %255 : vector<1x1x32xf32> to vector<1x32xf32>
    %cst_87 = arith.constant dense<0.000000e+00> : vector<16xf32>
    %257 = vector.multi_reduction <add>, %252, %cst_87 [1] : vector<16x32xf32> to vector<16xf32>
    %258 = vector.shape_cast %257 : vector<16xf32> to vector<16x1xf32>
    %cst_88 = arith.constant 3.200000e+01 : f32
    %259 = vector.broadcast %cst_88 : f32 to vector<16x1xf32>
    %260 = arith.divf %258, %259 : vector<16x1xf32>
    %261 = arith.mulf %252, %252 : vector<16x32xf32>
    %cst_89 = arith.constant dense<0.000000e+00> : vector<16xf32>
    %262 = vector.multi_reduction <add>, %261, %cst_89 [1] : vector<16x32xf32> to vector<16xf32>
    %263 = vector.shape_cast %262 : vector<16xf32> to vector<16x1xf32>
    %cst_90 = arith.constant 3.200000e+01 : f32
    %264 = vector.broadcast %cst_90 : f32 to vector<16x1xf32>
    %265 = arith.divf %263, %264 : vector<16x1xf32>
    %266 = arith.mulf %260, %260 : vector<16x1xf32>
    %267 = arith.subf %265, %266 : vector<16x1xf32>
    %268 = vector.broadcast %260 : vector<16x1xf32> to vector<16x32xf32>
    %269 = arith.subf %252, %268 : vector<16x32xf32>
    %cst_91 = arith.constant 9.99999974E-6 : f32
    %270 = vector.broadcast %cst_91 : f32 to vector<16x1xf32>
    %271 = arith.addf %267, %270 : vector<16x1xf32>
    %272 = math.rsqrt %271 : vector<16x1xf32>
    %273 = vector.broadcast %272 : vector<16x1xf32> to vector<16x32xf32>
    %274 = arith.mulf %269, %273 : vector<16x32xf32>
    %275 = vector.broadcast %254 : vector<1x32xf32> to vector<16x32xf32>
    %276 = arith.mulf %274, %275 : vector<16x32xf32>
    %277 = vector.broadcast %256 : vector<1x32xf32> to vector<16x32xf32>
    %278 = arith.addf %276, %277 : vector<16x32xf32>
    %279 = arith.truncf %278 : vector<16x32xf32> to vector<16x32xbf16>
    %c0_92 = arith.constant 0 : index
    %c0_93 = arith.constant 0 : index
    %c0_94 = arith.constant 0 : index
    %280 = vector.load %arg13[%c0_92, %c0_93, %c0_94] : memref<2x32x128xbf16, #tpu.memory_space<vmem>>, vector<1x32x128xbf16>
    %281 = vector.shape_cast %280 : vector<1x32x128xbf16> to vector<32x128xbf16>
    %cst_95 = arith.constant dense<0.000000e+00> : vector<16x128xf32>
    %282 = tpu.matmul %279, %281, %cst_95 {dimension_numbers = #tpu.dot_dimension_numbers<[1], [0], [0], [1], [0, 0, 1, 1], [], []>} : vector<16x32xbf16>, vector<32x128xbf16>, vector<16x128xf32> -> vector<16x128xf32>
    %c0_96 = arith.constant 0 : index
    %c0_97 = arith.constant 0 : index
    %c0_98 = arith.constant 0 : index
    %283 = vector.load %arg14[%c0_96, %c0_97, %c0_98] : memref<2x1x128xf32, #tpu.memory_space<vmem>>, vector<1x1x128xf32>
    %284 = vector.shape_cast %283 : vector<1x1x128xf32> to vector<1x128xf32>
    %285 = vector.broadcast %284 : vector<1x128xf32> to vector<16x128xf32>
    %286 = arith.addf %282, %285 : vector<16x128xf32>
    %c0_99 = arith.constant 0 : index
    %c0_100 = arith.constant 0 : index
    %c0_101 = arith.constant 0 : index
    %287 = vector.load %arg15[%c0_99, %c0_100, %c0_101] : memref<2x32x128xbf16, #tpu.memory_space<vmem>>, vector<1x32x128xbf16>
    %288 = vector.shape_cast %287 : vector<1x32x128xbf16> to vector<32x128xbf16>
    %cst_102 = arith.constant dense<0.000000e+00> : vector<16x128xf32>
    %289 = tpu.matmul %279, %288, %cst_102 {dimension_numbers = #tpu.dot_dimension_numbers<[1], [0], [0], [1], [0, 0, 1, 1], [], []>} : vector<16x32xbf16>, vector<32x128xbf16>, vector<16x128xf32> -> vector<16x128xf32>
    %c0_103 = arith.constant 0 : index
    %c0_104 = arith.constant 0 : index
    %c0_105 = arith.constant 0 : index
    %290 = vector.load %arg16[%c0_103, %c0_104, %c0_105] : memref<2x1x128xf32, #tpu.memory_space<vmem>>, vector<1x1x128xf32>
    %291 = vector.shape_cast %290 : vector<1x1x128xf32> to vector<1x128xf32>
    %292 = vector.broadcast %291 : vector<1x128xf32> to vector<16x128xf32>
    %293 = arith.addf %289, %292 : vector<16x128xf32>
    %294 = arith.negf %293 : vector<16x128xf32>
    %295 = math.exp %294 : vector<16x128xf32>
    %cst_106 = arith.constant 1.000000e+00 : f32
    %296 = vector.broadcast %cst_106 : f32 to vector<16x128xf32>
    %297 = arith.addf %296, %295 : vector<16x128xf32>
    %298 = arith.divf %296, %297 : vector<16x128xf32>
    %299 = arith.mulf %293, %298 : vector<16x128xf32>
    %300 = arith.mulf %286, %299 : vector<16x128xf32>
    %c0_107 = arith.constant 0 : index
    %c0_108 = arith.constant 0 : index
    %c0_109 = arith.constant 0 : index
    %301 = vector.load %arg17[%c0_107, %c0_108, %c0_109] : memref<2x128x32xbf16, #tpu.memory_space<vmem>>, vector<1x128x32xbf16>
    %302 = vector.shape_cast %301 : vector<1x128x32xbf16> to vector<128x32xbf16>
    %303 = arith.truncf %300 : vector<16x128xf32> to vector<16x128xbf16>
    %cst_110 = arith.constant dense<0.000000e+00> : vector<16x32xf32>
    %304 = tpu.matmul %303, %302, %cst_110 {dimension_numbers = #tpu.dot_dimension_numbers<[1], [0], [0], [1], [0, 0, 1, 1], [], []>} : vector<16x128xbf16>, vector<128x32xbf16>, vector<16x32xf32> -> vector<16x32xf32>
    %c0_111 = arith.constant 0 : index
    %c0_112 = arith.constant 0 : index
    %c0_113 = arith.constant 0 : index
    %305 = vector.load %arg18[%c0_111, %c0_112, %c0_113] : memref<2x1x32xf32, #tpu.memory_space<vmem>>, vector<1x1x32xf32>
    %306 = vector.shape_cast %305 : vector<1x1x32xf32> to vector<1x32xf32>
    %307 = vector.broadcast %306 : vector<1x32xf32> to vector<16x32xf32>
    %308 = arith.addf %304, %307 : vector<16x32xf32>
    %309 = arith.addf %252, %308 : vector<16x32xf32>
    %c1 = arith.constant 1 : index
    %c0_114 = arith.constant 0 : index
    %c0_115 = arith.constant 0 : index
    %310 = vector.load %arg1[%c1, %c0_114, %c0_115] : memref<2x1x32xf32, #tpu.memory_space<vmem>>, vector<1x1x32xf32>
    %311 = vector.shape_cast %310 : vector<1x1x32xf32> to vector<1x32xf32>
    %c1_116 = arith.constant 1 : index
    %c0_117 = arith.constant 0 : index
    %c0_118 = arith.constant 0 : index
    %312 = vector.load %arg2[%c1_116, %c0_117, %c0_118] : memref<2x1x32xf32, #tpu.memory_space<vmem>>, vector<1x1x32xf32>
    %313 = vector.shape_cast %312 : vector<1x1x32xf32> to vector<1x32xf32>
    %cst_119 = arith.constant dense<0.000000e+00> : vector<16xf32>
    %314 = vector.multi_reduction <add>, %309, %cst_119 [1] : vector<16x32xf32> to vector<16xf32>
    %315 = vector.shape_cast %314 : vector<16xf32> to vector<16x1xf32>
    %cst_120 = arith.constant 3.200000e+01 : f32
    %316 = vector.broadcast %cst_120 : f32 to vector<16x1xf32>
    %317 = arith.divf %315, %316 : vector<16x1xf32>
    %318 = arith.mulf %309, %309 : vector<16x32xf32>
    %cst_121 = arith.constant dense<0.000000e+00> : vector<16xf32>
    %319 = vector.multi_reduction <add>, %318, %cst_121 [1] : vector<16x32xf32> to vector<16xf32>
    %320 = vector.shape_cast %319 : vector<16xf32> to vector<16x1xf32>
    %cst_122 = arith.constant 3.200000e+01 : f32
    %321 = vector.broadcast %cst_122 : f32 to vector<16x1xf32>
    %322 = arith.divf %320, %321 : vector<16x1xf32>
    %323 = arith.mulf %317, %317 : vector<16x1xf32>
    %324 = arith.subf %322, %323 : vector<16x1xf32>
    %325 = vector.broadcast %317 : vector<16x1xf32> to vector<16x32xf32>
    %326 = arith.subf %309, %325 : vector<16x32xf32>
    %cst_123 = arith.constant 9.99999974E-6 : f32
    %327 = vector.broadcast %cst_123 : f32 to vector<16x1xf32>
    %328 = arith.addf %324, %327 : vector<16x1xf32>
    %329 = math.rsqrt %328 : vector<16x1xf32>
    %330 = vector.broadcast %329 : vector<16x1xf32> to vector<16x32xf32>
    %331 = arith.mulf %326, %330 : vector<16x32xf32>
    %332 = vector.broadcast %311 : vector<1x32xf32> to vector<16x32xf32>
    %333 = arith.mulf %331, %332 : vector<16x32xf32>
    %334 = vector.broadcast %313 : vector<1x32xf32> to vector<16x32xf32>
    %335 = arith.addf %333, %334 : vector<16x32xf32>
    %336 = arith.truncf %335 : vector<16x32xf32> to vector<16x32xbf16>
    %c1_124 = arith.constant 1 : index
    %c0_125 = arith.constant 0 : index
    %c0_126 = arith.constant 0 : index
    %337 = vector.load %arg3[%c1_124, %c0_125, %c0_126] : memref<2x32x32xbf16, #tpu.memory_space<vmem>>, vector<1x32x32xbf16>
    %338 = vector.shape_cast %337 : vector<1x32x32xbf16> to vector<32x32xbf16>
    %cst_127 = arith.constant dense<0.000000e+00> : vector<16x32xf32>
    %339 = tpu.matmul %336, %338, %cst_127 {dimension_numbers = #tpu.dot_dimension_numbers<[1], [0], [0], [1], [0, 0, 1, 1], [], []>} : vector<16x32xbf16>, vector<32x32xbf16>, vector<16x32xf32> -> vector<16x32xf32>
    %c1_128 = arith.constant 1 : index
    %c0_129 = arith.constant 0 : index
    %c0_130 = arith.constant 0 : index
    %340 = vector.load %arg4[%c1_128, %c0_129, %c0_130] : memref<2x1x32xf32, #tpu.memory_space<vmem>>, vector<1x1x32xf32>
    %341 = vector.shape_cast %340 : vector<1x1x32xf32> to vector<1x32xf32>
    %342 = vector.broadcast %341 : vector<1x32xf32> to vector<16x32xf32>
    %343 = arith.addf %339, %342 : vector<16x32xf32>
    %cst_131 = arith.constant 0.353553385 : f32
    %344 = vector.broadcast %cst_131 : f32 to vector<16x32xf32>
    %345 = arith.mulf %343, %344 : vector<16x32xf32>
    %c1_132 = arith.constant 1 : index
    %c0_133 = arith.constant 0 : index
    %c0_134 = arith.constant 0 : index
    %346 = vector.load %arg5[%c1_132, %c0_133, %c0_134] : memref<2x32x32xbf16, #tpu.memory_space<vmem>>, vector<1x32x32xbf16>
    %347 = vector.shape_cast %346 : vector<1x32x32xbf16> to vector<32x32xbf16>
    %cst_135 = arith.constant dense<0.000000e+00> : vector<16x32xf32>
    %348 = tpu.matmul %336, %347, %cst_135 {dimension_numbers = #tpu.dot_dimension_numbers<[1], [0], [0], [1], [0, 0, 1, 1], [], []>} : vector<16x32xbf16>, vector<32x32xbf16>, vector<16x32xf32> -> vector<16x32xf32>
    %c1_136 = arith.constant 1 : index
    %c0_137 = arith.constant 0 : index
    %c0_138 = arith.constant 0 : index
    %349 = vector.load %arg6[%c1_136, %c0_137, %c0_138] : memref<2x1x32xf32, #tpu.memory_space<vmem>>, vector<1x1x32xf32>
    %350 = vector.shape_cast %349 : vector<1x1x32xf32> to vector<1x32xf32>
    %351 = vector.broadcast %350 : vector<1x32xf32> to vector<16x32xf32>
    %352 = arith.addf %348, %351 : vector<16x32xf32>
    %c1_139 = arith.constant 1 : index
    %c0_140 = arith.constant 0 : index
    %c0_141 = arith.constant 0 : index
    %353 = vector.load %arg7[%c1_139, %c0_140, %c0_141] : memref<2x32x32xbf16, #tpu.memory_space<vmem>>, vector<1x32x32xbf16>
    %354 = vector.shape_cast %353 : vector<1x32x32xbf16> to vector<32x32xbf16>
    %cst_142 = arith.constant dense<0.000000e+00> : vector<16x32xf32>
    %355 = tpu.matmul %336, %354, %cst_142 {dimension_numbers = #tpu.dot_dimension_numbers<[1], [0], [0], [1], [0, 0, 1, 1], [], []>} : vector<16x32xbf16>, vector<32x32xbf16>, vector<16x32xf32> -> vector<16x32xf32>
    %c1_143 = arith.constant 1 : index
    %c0_144 = arith.constant 0 : index
    %c0_145 = arith.constant 0 : index
    %356 = vector.load %arg8[%c1_143, %c0_144, %c0_145] : memref<2x1x32xf32, #tpu.memory_space<vmem>>, vector<1x1x32xf32>
    %357 = vector.shape_cast %356 : vector<1x1x32xf32> to vector<1x32xf32>
    %358 = vector.broadcast %357 : vector<1x32xf32> to vector<16x32xf32>
    %359 = arith.addf %355, %358 : vector<16x32xf32>
    %c1_146 = arith.constant 1 : index
    %c0_147 = arith.constant 0 : index
    %c0_148 = arith.constant 0 : index
    %360 = vector.load %arg9[%c1_146, %c0_147, %c0_148] : memref<2x32x32xf32, #tpu.memory_space<vmem>>, vector<1x32x32xf32>
    %361 = vector.shape_cast %360 : vector<1x32x32xf32> to vector<32x32xf32>
    %cst_149 = arith.constant 0.000000e+00 : f32
    %362 = vector.broadcast %cst_149 : f32 to vector<8x32xf32>
    %363 = vector.extract_strided_slice %345 {offsets = [0, 0], sizes = [8, 8], strides = [1, 1]} : vector<16x32xf32> to vector<8x8xf32>
    %364 = vector.extract_strided_slice %352 {offsets = [0, 0], sizes = [8, 8], strides = [1, 1]} : vector<16x32xf32> to vector<8x8xf32>
    %365 = vector.extract_strided_slice %359 {offsets = [0, 0], sizes = [8, 8], strides = [1, 1]} : vector<16x32xf32> to vector<8x8xf32>
    %366 = arith.truncf %363 : vector<8x8xf32> to vector<8x8xbf16>
    %367 = arith.truncf %364 : vector<8x8xf32> to vector<8x8xbf16>
    %cst_150 = arith.constant dense<0.000000e+00> : vector<8x8xf32>
    %368 = tpu.matmul %366, %367, %cst_150 {dimension_numbers = #tpu.dot_dimension_numbers<[1], [1], [0], [0], [0, 0, 1, 0], [], []>} : vector<8x8xbf16>, vector<8x8xbf16>, vector<8x8xf32> -> vector<8x8xf32>
    %cst_151 = arith.constant dense<0xFF800000> : vector<8xf32>
    %369 = vector.multi_reduction <maximumf>, %368, %cst_151 [1] : vector<8x8xf32> to vector<8xf32>
    %370 = vector.shape_cast %369 : vector<8xf32> to vector<8x1xf32>
    %371 = vector.broadcast %370 : vector<8x1xf32> to vector<8x8xf32>
    %372 = arith.subf %368, %371 : vector<8x8xf32>
    %373 = math.exp %372 : vector<8x8xf32>
    %cst_152 = arith.constant dense<0.000000e+00> : vector<8xf32>
    %374 = vector.multi_reduction <add>, %373, %cst_152 [1] : vector<8x8xf32> to vector<8xf32>
    %375 = vector.shape_cast %374 : vector<8xf32> to vector<8x1xf32>
    %376 = tpu.reciprocal %375 {approx = true} : vector<8x1xf32> -> vector<8x1xf32>
    %377 = vector.broadcast %376 : vector<8x1xf32> to vector<8x8xf32>
    %378 = arith.mulf %373, %377 : vector<8x8xf32>
    %379 = arith.truncf %378 : vector<8x8xf32> to vector<8x8xbf16>
    %380 = arith.truncf %365 : vector<8x8xf32> to vector<8x8xbf16>
    %cst_153 = arith.constant dense<0.000000e+00> : vector<8x8xf32>
    %381 = tpu.matmul %379, %380, %cst_153 {dimension_numbers = #tpu.dot_dimension_numbers<[1], [0], [0], [1], [0, 0, 1, 1], [], []>} : vector<8x8xbf16>, vector<8x8xbf16>, vector<8x8xf32> -> vector<8x8xf32>
    %382 = vector.extract_strided_slice %361 {offsets = [0, 0], sizes = [8, 32], strides = [1, 1]} : vector<32x32xf32> to vector<8x32xf32>
    %383 = arith.truncf %381 : vector<8x8xf32> to vector<8x8xbf16>
    %384 = arith.truncf %382 : vector<8x32xf32> to vector<8x32xbf16>
    %cst_154 = arith.constant dense<0.000000e+00> : vector<8x32xf32>
    %385 = tpu.matmul %383, %384, %cst_154 {dimension_numbers = #tpu.dot_dimension_numbers<[1], [0], [0], [1], [0, 0, 1, 1], [], []>} : vector<8x8xbf16>, vector<8x32xbf16>, vector<8x32xf32> -> vector<8x32xf32>
    %386 = arith.addf %362, %385 : vector<8x32xf32>
    %387 = vector.extract_strided_slice %345 {offsets = [0, 8], sizes = [8, 8], strides = [1, 1]} : vector<16x32xf32> to vector<8x8xf32>
    %388 = vector.extract_strided_slice %352 {offsets = [0, 8], sizes = [8, 8], strides = [1, 1]} : vector<16x32xf32> to vector<8x8xf32>
    %389 = vector.extract_strided_slice %359 {offsets = [0, 8], sizes = [8, 8], strides = [1, 1]} : vector<16x32xf32> to vector<8x8xf32>
    %390 = arith.truncf %387 : vector<8x8xf32> to vector<8x8xbf16>
    %391 = arith.truncf %388 : vector<8x8xf32> to vector<8x8xbf16>
    %cst_155 = arith.constant dense<0.000000e+00> : vector<8x8xf32>
    %392 = tpu.matmul %390, %391, %cst_155 {dimension_numbers = #tpu.dot_dimension_numbers<[1], [1], [0], [0], [0, 0, 1, 0], [], []>} : vector<8x8xbf16>, vector<8x8xbf16>, vector<8x8xf32> -> vector<8x8xf32>
    %cst_156 = arith.constant dense<0xFF800000> : vector<8xf32>
    %393 = vector.multi_reduction <maximumf>, %392, %cst_156 [1] : vector<8x8xf32> to vector<8xf32>
    %394 = vector.shape_cast %393 : vector<8xf32> to vector<8x1xf32>
    %395 = vector.broadcast %394 : vector<8x1xf32> to vector<8x8xf32>
    %396 = arith.subf %392, %395 : vector<8x8xf32>
    %397 = math.exp %396 : vector<8x8xf32>
    %cst_157 = arith.constant dense<0.000000e+00> : vector<8xf32>
    %398 = vector.multi_reduction <add>, %397, %cst_157 [1] : vector<8x8xf32> to vector<8xf32>
    %399 = vector.shape_cast %398 : vector<8xf32> to vector<8x1xf32>
    %400 = tpu.reciprocal %399 {approx = true} : vector<8x1xf32> -> vector<8x1xf32>
    %401 = vector.broadcast %400 : vector<8x1xf32> to vector<8x8xf32>
    %402 = arith.mulf %397, %401 : vector<8x8xf32>
    %403 = arith.truncf %402 : vector<8x8xf32> to vector<8x8xbf16>
    %404 = arith.truncf %389 : vector<8x8xf32> to vector<8x8xbf16>
    %cst_158 = arith.constant dense<0.000000e+00> : vector<8x8xf32>
    %405 = tpu.matmul %403, %404, %cst_158 {dimension_numbers = #tpu.dot_dimension_numbers<[1], [0], [0], [1], [0, 0, 1, 1], [], []>} : vector<8x8xbf16>, vector<8x8xbf16>, vector<8x8xf32> -> vector<8x8xf32>
    %406 = vector.extract_strided_slice %361 {offsets = [8, 0], sizes = [8, 32], strides = [1, 1]} : vector<32x32xf32> to vector<8x32xf32>
    %407 = arith.truncf %405 : vector<8x8xf32> to vector<8x8xbf16>
    %408 = arith.truncf %406 : vector<8x32xf32> to vector<8x32xbf16>
    %cst_159 = arith.constant dense<0.000000e+00> : vector<8x32xf32>
    %409 = tpu.matmul %407, %408, %cst_159 {dimension_numbers = #tpu.dot_dimension_numbers<[1], [0], [0], [1], [0, 0, 1, 1], [], []>} : vector<8x8xbf16>, vector<8x32xbf16>, vector<8x32xf32> -> vector<8x32xf32>
    %410 = arith.addf %386, %409 : vector<8x32xf32>
    %411 = vector.extract_strided_slice %345 {offsets = [0, 16], sizes = [8, 8], strides = [1, 1]} : vector<16x32xf32> to vector<8x8xf32>
    %412 = vector.extract_strided_slice %352 {offsets = [0, 16], sizes = [8, 8], strides = [1, 1]} : vector<16x32xf32> to vector<8x8xf32>
    %413 = vector.extract_strided_slice %359 {offsets = [0, 16], sizes = [8, 8], strides = [1, 1]} : vector<16x32xf32> to vector<8x8xf32>
    %414 = arith.truncf %411 : vector<8x8xf32> to vector<8x8xbf16>
    %415 = arith.truncf %412 : vector<8x8xf32> to vector<8x8xbf16>
    %cst_160 = arith.constant dense<0.000000e+00> : vector<8x8xf32>
    %416 = tpu.matmul %414, %415, %cst_160 {dimension_numbers = #tpu.dot_dimension_numbers<[1], [1], [0], [0], [0, 0, 1, 0], [], []>} : vector<8x8xbf16>, vector<8x8xbf16>, vector<8x8xf32> -> vector<8x8xf32>
    %cst_161 = arith.constant dense<0xFF800000> : vector<8xf32>
    %417 = vector.multi_reduction <maximumf>, %416, %cst_161 [1] : vector<8x8xf32> to vector<8xf32>
    %418 = vector.shape_cast %417 : vector<8xf32> to vector<8x1xf32>
    %419 = vector.broadcast %418 : vector<8x1xf32> to vector<8x8xf32>
    %420 = arith.subf %416, %419 : vector<8x8xf32>
    %421 = math.exp %420 : vector<8x8xf32>
    %cst_162 = arith.constant dense<0.000000e+00> : vector<8xf32>
    %422 = vector.multi_reduction <add>, %421, %cst_162 [1] : vector<8x8xf32> to vector<8xf32>
    %423 = vector.shape_cast %422 : vector<8xf32> to vector<8x1xf32>
    %424 = tpu.reciprocal %423 {approx = true} : vector<8x1xf32> -> vector<8x1xf32>
    %425 = vector.broadcast %424 : vector<8x1xf32> to vector<8x8xf32>
    %426 = arith.mulf %421, %425 : vector<8x8xf32>
    %427 = arith.truncf %426 : vector<8x8xf32> to vector<8x8xbf16>
    %428 = arith.truncf %413 : vector<8x8xf32> to vector<8x8xbf16>
    %cst_163 = arith.constant dense<0.000000e+00> : vector<8x8xf32>
    %429 = tpu.matmul %427, %428, %cst_163 {dimension_numbers = #tpu.dot_dimension_numbers<[1], [0], [0], [1], [0, 0, 1, 1], [], []>} : vector<8x8xbf16>, vector<8x8xbf16>, vector<8x8xf32> -> vector<8x8xf32>
    %430 = vector.extract_strided_slice %361 {offsets = [16, 0], sizes = [8, 32], strides = [1, 1]} : vector<32x32xf32> to vector<8x32xf32>
    %431 = arith.truncf %429 : vector<8x8xf32> to vector<8x8xbf16>
    %432 = arith.truncf %430 : vector<8x32xf32> to vector<8x32xbf16>
    %cst_164 = arith.constant dense<0.000000e+00> : vector<8x32xf32>
    %433 = tpu.matmul %431, %432, %cst_164 {dimension_numbers = #tpu.dot_dimension_numbers<[1], [0], [0], [1], [0, 0, 1, 1], [], []>} : vector<8x8xbf16>, vector<8x32xbf16>, vector<8x32xf32> -> vector<8x32xf32>
    %434 = arith.addf %410, %433 : vector<8x32xf32>
    %435 = vector.extract_strided_slice %345 {offsets = [0, 24], sizes = [8, 8], strides = [1, 1]} : vector<16x32xf32> to vector<8x8xf32>
    %436 = vector.extract_strided_slice %352 {offsets = [0, 24], sizes = [8, 8], strides = [1, 1]} : vector<16x32xf32> to vector<8x8xf32>
    %437 = vector.extract_strided_slice %359 {offsets = [0, 24], sizes = [8, 8], strides = [1, 1]} : vector<16x32xf32> to vector<8x8xf32>
    %438 = arith.truncf %435 : vector<8x8xf32> to vector<8x8xbf16>
    %439 = arith.truncf %436 : vector<8x8xf32> to vector<8x8xbf16>
    %cst_165 = arith.constant dense<0.000000e+00> : vector<8x8xf32>
    %440 = tpu.matmul %438, %439, %cst_165 {dimension_numbers = #tpu.dot_dimension_numbers<[1], [1], [0], [0], [0, 0, 1, 0], [], []>} : vector<8x8xbf16>, vector<8x8xbf16>, vector<8x8xf32> -> vector<8x8xf32>
    %cst_166 = arith.constant dense<0xFF800000> : vector<8xf32>
    %441 = vector.multi_reduction <maximumf>, %440, %cst_166 [1] : vector<8x8xf32> to vector<8xf32>
    %442 = vector.shape_cast %441 : vector<8xf32> to vector<8x1xf32>
    %443 = vector.broadcast %442 : vector<8x1xf32> to vector<8x8xf32>
    %444 = arith.subf %440, %443 : vector<8x8xf32>
    %445 = math.exp %444 : vector<8x8xf32>
    %cst_167 = arith.constant dense<0.000000e+00> : vector<8xf32>
    %446 = vector.multi_reduction <add>, %445, %cst_167 [1] : vector<8x8xf32> to vector<8xf32>
    %447 = vector.shape_cast %446 : vector<8xf32> to vector<8x1xf32>
    %448 = tpu.reciprocal %447 {approx = true} : vector<8x1xf32> -> vector<8x1xf32>
    %449 = vector.broadcast %448 : vector<8x1xf32> to vector<8x8xf32>
    %450 = arith.mulf %445, %449 : vector<8x8xf32>
    %451 = arith.truncf %450 : vector<8x8xf32> to vector<8x8xbf16>
    %452 = arith.truncf %437 : vector<8x8xf32> to vector<8x8xbf16>
    %cst_168 = arith.constant dense<0.000000e+00> : vector<8x8xf32>
    %453 = tpu.matmul %451, %452, %cst_168 {dimension_numbers = #tpu.dot_dimension_numbers<[1], [0], [0], [1], [0, 0, 1, 1], [], []>} : vector<8x8xbf16>, vector<8x8xbf16>, vector<8x8xf32> -> vector<8x8xf32>
    %454 = vector.extract_strided_slice %361 {offsets = [24, 0], sizes = [8, 32], strides = [1, 1]} : vector<32x32xf32> to vector<8x32xf32>
    %455 = arith.truncf %453 : vector<8x8xf32> to vector<8x8xbf16>
    %456 = arith.truncf %454 : vector<8x32xf32> to vector<8x32xbf16>
    %cst_169 = arith.constant dense<0.000000e+00> : vector<8x32xf32>
    %457 = tpu.matmul %455, %456, %cst_169 {dimension_numbers = #tpu.dot_dimension_numbers<[1], [0], [0], [1], [0, 0, 1, 1], [], []>} : vector<8x8xbf16>, vector<8x32xbf16>, vector<8x32xf32> -> vector<8x32xf32>
    %458 = arith.addf %434, %457 : vector<8x32xf32>
    %cst_170 = arith.constant 0.000000e+00 : f32
    %459 = vector.broadcast %cst_170 : f32 to vector<8x32xf32>
    %460 = vector.extract_strided_slice %345 {offsets = [8, 0], sizes = [8, 8], strides = [1, 1]} : vector<16x32xf32> to vector<8x8xf32>
    %461 = vector.extract_strided_slice %352 {offsets = [8, 0], sizes = [8, 8], strides = [1, 1]} : vector<16x32xf32> to vector<8x8xf32>
    %462 = vector.extract_strided_slice %359 {offsets = [8, 0], sizes = [8, 8], strides = [1, 1]} : vector<16x32xf32> to vector<8x8xf32>
    %463 = arith.truncf %460 : vector<8x8xf32> to vector<8x8xbf16>
    %464 = arith.truncf %461 : vector<8x8xf32> to vector<8x8xbf16>
    %cst_171 = arith.constant dense<0.000000e+00> : vector<8x8xf32>
    %465 = tpu.matmul %463, %464, %cst_171 {dimension_numbers = #tpu.dot_dimension_numbers<[1], [1], [0], [0], [0, 0, 1, 0], [], []>} : vector<8x8xbf16>, vector<8x8xbf16>, vector<8x8xf32> -> vector<8x8xf32>
    %cst_172 = arith.constant dense<0xFF800000> : vector<8xf32>
    %466 = vector.multi_reduction <maximumf>, %465, %cst_172 [1] : vector<8x8xf32> to vector<8xf32>
    %467 = vector.shape_cast %466 : vector<8xf32> to vector<8x1xf32>
    %468 = vector.broadcast %467 : vector<8x1xf32> to vector<8x8xf32>
    %469 = arith.subf %465, %468 : vector<8x8xf32>
    %470 = math.exp %469 : vector<8x8xf32>
    %cst_173 = arith.constant dense<0.000000e+00> : vector<8xf32>
    %471 = vector.multi_reduction <add>, %470, %cst_173 [1] : vector<8x8xf32> to vector<8xf32>
    %472 = vector.shape_cast %471 : vector<8xf32> to vector<8x1xf32>
    %473 = tpu.reciprocal %472 {approx = true} : vector<8x1xf32> -> vector<8x1xf32>
    %474 = vector.broadcast %473 : vector<8x1xf32> to vector<8x8xf32>
    %475 = arith.mulf %470, %474 : vector<8x8xf32>
    %476 = arith.truncf %475 : vector<8x8xf32> to vector<8x8xbf16>
    %477 = arith.truncf %462 : vector<8x8xf32> to vector<8x8xbf16>
    %cst_174 = arith.constant dense<0.000000e+00> : vector<8x8xf32>
    %478 = tpu.matmul %476, %477, %cst_174 {dimension_numbers = #tpu.dot_dimension_numbers<[1], [0], [0], [1], [0, 0, 1, 1], [], []>} : vector<8x8xbf16>, vector<8x8xbf16>, vector<8x8xf32> -> vector<8x8xf32>
    %479 = vector.extract_strided_slice %361 {offsets = [0, 0], sizes = [8, 32], strides = [1, 1]} : vector<32x32xf32> to vector<8x32xf32>
    %480 = arith.truncf %478 : vector<8x8xf32> to vector<8x8xbf16>
    %481 = arith.truncf %479 : vector<8x32xf32> to vector<8x32xbf16>
    %cst_175 = arith.constant dense<0.000000e+00> : vector<8x32xf32>
    %482 = tpu.matmul %480, %481, %cst_175 {dimension_numbers = #tpu.dot_dimension_numbers<[1], [0], [0], [1], [0, 0, 1, 1], [], []>} : vector<8x8xbf16>, vector<8x32xbf16>, vector<8x32xf32> -> vector<8x32xf32>
    %483 = arith.addf %459, %482 : vector<8x32xf32>
    %484 = vector.extract_strided_slice %345 {offsets = [8, 8], sizes = [8, 8], strides = [1, 1]} : vector<16x32xf32> to vector<8x8xf32>
    %485 = vector.extract_strided_slice %352 {offsets = [8, 8], sizes = [8, 8], strides = [1, 1]} : vector<16x32xf32> to vector<8x8xf32>
    %486 = vector.extract_strided_slice %359 {offsets = [8, 8], sizes = [8, 8], strides = [1, 1]} : vector<16x32xf32> to vector<8x8xf32>
    %487 = arith.truncf %484 : vector<8x8xf32> to vector<8x8xbf16>
    %488 = arith.truncf %485 : vector<8x8xf32> to vector<8x8xbf16>
    %cst_176 = arith.constant dense<0.000000e+00> : vector<8x8xf32>
    %489 = tpu.matmul %487, %488, %cst_176 {dimension_numbers = #tpu.dot_dimension_numbers<[1], [1], [0], [0], [0, 0, 1, 0], [], []>} : vector<8x8xbf16>, vector<8x8xbf16>, vector<8x8xf32> -> vector<8x8xf32>
    %cst_177 = arith.constant dense<0xFF800000> : vector<8xf32>
    %490 = vector.multi_reduction <maximumf>, %489, %cst_177 [1] : vector<8x8xf32> to vector<8xf32>
    %491 = vector.shape_cast %490 : vector<8xf32> to vector<8x1xf32>
    %492 = vector.broadcast %491 : vector<8x1xf32> to vector<8x8xf32>
    %493 = arith.subf %489, %492 : vector<8x8xf32>
    %494 = math.exp %493 : vector<8x8xf32>
    %cst_178 = arith.constant dense<0.000000e+00> : vector<8xf32>
    %495 = vector.multi_reduction <add>, %494, %cst_178 [1] : vector<8x8xf32> to vector<8xf32>
    %496 = vector.shape_cast %495 : vector<8xf32> to vector<8x1xf32>
    %497 = tpu.reciprocal %496 {approx = true} : vector<8x1xf32> -> vector<8x1xf32>
    %498 = vector.broadcast %497 : vector<8x1xf32> to vector<8x8xf32>
    %499 = arith.mulf %494, %498 : vector<8x8xf32>
    %500 = arith.truncf %499 : vector<8x8xf32> to vector<8x8xbf16>
    %501 = arith.truncf %486 : vector<8x8xf32> to vector<8x8xbf16>
    %cst_179 = arith.constant dense<0.000000e+00> : vector<8x8xf32>
    %502 = tpu.matmul %500, %501, %cst_179 {dimension_numbers = #tpu.dot_dimension_numbers<[1], [0], [0], [1], [0, 0, 1, 1], [], []>} : vector<8x8xbf16>, vector<8x8xbf16>, vector<8x8xf32> -> vector<8x8xf32>
    %503 = vector.extract_strided_slice %361 {offsets = [8, 0], sizes = [8, 32], strides = [1, 1]} : vector<32x32xf32> to vector<8x32xf32>
    %504 = arith.truncf %502 : vector<8x8xf32> to vector<8x8xbf16>
    %505 = arith.truncf %503 : vector<8x32xf32> to vector<8x32xbf16>
    %cst_180 = arith.constant dense<0.000000e+00> : vector<8x32xf32>
    %506 = tpu.matmul %504, %505, %cst_180 {dimension_numbers = #tpu.dot_dimension_numbers<[1], [0], [0], [1], [0, 0, 1, 1], [], []>} : vector<8x8xbf16>, vector<8x32xbf16>, vector<8x32xf32> -> vector<8x32xf32>
    %507 = arith.addf %483, %506 : vector<8x32xf32>
    %508 = vector.extract_strided_slice %345 {offsets = [8, 16], sizes = [8, 8], strides = [1, 1]} : vector<16x32xf32> to vector<8x8xf32>
    %509 = vector.extract_strided_slice %352 {offsets = [8, 16], sizes = [8, 8], strides = [1, 1]} : vector<16x32xf32> to vector<8x8xf32>
    %510 = vector.extract_strided_slice %359 {offsets = [8, 16], sizes = [8, 8], strides = [1, 1]} : vector<16x32xf32> to vector<8x8xf32>
    %511 = arith.truncf %508 : vector<8x8xf32> to vector<8x8xbf16>
    %512 = arith.truncf %509 : vector<8x8xf32> to vector<8x8xbf16>
    %cst_181 = arith.constant dense<0.000000e+00> : vector<8x8xf32>
    %513 = tpu.matmul %511, %512, %cst_181 {dimension_numbers = #tpu.dot_dimension_numbers<[1], [1], [0], [0], [0, 0, 1, 0], [], []>} : vector<8x8xbf16>, vector<8x8xbf16>, vector<8x8xf32> -> vector<8x8xf32>
    %cst_182 = arith.constant dense<0xFF800000> : vector<8xf32>
    %514 = vector.multi_reduction <maximumf>, %513, %cst_182 [1] : vector<8x8xf32> to vector<8xf32>
    %515 = vector.shape_cast %514 : vector<8xf32> to vector<8x1xf32>
    %516 = vector.broadcast %515 : vector<8x1xf32> to vector<8x8xf32>
    %517 = arith.subf %513, %516 : vector<8x8xf32>
    %518 = math.exp %517 : vector<8x8xf32>
    %cst_183 = arith.constant dense<0.000000e+00> : vector<8xf32>
    %519 = vector.multi_reduction <add>, %518, %cst_183 [1] : vector<8x8xf32> to vector<8xf32>
    %520 = vector.shape_cast %519 : vector<8xf32> to vector<8x1xf32>
    %521 = tpu.reciprocal %520 {approx = true} : vector<8x1xf32> -> vector<8x1xf32>
    %522 = vector.broadcast %521 : vector<8x1xf32> to vector<8x8xf32>
    %523 = arith.mulf %518, %522 : vector<8x8xf32>
    %524 = arith.truncf %523 : vector<8x8xf32> to vector<8x8xbf16>
    %525 = arith.truncf %510 : vector<8x8xf32> to vector<8x8xbf16>
    %cst_184 = arith.constant dense<0.000000e+00> : vector<8x8xf32>
    %526 = tpu.matmul %524, %525, %cst_184 {dimension_numbers = #tpu.dot_dimension_numbers<[1], [0], [0], [1], [0, 0, 1, 1], [], []>} : vector<8x8xbf16>, vector<8x8xbf16>, vector<8x8xf32> -> vector<8x8xf32>
    %527 = vector.extract_strided_slice %361 {offsets = [16, 0], sizes = [8, 32], strides = [1, 1]} : vector<32x32xf32> to vector<8x32xf32>
    %528 = arith.truncf %526 : vector<8x8xf32> to vector<8x8xbf16>
    %529 = arith.truncf %527 : vector<8x32xf32> to vector<8x32xbf16>
    %cst_185 = arith.constant dense<0.000000e+00> : vector<8x32xf32>
    %530 = tpu.matmul %528, %529, %cst_185 {dimension_numbers = #tpu.dot_dimension_numbers<[1], [0], [0], [1], [0, 0, 1, 1], [], []>} : vector<8x8xbf16>, vector<8x32xbf16>, vector<8x32xf32> -> vector<8x32xf32>
    %531 = arith.addf %507, %530 : vector<8x32xf32>
    %532 = vector.extract_strided_slice %345 {offsets = [8, 24], sizes = [8, 8], strides = [1, 1]} : vector<16x32xf32> to vector<8x8xf32>
    %533 = vector.extract_strided_slice %352 {offsets = [8, 24], sizes = [8, 8], strides = [1, 1]} : vector<16x32xf32> to vector<8x8xf32>
    %534 = vector.extract_strided_slice %359 {offsets = [8, 24], sizes = [8, 8], strides = [1, 1]} : vector<16x32xf32> to vector<8x8xf32>
    %535 = arith.truncf %532 : vector<8x8xf32> to vector<8x8xbf16>
    %536 = arith.truncf %533 : vector<8x8xf32> to vector<8x8xbf16>
    %cst_186 = arith.constant dense<0.000000e+00> : vector<8x8xf32>
    %537 = tpu.matmul %535, %536, %cst_186 {dimension_numbers = #tpu.dot_dimension_numbers<[1], [1], [0], [0], [0, 0, 1, 0], [], []>} : vector<8x8xbf16>, vector<8x8xbf16>, vector<8x8xf32> -> vector<8x8xf32>
    %cst_187 = arith.constant dense<0xFF800000> : vector<8xf32>
    %538 = vector.multi_reduction <maximumf>, %537, %cst_187 [1] : vector<8x8xf32> to vector<8xf32>
    %539 = vector.shape_cast %538 : vector<8xf32> to vector<8x1xf32>
    %540 = vector.broadcast %539 : vector<8x1xf32> to vector<8x8xf32>
    %541 = arith.subf %537, %540 : vector<8x8xf32>
    %542 = math.exp %541 : vector<8x8xf32>
    %cst_188 = arith.constant dense<0.000000e+00> : vector<8xf32>
    %543 = vector.multi_reduction <add>, %542, %cst_188 [1] : vector<8x8xf32> to vector<8xf32>
    %544 = vector.shape_cast %543 : vector<8xf32> to vector<8x1xf32>
    %545 = tpu.reciprocal %544 {approx = true} : vector<8x1xf32> -> vector<8x1xf32>
    %546 = vector.broadcast %545 : vector<8x1xf32> to vector<8x8xf32>
    %547 = arith.mulf %542, %546 : vector<8x8xf32>
    %548 = arith.truncf %547 : vector<8x8xf32> to vector<8x8xbf16>
    %549 = arith.truncf %534 : vector<8x8xf32> to vector<8x8xbf16>
    %cst_189 = arith.constant dense<0.000000e+00> : vector<8x8xf32>
    %550 = tpu.matmul %548, %549, %cst_189 {dimension_numbers = #tpu.dot_dimension_numbers<[1], [0], [0], [1], [0, 0, 1, 1], [], []>} : vector<8x8xbf16>, vector<8x8xbf16>, vector<8x8xf32> -> vector<8x8xf32>
    %551 = vector.extract_strided_slice %361 {offsets = [24, 0], sizes = [8, 32], strides = [1, 1]} : vector<32x32xf32> to vector<8x32xf32>
    %552 = arith.truncf %550 : vector<8x8xf32> to vector<8x8xbf16>
    %553 = arith.truncf %551 : vector<8x32xf32> to vector<8x32xbf16>
    %cst_190 = arith.constant dense<0.000000e+00> : vector<8x32xf32>
    %554 = tpu.matmul %552, %553, %cst_190 {dimension_numbers = #tpu.dot_dimension_numbers<[1], [0], [0], [1], [0, 0, 1, 1], [], []>} : vector<8x8xbf16>, vector<8x32xbf16>, vector<8x32xf32> -> vector<8x32xf32>
    %555 = arith.addf %531, %554 : vector<8x32xf32>
    %556 = tpu.concatenate %458, %555 in 0 : vector<8x32xf32>, vector<8x32xf32> -> vector<16x32xf32>
    %c1_191 = arith.constant 1 : index
    %c0_192 = arith.constant 0 : index
    %c0_193 = arith.constant 0 : index
    %557 = vector.load %arg10[%c1_191, %c0_192, %c0_193] : memref<2x1x32xf32, #tpu.memory_space<vmem>>, vector<1x1x32xf32>
    %558 = vector.shape_cast %557 : vector<1x1x32xf32> to vector<1x32xf32>
    %559 = vector.broadcast %558 : vector<1x32xf32> to vector<16x32xf32>
    %560 = arith.addf %556, %559 : vector<16x32xf32>
    %561 = arith.addf %309, %560 : vector<16x32xf32>
    %c1_194 = arith.constant 1 : index
    %c0_195 = arith.constant 0 : index
    %c0_196 = arith.constant 0 : index
    %562 = vector.load %arg11[%c1_194, %c0_195, %c0_196] : memref<2x1x32xf32, #tpu.memory_space<vmem>>, vector<1x1x32xf32>
    %563 = vector.shape_cast %562 : vector<1x1x32xf32> to vector<1x32xf32>
    %c1_197 = arith.constant 1 : index
    %c0_198 = arith.constant 0 : index
    %c0_199 = arith.constant 0 : index
    %564 = vector.load %arg12[%c1_197, %c0_198, %c0_199] : memref<2x1x32xf32, #tpu.memory_space<vmem>>, vector<1x1x32xf32>
    %565 = vector.shape_cast %564 : vector<1x1x32xf32> to vector<1x32xf32>
    %cst_200 = arith.constant dense<0.000000e+00> : vector<16xf32>
    %566 = vector.multi_reduction <add>, %561, %cst_200 [1] : vector<16x32xf32> to vector<16xf32>
    %567 = vector.shape_cast %566 : vector<16xf32> to vector<16x1xf32>
    %cst_201 = arith.constant 3.200000e+01 : f32
    %568 = vector.broadcast %cst_201 : f32 to vector<16x1xf32>
    %569 = arith.divf %567, %568 : vector<16x1xf32>
    %570 = arith.mulf %561, %561 : vector<16x32xf32>
    %cst_202 = arith.constant dense<0.000000e+00> : vector<16xf32>
    %571 = vector.multi_reduction <add>, %570, %cst_202 [1] : vector<16x32xf32> to vector<16xf32>
    %572 = vector.shape_cast %571 : vector<16xf32> to vector<16x1xf32>
    %cst_203 = arith.constant 3.200000e+01 : f32
    %573 = vector.broadcast %cst_203 : f32 to vector<16x1xf32>
    %574 = arith.divf %572, %573 : vector<16x1xf32>
    %575 = arith.mulf %569, %569 : vector<16x1xf32>
    %576 = arith.subf %574, %575 : vector<16x1xf32>
    %577 = vector.broadcast %569 : vector<16x1xf32> to vector<16x32xf32>
    %578 = arith.subf %561, %577 : vector<16x32xf32>
    %cst_204 = arith.constant 9.99999974E-6 : f32
    %579 = vector.broadcast %cst_204 : f32 to vector<16x1xf32>
    %580 = arith.addf %576, %579 : vector<16x1xf32>
    %581 = math.rsqrt %580 : vector<16x1xf32>
    %582 = vector.broadcast %581 : vector<16x1xf32> to vector<16x32xf32>
    %583 = arith.mulf %578, %582 : vector<16x32xf32>
    %584 = vector.broadcast %563 : vector<1x32xf32> to vector<16x32xf32>
    %585 = arith.mulf %583, %584 : vector<16x32xf32>
    %586 = vector.broadcast %565 : vector<1x32xf32> to vector<16x32xf32>
    %587 = arith.addf %585, %586 : vector<16x32xf32>
    %588 = arith.truncf %587 : vector<16x32xf32> to vector<16x32xbf16>
    %c1_205 = arith.constant 1 : index
    %c0_206 = arith.constant 0 : index
    %c0_207 = arith.constant 0 : index
    %589 = vector.load %arg13[%c1_205, %c0_206, %c0_207] : memref<2x32x128xbf16, #tpu.memory_space<vmem>>, vector<1x32x128xbf16>
    %590 = vector.shape_cast %589 : vector<1x32x128xbf16> to vector<32x128xbf16>
    %cst_208 = arith.constant dense<0.000000e+00> : vector<16x128xf32>
    %591 = tpu.matmul %588, %590, %cst_208 {dimension_numbers = #tpu.dot_dimension_numbers<[1], [0], [0], [1], [0, 0, 1, 1], [], []>} : vector<16x32xbf16>, vector<32x128xbf16>, vector<16x128xf32> -> vector<16x128xf32>
    %c1_209 = arith.constant 1 : index
    %c0_210 = arith.constant 0 : index
    %c0_211 = arith.constant 0 : index
    %592 = vector.load %arg14[%c1_209, %c0_210, %c0_211] : memref<2x1x128xf32, #tpu.memory_space<vmem>>, vector<1x1x128xf32>
    %593 = vector.shape_cast %592 : vector<1x1x128xf32> to vector<1x128xf32>
    %594 = vector.broadcast %593 : vector<1x128xf32> to vector<16x128xf32>
    %595 = arith.addf %591, %594 : vector<16x128xf32>
    %c1_212 = arith.constant 1 : index
    %c0_213 = arith.constant 0 : index
    %c0_214 = arith.constant 0 : index
    %596 = vector.load %arg15[%c1_212, %c0_213, %c0_214] : memref<2x32x128xbf16, #tpu.memory_space<vmem>>, vector<1x32x128xbf16>
    %597 = vector.shape_cast %596 : vector<1x32x128xbf16> to vector<32x128xbf16>
    %cst_215 = arith.constant dense<0.000000e+00> : vector<16x128xf32>
    %598 = tpu.matmul %588, %597, %cst_215 {dimension_numbers = #tpu.dot_dimension_numbers<[1], [0], [0], [1], [0, 0, 1, 1], [], []>} : vector<16x32xbf16>, vector<32x128xbf16>, vector<16x128xf32> -> vector<16x128xf32>
    %c1_216 = arith.constant 1 : index
    %c0_217 = arith.constant 0 : index
    %c0_218 = arith.constant 0 : index
    %599 = vector.load %arg16[%c1_216, %c0_217, %c0_218] : memref<2x1x128xf32, #tpu.memory_space<vmem>>, vector<1x1x128xf32>
    %600 = vector.shape_cast %599 : vector<1x1x128xf32> to vector<1x128xf32>
    %601 = vector.broadcast %600 : vector<1x128xf32> to vector<16x128xf32>
    %602 = arith.addf %598, %601 : vector<16x128xf32>
    %603 = arith.negf %602 : vector<16x128xf32>
    %604 = math.exp %603 : vector<16x128xf32>
    %cst_219 = arith.constant 1.000000e+00 : f32
    %605 = vector.broadcast %cst_219 : f32 to vector<16x128xf32>
    %606 = arith.addf %605, %604 : vector<16x128xf32>
    %607 = arith.divf %605, %606 : vector<16x128xf32>
    %608 = arith.mulf %602, %607 : vector<16x128xf32>
    %609 = arith.mulf %595, %608 : vector<16x128xf32>
    %c1_220 = arith.constant 1 : index
    %c0_221 = arith.constant 0 : index
    %c0_222 = arith.constant 0 : index
    %610 = vector.load %arg17[%c1_220, %c0_221, %c0_222] : memref<2x128x32xbf16, #tpu.memory_space<vmem>>, vector<1x128x32xbf16>
    %611 = vector.shape_cast %610 : vector<1x128x32xbf16> to vector<128x32xbf16>
    %612 = arith.truncf %609 : vector<16x128xf32> to vector<16x128xbf16>
    %cst_223 = arith.constant dense<0.000000e+00> : vector<16x32xf32>
    %613 = tpu.matmul %612, %611, %cst_223 {dimension_numbers = #tpu.dot_dimension_numbers<[1], [0], [0], [1], [0, 0, 1, 1], [], []>} : vector<16x128xbf16>, vector<128x32xbf16>, vector<16x32xf32> -> vector<16x32xf32>
    %c1_224 = arith.constant 1 : index
    %c0_225 = arith.constant 0 : index
    %c0_226 = arith.constant 0 : index
    %614 = vector.load %arg18[%c1_224, %c0_225, %c0_226] : memref<2x1x32xf32, #tpu.memory_space<vmem>>, vector<1x1x32xf32>
    %615 = vector.shape_cast %614 : vector<1x1x32xf32> to vector<1x32xf32>
    %616 = vector.broadcast %615 : vector<1x32xf32> to vector<16x32xf32>
    %617 = arith.addf %613, %616 : vector<16x32xf32>
    %618 = arith.addf %561, %617 : vector<16x32xf32>
    %c0_227 = arith.constant 0 : index
    %c0_228 = arith.constant 0 : index
    %619 = vector.load %arg19[%c0_227, %c0_228] : memref<1x32xf32, #tpu.memory_space<vmem>>, vector<1x32xf32>
    %c0_229 = arith.constant 0 : index
    %c0_230 = arith.constant 0 : index
    %620 = vector.load %arg20[%c0_229, %c0_230] : memref<1x32xf32, #tpu.memory_space<vmem>>, vector<1x32xf32>
    %cst_231 = arith.constant dense<0.000000e+00> : vector<16xf32>
    %621 = vector.multi_reduction <add>, %618, %cst_231 [1] : vector<16x32xf32> to vector<16xf32>
    %622 = vector.shape_cast %621 : vector<16xf32> to vector<16x1xf32>
    %cst_232 = arith.constant 3.200000e+01 : f32
    %623 = vector.broadcast %cst_232 : f32 to vector<16x1xf32>
    %624 = arith.divf %622, %623 : vector<16x1xf32>
    %625 = arith.mulf %618, %618 : vector<16x32xf32>
    %cst_233 = arith.constant dense<0.000000e+00> : vector<16xf32>
    %626 = vector.multi_reduction <add>, %625, %cst_233 [1] : vector<16x32xf32> to vector<16xf32>
    %627 = vector.shape_cast %626 : vector<16xf32> to vector<16x1xf32>
    %cst_234 = arith.constant 3.200000e+01 : f32
    %628 = vector.broadcast %cst_234 : f32 to vector<16x1xf32>
    %629 = arith.divf %627, %628 : vector<16x1xf32>
    %630 = arith.mulf %624, %624 : vector<16x1xf32>
    %631 = arith.subf %629, %630 : vector<16x1xf32>
    %632 = vector.broadcast %624 : vector<16x1xf32> to vector<16x32xf32>
    %633 = arith.subf %618, %632 : vector<16x32xf32>
    %cst_235 = arith.constant 9.99999974E-6 : f32
    %634 = vector.broadcast %cst_235 : f32 to vector<16x1xf32>
    %635 = arith.addf %631, %634 : vector<16x1xf32>
    %636 = math.rsqrt %635 : vector<16x1xf32>
    %637 = vector.broadcast %636 : vector<16x1xf32> to vector<16x32xf32>
    %638 = arith.mulf %633, %637 : vector<16x32xf32>
    %639 = vector.broadcast %619 : vector<1x32xf32> to vector<16x32xf32>
    %640 = arith.mulf %638, %639 : vector<16x32xf32>
    %641 = vector.broadcast %620 : vector<1x32xf32> to vector<16x32xf32>
    %642 = arith.addf %640, %641 : vector<16x32xf32>
    %c0_236 = arith.constant 0 : index
    %c0_237 = arith.constant 0 : index
    %643 = vector.load %arg21[%c0_236, %c0_237] : memref<32x128xbf16, #tpu.memory_space<vmem>>, vector<32x128xbf16>
    %644 = arith.truncf %642 : vector<16x32xf32> to vector<16x32xbf16>
    %cst_238 = arith.constant dense<0.000000e+00> : vector<16x128xf32>
    %645 = tpu.matmul %644, %643, %cst_238 {dimension_numbers = #tpu.dot_dimension_numbers<[1], [0], [0], [1], [0, 0, 1, 1], [], []>} : vector<16x32xbf16>, vector<32x128xbf16>, vector<16x128xf32> -> vector<16x128xf32>
    %c0_239 = arith.constant 0 : index
    %c0_240 = arith.constant 0 : index
    %646 = vector.load %arg22[%c0_239, %c0_240] : memref<1x128xf32, #tpu.memory_space<vmem>>, vector<1x128xf32>
    %647 = vector.broadcast %646 : vector<1x128xf32> to vector<16x128xf32>
    %648 = arith.addf %645, %647 : vector<16x128xf32>
    %c0_241 = arith.constant 0 : index
    %c0_242 = arith.constant 0 : index
    %649 = vector.load %arg23[%c0_241, %c0_242] : memref<16x128xf32, #tpu.memory_space<vmem>>, vector<16x128xf32>
    tpu.vector_store %arg23[%c0_241, %c0_242], %648 {strides = array<i32>} : memref<16x128xf32, #tpu.memory_space<vmem>>, vector<16x128xf32>,
    return
  }
}

</mosaic_0001>

<bundles_post_ra>
// kernel: seq_transformer_forward.1
= control target key start
LH: loop header
LB: loop body
LE: loop exit
PB: predicated region body
PF: predicated region fallthrough
CT: control target
= control target key end

     0   :  { %s3494_s0 = inlined_call_operand.vmem [shape: f32[16,32], index: 0, kind: input, shape index: {}]   ;;  %s3495_s1 = inlined_call_operand.vmem [shape: f32[2,1,32], index: 1, kind: input, shape index: {}]   ;;  %s3496_s2 = inlined_call_operand.vmem [shape: f32[2,1,32], index: 2, kind: input, shape index: {}]   ;;  %s3497_s3 = inlined_call_operand.vmem [shape: bf16[2,32,32], index: 3, kind: input, shape index: {}]   ;;  %s3498_s4 = inlined_call_operand.vmem [shape: f32[2,1,32], index: 4, kind: input, shape index: {}]   ;;  %s3499_s5 = inlined_call_operand.vmem [shape: bf16[2,32,32], index: 5, kind: input, shape index: {}]   ;;  %s3500_s6 = inlined_call_operand.vmem [shape: f32[2,1,32], index: 6, kind: input, shape index: {}]   ;;  %s3501_s7 = inlined_call_operand.vmem [shape: bf16[2,32,32], index: 7, kind: input, shape index: {}]   ;;  %s3502_s8 = inlined_call_operand.vmem [shape: f32[2,1,32], index: 8, kind: input, shape index: {}]   ;;  %s3503_s9 = inlined_call_operand.vmem [shape: f32[2,32,32], index: 9, kind: input, shape index: {}]   ;;  %s3504_s10 = inlined_call_operand.vmem [shape: f32[2,1,32], index: 10, kind: input, shape index: {}]   ;;  %s3505_s11 = inlined_call_operand.vmem [shape: f32[2,1,32], index: 11, kind: input, shape index: {}]   ;;  %s3506_s12 = inlined_call_operand.vmem [shape: f32[2,1,32], index: 12, kind: input, shape index: {}]   ;;  %s3507_s13 = inlined_call_operand.vmem [shape: bf16[2,32,128], index: 13, kind: input, shape index: {}]   ;;  %s3508_s14 = inlined_call_operand.vmem [shape: f32[2,1,128], index: 14, kind: input, shape index: {}]   ;;  %s3509_s15 = inlined_call_operand.vmem [shape: bf16[2,32,128], index: 15, kind: input, shape index: {}]   ;;  %s3510_s16 = inlined_call_operand.vmem [shape: f32[2,1,128], index: 16, kind: input, shape index: {}]   ;;  %s3511_s17 = inlined_call_operand.vmem [shape: bf16[2,128,32], index: 17, kind: input, shape index: {}]   ;;  %s3512_s18 = inlined_call_operand.vmem [shape: f32[2,1,32], index: 18, kind: input, shape index: {}]   ;;  %s3513_s19 = inlined_call_operand.vmem [shape: f32[1,32], index: 19, kind: input, shape index: {}]   ;;  %s3514_s20 = inlined_call_operand.vmem [shape: f32[1,32], index: 20, kind: input, shape index: {}]   ;;  %s3515_s21 = inlined_call_operand.vmem [shape: bf16[32,128], index: 21, kind: input, shape index: {}]   ;;  %s3516_s22 = inlined_call_operand.vmem [shape: f32[1,128], index: 22, kind: input, shape index: {}]   ;;  %s3517_s23 = inlined_call_operand.hbm [shape: f32[16,128], index: 23, kind: output, shape index: {}]  }
   0x1   :  { %3532 = sst [smem:[#allocation5_spill]] %s3494_s0 }
   0x2   :  { %3533 = sst [smem:[#allocation6_spill]] %s3495_s1 }
   0x3   :  { %3534 = sst [smem:[#allocation7_spill]] %s3496_s2 }
   0x4   :  { %3535 = sst [smem:[#allocation8_spill]] %s3497_s3 }
   0x5   :  { %3536 = sst [smem:[#allocation9_spill]] %s3498_s4 }
   0x6   :  { %3537 = sst [smem:[#allocation10_spill]] %s3499_s5 }
   0x7   :  { %3538 = sst [smem:[#allocation11_spill]] %s3500_s6 }
   0x8   :  { %3539 = sst [smem:[#allocation12_spill]] %s3501_s7 }
   0x9   :  { %3540 = sst [smem:[#allocation13_spill]] %s3514_s20 }
   0xa   :  { %3541 = sst [smem:[#allocation14_spill]] %s3516_s22 }
   0xb   :  { %3542 = sst [smem:[#allocation15_spill]] %s3517_s23 }
   0xc   :  { %s3543_s24 = sld [smem:[#allocation5_spill]]  ;;  %vm80_vm0 = vcmask 261120  }
  0x12   :  { %v2904_v0 = vld [vmem:[%s3543_s24] sm:$0xff]  ;;  %v2909_v1 = vld [vmem:[%s3543_s24 + $0x8] sm:$0xff] }
  0x13   :  { %v81_v2 = vsel %vm80_vm0, %v2904_v0, 0.0  ;;  %v96_v3 = vmul.f32 %v2904_v0, %v2904_v0  ;;  %v84_v5 = vsel %vm80_vm0, %v2909_v1, 0.0  ;;  %v97_v6 = vmul.f32 %v2909_v1, %v2909_v1 }
  0x14   :  { %82 = vadd.xlane.f32.xlu0 %v81_v2 }
  0x15   :  { %v98_v4 = vsel %vm80_vm0, %v96_v3, 0.0  ;;  %v101_v7 = vsel %vm80_vm0, %v97_v6, 0.0 }
  0x16   :  { %99 = vadd.xlane.f32.xlu1 %v98_v4 }
  0x1c   :  { %85 = vadd.xlane.f32.xlu0 %v84_v5 }
  0x1d   :  { %28 = vsyncpa [#allocation3], 0  ;;  %v2774_v8 = vmov 32.0   ;;  %s3544_s2 = sld [smem:[#allocation8_spill]]  ;;  %vm260_vm8 = vcmask 64512   ;;  %s3526_s1 = smov 112  }
  0x1e   :  { %102 = vadd.xlane.f32.xlu1 %v101_v7  ;;  %2646 = vrcp.f32 %v2774_v8  ;;  %s3545_s7 = sld [smem:[#allocation10_spill]]  ;;  %s3530_s26 = smov 120   ;;  %vm296_vm9 = vcmask 1043456  }
  0x1f   :  { %s3546_s24 = sld [smem:[#allocation12_spill]]  ;;  %s3528_s3 = smov 104  }
  0x20   :  { %s3547_s6 = sld [smem:[#allocation6_spill]]  ;;  %s2778_s28 = smov [#allocation2]  }
  0x21   :  { %s3548_s29 = sld [smem:[#allocation7_spill]] }
  0x22   :  { %s3549_s4 = sld [smem:[#allocation11_spill]] }
  0x23   :  { %v2577_v18 = vld [vmem:[%s3544_s2 + $0x8] sm:$0xff]  ;;  %v2576_v22 = vld [vmem:[%s3544_s2] sm:$0xff]  ;;  %s3550_s5 = sld [smem:[#allocation9_spill]] }
  0x24   :  { %v2647_v9 = vpop.eup %2646  ;;  %v2579_v19 = vld [vmem:[%s3545_s7 + $0x8] sm:$0xff]  ;;  %176 = vmatpush.bf16.msra.mxu2 %v2577_v18  ;;  %v2578_v23 = vld [vmem:[%s3545_s7] sm:$0xff]  ;;  %s3556_s25 = sld [smem:[#allocation15_spill]] }
  0x25   :  { %v88_v10 = vmul.f32 32.0, %v2647_v9  ;;  %vm92_vm1 = vweird.f32 %v2647_v9  ;;  %212 = vmatpush.bf16.msra.mxu1 %v2579_v19  ;;  %v2581_v31 = vld [vmem:[%s3546_s24 + $0x8] sm:$0xff]  ;;  %v2580_v33 = vld [vmem:[%s3546_s24] sm:$0xff] }
  0x26   :  { %v2621_v49 = vld [vmem:[%s3547_s6] ss:$0 sm:$0xff] }
  0x27   :  { %v89_v11 = vsub.f32 1.0, %v88_v10  ;;  %v2622_v55 = vld [vmem:[%s3548_s29] ss:$0 sm:$0xff] }
  0x28   :  { %177 = vmatpush.bf16.msra.mxu2 %v2576_v22  ;;  %v2959_v60 = vld [vmem:[%s3549_s4] ss:$0 sm:$0xff] }
  0x29   :  { %v90_v12 = vmul.f32 %v2647_v9, %v89_v11  ;;  %213 = vmatpush.bf16.msra.mxu1 %v2578_v23  ;;  %v2965_v2 = vld [vmem:[%s3550_s5] ss:$0 sm:$0xff] }
  0x2a   :  { %s2298_s27 = sshll.u32 %s3556_s25, 4  ;;  %s2299_s27 = int_to_ptr.hbm [resolvable:$true] %s2298_s27 }
  0x2b   :  { %v91_v13 = vadd.f32 %v2647_v9, %v90_v12 }
  0x2c   :  { %246 = vmatpush.bf16.msrb.mxu2 %v2581_v31 }
  0x2d   :  { %v2921_v14 = vsel %vm92_vm1, %v2647_v9, %v91_v13  ;;  %v2977_v9 = vld [vmem:[%s3502_s8] ss:$0 sm:$0xff] }
  0x30   :  { %247 = vmatpush.bf16.msrb.mxu2 %v2580_v33 }
  0x87   :  { %v83_v15 = vpop.xlane.xlu0 %82 }
  0x88   :  { %v94_v16 = vmul.f32 %v2921_v14, %v83_v15 }
  0x89   :  { %v100_v17 = vpop.xlane.xlu1 %99 }
  0x8a   :  { %v106_v20 = vmul.f32 %v94_v16, %v94_v16  ;;  %v104_v21 = vmul.f32 %v100_v17, %v2921_v14  ;;  %v110_v46 = vsub.f32 %v2904_v0, %v94_v16 }
  0x8c   :  { %v108_v24 = vsub.f32 %v104_v21, %v106_v20 }
  0x8e   :  { %v112_v25 = vadd.f32 1e-05, %v108_v24 }
  0x8f   :  { %v86_v26 = vpop.xlane.xlu0 %85 }
  0x90   :  { %2648 = vrsqrt.f32 %v112_v25  ;;  %v95_v27 = vmul.f32 %v2921_v14, %v86_v26  ;;  %vm120_vm3 = vweird.f32 %v112_v25 }
  0x91   :  { %v103_v28 = vpop.xlane.xlu1 %102 }
  0x92   :  { %v107_v29 = vmul.f32 %v95_v27, %v95_v27  ;;  %v105_v30 = vmul.f32 %v103_v28, %v2921_v14  ;;  %v111_v51 = vsub.f32 %v2909_v1, %v95_v27 }
  0x94   :  { %v109_v32 = vsub.f32 %v105_v30, %v107_v29 }
  0x96   :  { %v2649_v34 = vpop.eup %2648  ;;  %v113_v35 = vadd.f32 1e-05, %v109_v32 }
  0x97   :  { %v115_v36 = vmul.f32 %v2649_v34, %v112_v25  ;;  %vm121_vm2 = vweird.f32 %v2649_v34 }
  0x98   :  { %2650 = vrsqrt.f32 %v113_v35  ;;  %vm122_vm4 = vmor %vm120_vm3, %vm121_vm2  ;;  %vm130_vm6 = vweird.f32 %v113_v35 }
  0x99   :  { %v116_v37 = vmul.f32 %v2649_v34, %v115_v36 }
  0x9b   :  { %v117_v38 = vmul.f32 0.5, %v116_v37 }
  0x9d   :  { %v118_v39 = vsub.f32 1.5, %v117_v38 }
  0x9e   :  { %v2651_v40 = vpop.eup %2650 }
  0x9f   :  { %v119_v41 = vmul.f32 %v2649_v34, %v118_v39  ;;  %v125_v42 = vmul.f32 %v2651_v40, %v113_v35  ;;  %vm131_vm5 = vweird.f32 %v2651_v40 }
  0xa0   :  { %vm132_vm7 = vmor %vm130_vm6, %vm131_vm5 }
  0xa1   :  { %v126_v43 = vmul.f32 %v2651_v40, %v125_v42  ;;  %v123_v44 = vsel %vm122_vm4, %v2649_v34, %v119_v41 }
  0xa2   :  { %v134_v48 = vmul.f32 %v123_v44, %v110_v46 }
  0xa3   :  { %v127_v45 = vmul.f32 0.5, %v126_v43 }
  0xa4   :  { %v139_v54 = vmul.f32 %v2621_v49, %v134_v48 }
  0xa5   :  { %v128_v47 = vsub.f32 1.5, %v127_v45 }
  0xa6   :  { %v144_v57 = vadd.f32 %v2622_v55, %v139_v54 }
  0xa7   :  { %v129_v50 = vmul.f32 %v2651_v40, %v128_v47 }
  0xa9   :  { %v133_v52 = vsel %vm132_vm7, %v2651_v40, %v129_v50 }
  0xaa   :  { %v135_v53 = vmul.f32 %v133_v52, %v111_v51 }
  0xac   :  { %v140_v56 = vmul.f32 %v2621_v49, %v135_v53 }
  0xae   :  { %v145_v58 = vadd.f32 %v2622_v55, %v140_v56 }
  0xb0   :  { %v146_v59 = vpack.c.bf16 %v145_v58, %v144_v57 }
  0xb2   :  { %2318 = vmatmul.msk.bf16.vlgmr.msra.gmra.mxu2 %vm80_vm0, %v146_v59  ;;  %2327 = vmatmul.msk.bf16.vlgmr.msra.gmra.mxu1 %vm80_vm0, %v146_v59 }
  0xc2   :  { %2336 = vmatmul.msk.bf16.vlgmr.msrb.gmra.mxu2 %vm80_vm0, %v146_v59 }
 0x12f   :  { %v215_v61 = vpop.f32.mrf.mxu1 }
 0x130   :  { %v216_v62 = vadd.f32 %v2959_v60, %v215_v61 }
 0x132   :  { %v259_v63 = vpack.c.bf16 %v216_v62, %v216_v62 }
 0x134   :  { %416 = vrot.lane.b32.xlu0 %v259_v63, %s3526_s1  ;;  %319 = vrot.lane.b32.xlu2 %v259_v63, %s3530_s26  ;;  %v265_v3 = vsel %vm260_vm8, %v259_v63, 0 }
 0x135   :  { %v179_v4 = vpop.f32.mrf.mxu2  ;;  %274 = vmatpush.bf16.xpose.msra.mxu3 %v265_v3 }
 0x136   :  { %v180_v5 = vadd.f32 %v2965_v2, %v179_v4  ;;  %v255_v4 = vld [vmem:[%s3503_s9 + $0x8] sm:$0xff] }
 0x137   :  { %v217_v23 = vpop.f32.mrf.mxu1 }
 0x138   :  { %v184_v6 = vmul.f32 0.35355338, %v180_v5  ;;  %v218_v48 = vadd.f32 %v2959_v60, %v217_v23  ;;  %v375_v5 = vpack.c.bf16 %v255_v4, %v255_v4 }
 0x13a   :  { %v258_v7 = vpack.c.bf16 %v184_v6, %v184_v6  ;;  %v3003_v49 = vpack.c.bf16 %v218_v48, %v218_v48  ;;  %v380_v6 = vsel %vm296_vm9, %v375_v5, 0 }
 0x13c   :  { %414 = vrot.lane.b32.xlu1 %v258_v7, %s3526_s1  ;;  %316 = vrot.lane.b32.xlu2 %v258_v7, %s3530_s26 }
 0x13d   :  { %2337 = vmatmul.msk.bf16.vlgmr.msra.gmra.mxu3 %vm260_vm8, %v258_v7  ;;  %v181_v8 = vpop.f32.mrf.mxu2 }
 0x13e   :  { %v182_v45 = vadd.f32 %v2965_v2, %v181_v8  ;;  %389 = vmatpush.bf16.msrb.mxu3 %v380_v6 }
 0x140   :  { %v185_v46 = vmul.f32 0.35355338, %v182_v45 }
 0x142   :  { %v2998_v47 = vpack.c.bf16 %v185_v46, %v185_v46 }
 0x145   :  { %v249_v10 = vpop.f32.mrf.mxu2 }
 0x146   :  { %v250_v11 = vadd.f32 %v2977_v9, %v249_v10  ;;  %v254_v10 = vld [vmem:[%s3503_s9] sm:$0xff] }
 0x148   :  { %v292_v12 = vpack.c.bf16 %v250_v11, %v250_v11 }
 0x14a   :  { %v298_v13 = vsel %vm296_vm9, %v292_v12, 0 }
 0x14b   :  { %307 = vmatpush.bf16.msra.mxu0 %v298_v13 }
 0x18e   :  { %v320_v15 = vpop.permute.xlu2 %319 }
 0x18f   :  { %v325_v16 = vsel %vm260_vm8, %v320_v15, 0  ;;  %v251_v15 = vpop.f32.mrf.mxu2 }
 0x190   :  { %334 = vmatpush.bf16.xpose.msrb.mxu1 %v325_v16 }
 0x196   :  { %v317_v17 = vpop.permute.xlu2 %316 }
 0x197   :  { %2339 = vmatmul.msk.bf16.vlgmr.msrb.gmra.mxu1 %vm260_vm8, %v317_v17 }
 0x1a6   :  { %v417_v18 = vpop.permute.xlu0 %416 }
 0x1a7   :  { %v422_v19 = vsel %vm260_vm8, %v417_v18, 0 }
 0x1a8   :  { %431 = vmatpush.bf16.xpose.msra.mxu1 %v422_v19 }
 0x1ae   :  { %v415_v20 = vpop.permute.xlu1 %414 }
 0x1af   :  { %2343 = vmatmul.msk.bf16.vlgmr.msra.gmra.mxu1 %vm260_vm8, %v415_v20 }
 0x1c0   :  { %v276_v21 = vpop.f32.mrf.mxu3 }
 0x1c1   :  { %v280_v39 = vsel %vm260_vm8, %v276_v21, -inf }
 0x1c8   :  { %v278_v22 = vpop.f32.mrf.mxu3 }
 0x1c9   :  { %v576_v22 = vsel %vm260_vm8, %v3003_v49, 0 }
 0x214   :  { %v336_v24 = vpop.f32.mrf.mxu1 }
 0x215   :  { %v340_v25 = vsel %vm260_vm8, %v336_v24, -inf }
 0x216   :  { %341 = vmax.xlane.f32.xlu2 %v340_v25 }
 0x21c   :  { %v338_v26 = vpop.f32.mrf.mxu1 }
 0x22c   :  { %v433_v27 = vpop.f32.mrf.mxu1 }
 0x22d   :  { %v437_v28 = vsel %vm260_vm8, %v433_v27, -inf }
 0x22e   :  { %353 = vrot.lane.b32.xlu2 %v292_v12, %s3530_s26  ;;  %438 = vmax.xlane.f32.xlu0 %v437_v28 }
 0x234   :  { %v435_v29 = vpop.f32.mrf.mxu1 }
 0x235   :  { %v252_v29 = vadd.f32 %v2977_v9, %v251_v15 }
 0x236   :  { %449 = vrot.lane.b32.xlu2 %v292_v12, %s3526_s1 }
 0x23e   :  { %494 = vrot.lane.b32.xlu2 %v259_v63, %s3528_s3 }
 0x289   :  { %v342_v30 = vpop.xlane.xlu2 %341 }
 0x28a   :  { %v343_v31 = vsub.f32 %v336_v24, %v342_v30  ;;  %v3034_v30 = vpack.c.bf16 %v252_v29, %v252_v29 }
 0x28c   :  { %v344_v32 = vmul.f32 1.442695, %v343_v31 }
 0x28e   :  { %2652 = vpow2.f32 %v344_v32 }
 0x291   :  { %v354_v33 = vpop.permute.xlu2 %353 }
 0x292   :  { %v359_v34 = vsel %vm296_vm9, %v354_v33, 0  ;;  %v608_v33 = vsel %vm296_vm9, %v3034_v30, 0 }
 0x293   :  { %368 = vmatpush.bf16.msra.mxu2 %v359_v34 }
 0x294   :  { %v2653_v35 = vpop.eup %2652 }
 0x295   :  { %v346_v36 = vsel %vm260_vm8, %v2653_v35, 0.0 }
 0x296   :  { %347 = vadd.xlane.f32.xlu1 %v346_v36 }
 0x299   :  { %v450_v37 = vpop.permute.xlu2 %449 }
 0x29a   :  { %v455_v38 = vsel %vm296_vm9, %v450_v37, 0 }
 0x29b   :  { %464 = vmatpush.bf16.msrb.mxu2 %v455_v38 }
 0x29e   :  { %281 = vmax.xlane.f32.xlu1 %v280_v39 }
 0x2a1   :  { %v439_v40 = vpop.xlane.xlu0 %438 }
 0x2a2   :  { %v440_v41 = vsub.f32 %v433_v27, %v439_v40 }
 0x2a4   :  { %v441_v42 = vmul.f32 1.442695, %v440_v41 }
 0x2a6   :  { %2654 = vpow2.f32 %v441_v42 }
 0x2ac   :  { %v2655_v43 = vpop.eup %2654 }
 0x2ad   :  { %v443_v44 = vsel %vm260_vm8, %v2655_v43, 0.0 }
 0x2ae   :  { %444 = vadd.xlane.f32.xlu0 %v443_v44 }
 0x2b7   :  { %492 = vrot.lane.b32.xlu1 %v258_v7, %s3528_s3  ;;  %v256_v7 = vld [vmem:[%s3503_s9 + $0x10] sm:$0xff] }
 0x2b8   :  { %v471_v8 = vpack.c.bf16 %v256_v7, %v256_v7 }
 0x2ba   :  { %v476_v11 = vsel %vm296_vm9, %v471_v8, 0 }
 0x2bb   :  { %485 = vmatpush.bf16.msra.mxu3 %v476_v11 }
 0x2bf   :  { %527 = vrot.lane.b32.xlu1 %v292_v12, %s3528_s3  ;;  %v314_v12 = vpack.c.bf16 %v254_v10, %v254_v10 }
 0x2c1   :  { %v399_v13 = vsel %vm296_vm9, %v314_v12, 0 }
 0x2c2   :  { %408 = vmatpush.bf16.msrb.mxu0 %v399_v13 }
 0x2c7   :  { %625 = vrot.lane.b32.xlu1 %v2998_v47, %s3530_s26 }
 0x2cf   :  { %718 = vrot.lane.b32.xlu1 %v3003_v49, %s3526_s1  ;;  %s3551_s1 = smov 112  }
 0x2d7   :  { %790 = vrot.lane.b32.xlu1 %v2998_v47, %s3528_s3 }
 0x309   :  { %v348_v50 = vpop.xlane.xlu1 %347 }
 0x30a   :  { %2656 = vrcp.f32 %v348_v50 }
 0x310   :  { %v2657_v51 = vpop.eup %2656 }
 0x311   :  { %v350_v52 = vmul.f32 %v2657_v51, %v2653_v35  ;;  %v282_v53 = vpop.xlane.xlu1 %281 }
 0x312   :  { %v283_v54 = vsub.f32 %v276_v21, %v282_v53  ;;  %v495_v21 = vpop.permute.xlu2 %494 }
 0x313   :  { %v351_v55 = vpack.c.bf16 %v350_v52, %v350_v52  ;;  %v500_v24 = vsel %vm260_vm8, %v495_v21, 0 }
 0x314   :  { %v284_v56 = vmul.f32 1.442695, %v283_v54 }
 0x315   :  { %2340 = vmatmul.msk.bf16.vlgmr.msra.gmra.mxu2 %vm260_vm8, %v351_v55 }
 0x316   :  { %2658 = vpow2.f32 %v284_v56 }
 0x31c   :  { %v2659_v57 = vpop.eup %2658 }
 0x31d   :  { %v286_v58 = vsel %vm260_vm8, %v2659_v57, 0.0 }
 0x31e   :  { %287 = vadd.xlane.f32.xlu0 %v286_v58 }
 0x321   :  { %v445_v59 = vpop.xlane.xlu0 %444 }
 0x322   :  { %2660 = vrcp.f32 %v445_v59 }
 0x328   :  { %v2661_v60 = vpop.eup %2660 }
 0x329   :  { %v447_v61 = vmul.f32 %v2661_v60, %v2655_v43  ;;  %v493_v62 = vpop.permute.xlu1 %492 }
 0x32b   :  { %v448_v63 = vpack.c.bf16 %v447_v61, %v447_v61 }
 0x32d   :  { %2344 = vmatmul.msk.bf16.vlgmr.msrb.gmra.mxu2 %vm260_vm8, %v448_v63 }
 0x331   :  { %v528_v2 = vpop.permute.xlu1 %527 }
 0x332   :  { %v533_v3 = vsel %vm296_vm9, %v528_v2, 0 }
 0x333   :  { %542 = vmatpush.bf16.msrb.mxu1 %v533_v3 }
 0x339   :  { %v626_v4 = vpop.permute.xlu1 %625 }
 0x391   :  { %v288_v16 = vpop.xlane.xlu0 %287 }
 0x392   :  { %2662 = vrcp.f32 %v288_v16  ;;  %v257_v16 = vld [vmem:[%s3503_s9 + $0x18] sm:$0xff] }
 0x398   :  { %v2663_v17 = vpop.eup %2662  ;;  %v370_v18 = vpop.f32.mrf.mxu2 }
 0x399   :  { %v374_v19 = vpack.c.bf16 %v370_v18, %v370_v18  ;;  %v290_v20 = vmul.f32 %v2663_v17, %v2659_v57  ;;  %v549_v17 = vpack.c.bf16 %v257_v16, %v257_v16 }
 0x39b   :  { %2341 = vmatmul.msk.bf16.vlgmr.msrb.gmra.mxu3 %vm260_vm8, %v374_v19  ;;  %v291_v23 = vpack.c.bf16 %v290_v20, %v290_v20  ;;  %v3069_v18 = vsel %vm296_vm9, %v549_v17, 0 }
 0x39c   :  { %585 = vmatpush.bf16.xpose.msrb.mxu3 %v576_v22  ;;  %563 = vmatpush.bf16.msra.mxu2 %v3069_v18 }
 0x39d   :  { %2338 = vmatmul.msk.bf16.vlgmr.msra.gmra.mxu0 %vm260_vm8, %v291_v23 }
 0x39e   :  { %509 = vmatpush.bf16.xpose.msra.mxu0 %v500_v24 }
 0x3a0   :  { %v372_v25 = vpop.f32.mrf.mxu2 }
 0x3b0   :  { %v466_v26 = vpop.f32.mrf.mxu2 }
 0x3b1   :  { %v470_v27 = vpack.c.bf16 %v466_v26, %v466_v26 }
 0x3b3   :  { %2345 = vmatmul.msk.bf16.vlgmr.msra.gmra.mxu3 %vm260_vm8, %v470_v27 }
 0x3b4   :  { %694 = vmatpush.bf16.msra.mxu3 %v380_v6 }
 0x3b8   :  { %v468_v28 = vpop.f32.mrf.mxu2 }
 0x3c3   :  { %2349 = vmatmul.msk.bf16.vlgmr.msrb.gmra.mxu3 %vm260_vm8, %v2998_v47 }
 0x3c4   :  { %783 = vmatpush.bf16.msrb.mxu3 %v476_v11 }
 0x41a   :  { %v309_v31 = vpop.f32.mrf.mxu0 }
 0x41b   :  { %v313_v32 = vpack.c.bf16 %v309_v31, %v309_v31 }
 0x41d   :  { %2342 = vmatmul.msk.bf16.vlgmr.msrb.gmra.mxu0 %vm260_vm8, %v313_v32 }
 0x41e   :  { %617 = vmatpush.bf16.msrb.mxu0 %v608_v33  ;;  %v3039_v34 = vpop.f32.mrf.mxu3 }
 0x422   :  { %v311_v35 = vpop.f32.mrf.mxu0 }
 0x426   :  { %v393_v36 = vpop.f32.mrf.mxu3 }
 0x42d   :  { %2346 = vmatmul.msk.bf16.vlgmr.msra.gmra.mxu0 %vm260_vm8, %v493_v62 }
 0x42e   :  { %710 = vmatpush.bf16.msra.mxu0 %v399_v13 }
 0x436   :  { %v3042_v37 = vpop.f32.mrf.mxu3 }
 0x43e   :  { %v489_v9 = vpop.f32.mrf.mxu3 }
 0x446   :  { %v587_v38 = vpop.f32.mrf.mxu3 }
 0x447   :  { %v591_v39 = vsel %vm260_vm8, %v587_v38, -inf }
 0x448   :  { %592 = vmax.xlane.f32.xlu0 %v591_v39 }
 0x44e   :  { %v589_v40 = vpop.f32.mrf.mxu3 }
 0x49a   :  { %v3045_v41 = vpop.f32.mrf.mxu0 }
 0x49b   :  { %v411_v35 = vadd.f32 %v3045_v41, %v3039_v34 }
 0x49d   :  { %v491_v9 = vadd.f32 %v3042_v37, %v411_v35 }
 0x4a2   :  { %v412_v42 = vpop.f32.mrf.mxu0 }
 0x4aa   :  { %v511_v43 = vpop.f32.mrf.mxu0 }
 0x4ab   :  { %v515_v44 = vsel %vm260_vm8, %v511_v43, -inf }
 0x4ac   :  { %516 = vmax.xlane.f32.xlu0 %v515_v44 }
 0x4b2   :  { %v513_v45 = vpop.f32.mrf.mxu0 }
 0x4bb   :  { %v593_v46 = vpop.xlane.xlu0 %592 }
 0x4bc   :  { %v594_v48 = vsub.f32 %v587_v38, %v593_v46  ;;  %v3088_v38 = vld [vmem:[%s3504_s10] ss:$0 sm:$0xff] }
 0x4be   :  { %v595_v50 = vmul.f32 1.442695, %v594_v48 }
 0x4c0   :  { %2664 = vpow2.f32 %v595_v50 }
 0x4c6   :  { %v2665_v51 = vpop.eup %2664 }
 0x4c7   :  { %v597_v52 = vsel %vm260_vm8, %v2665_v51, 0.0 }
 0x4c8   :  { %598 = vadd.xlane.f32.xlu2 %v597_v52 }
 0x4e0   :  { %792 = vrot.lane.b32.xlu2 %v3003_v49, %s3528_s3 }
 0x51f   :  { %v517_v53 = vpop.xlane.xlu0 %516 }
 0x520   :  { %v518_v54 = vsub.f32 %v511_v43, %v517_v53 }
 0x522   :  { %v519_v55 = vmul.f32 1.442695, %v518_v54 }
 0x524   :  { %2666 = vpow2.f32 %v519_v55 }
 0x52a   :  { %v2667_v56 = vpop.eup %2666 }
 0x52b   :  { %v521_v57 = vsel %vm260_vm8, %v2667_v56, 0.0 }
 0x52c   :  { %522 = vadd.xlane.f32.xlu0 %v521_v57 }
 0x53b   :  { %v599_v58 = vpop.xlane.xlu2 %598 }
 0x53c   :  { %2668 = vrcp.f32 %v599_v58 }
 0x540   :  { %628 = vrot.lane.b32.xlu0 %v3003_v49, %s3530_s26  ;;  %v719_v49 = vpop.permute.xlu1 %718 }
 0x541   :  { %v724_v10 = vsel %vm260_vm8, %v719_v49, 0 }
 0x542   :  { %v2669_v59 = vpop.eup %2668 }
 0x543   :  { %v601_v60 = vmul.f32 %v2669_v59, %v2665_v51  ;;  %v793_v61 = vpop.permute.xlu2 %792 }
 0x544   :  { %v798_v63 = vsel %vm260_vm8, %v793_v61, 0 }
 0x545   :  { %v602_v62 = vpack.c.bf16 %v601_v60, %v601_v60 }
 0x547   :  { %2350 = vmatmul.msk.bf16.vlgmr.msrb.gmra.mxu0 %vm260_vm8, %v602_v62 }
 0x548   :  { %807 = vmatpush.bf16.xpose.msrb.mxu0 %v798_v63  ;;  %716 = vrot.lane.b32.xlu0 %v2998_v47, %s3551_s1  ;;  %v791_v15 = vpop.permute.xlu1 %790 }
 0x59f   :  { %v523_v2 = vpop.xlane.xlu0 %522 }
 0x5a0   :  { %2670 = vrcp.f32 %v523_v2 }
 0x5a6   :  { %v2671_v3 = vpop.eup %2670 }
 0x5a7   :  { %v525_v5 = vmul.f32 %v2671_v3, %v2667_v56 }
 0x5a9   :  { %v526_v6 = vpack.c.bf16 %v525_v5, %v525_v5 }
 0x5ab   :  { %2347 = vmatmul.msk.bf16.vlgmr.msrb.gmra.mxu1 %vm260_vm8, %v526_v6 }
 0x5b2   :  { %v629_v7 = vpop.permute.xlu0 %628 }
 0x5b3   :  { %v634_v8 = vsel %vm260_vm8, %v629_v7, 0 }
 0x5b4   :  { %643 = vmatpush.bf16.xpose.msra.mxu1 %v634_v8 }
 0x5ba   :  { %v717_v12 = vpop.permute.xlu0 %716 }
 0x5bb   :  { %2351 = vmatmul.msk.bf16.vlgmr.msra.gmra.mxu1 %vm260_vm8, %v626_v4 }
 0x5bc   :  { %733 = vmatpush.bf16.xpose.msrb.mxu1 %v724_v10 }
 0x5c4   :  { %v619_v11 = vpop.f32.mrf.mxu0 }
 0x5c5   :  { %v623_v47 = vpack.c.bf16 %v619_v11, %v619_v11 }
 0x5c7   :  { %2354 = vmatmul.msk.bf16.vlgmr.msra.gmra.mxu0 %vm260_vm8, %v623_v47 }
 0x5cb   :  { %2355 = vmatmul.msk.bf16.vlgmr.msrb.gmra.mxu1 %vm260_vm8, %v717_v12 }
 0x5cc   :  { %v621_v13 = vpop.f32.mrf.mxu0 }
 0x5d7   :  { %2358 = vmatmul.msk.bf16.vlgmr.msrb.gmra.mxu0 %vm260_vm8, %v791_v15 }
 0x628   :  { %v544_v19 = vpop.f32.mrf.mxu1 }
 0x629   :  { %v548_v20 = vpack.c.bf16 %v544_v19, %v544_v19 }
 0x62b   :  { %2348 = vmatmul.msk.bf16.vlgmr.msra.gmra.mxu2 %vm260_vm8, %v548_v20 }
 0x630   :  { %v546_v21 = vpop.f32.mrf.mxu1 }
 0x638   :  { %v645_v22 = vpop.f32.mrf.mxu1 }
 0x639   :  { %v649_v23 = vsel %vm260_vm8, %v645_v22, -inf }
 0x63a   :  { %650 = vmax.xlane.f32.xlu0 %v649_v23 }
 0x640   :  { %v647_v24 = vpop.f32.mrf.mxu1 }
 0x644   :  { %v3074_v25 = vpop.f32.mrf.mxu0 }
 0x648   :  { %v735_v26 = vpop.f32.mrf.mxu1 }
 0x649   :  { %v739_v27 = vsel %vm260_vm8, %v735_v26, -inf }
 0x64a   :  { %740 = vmax.xlane.f32.xlu1 %v739_v27 }
 0x64c   :  { %v714_v28 = vpop.f32.mrf.mxu0 }
 0x650   :  { %v737_v29 = vpop.f32.mrf.mxu1 }
 0x654   :  { %v809_v31 = vpop.f32.mrf.mxu0 }
 0x655   :  { %v813_v32 = vsel %vm260_vm8, %v809_v31, -inf }
 0x656   :  { %814 = vmax.xlane.f32.xlu2 %v813_v32 }
 0x65c   :  { %v811_v33 = vpop.f32.mrf.mxu0 }
 0x663   :  { %662 = vrot.lane.b32.xlu1 %v3034_v30, %s3530_s26 }
 0x66e   :  { %751 = vrot.lane.b32.xlu2 %v3034_v30, %s3551_s1 }
 0x6ad   :  { %v651_v36 = vpop.xlane.xlu0 %650 }
 0x6ae   :  { %v652_v39 = vsub.f32 %v645_v22, %v651_v36  ;;  %v565_v40 = vpop.f32.mrf.mxu2 }
 0x6af   :  { %v569_v42 = vadd.f32 %v565_v40, %v491_v9 }
 0x6b0   :  { %v653_v43 = vmul.f32 1.442695, %v652_v39 }
 0x6b1   :  { %v868_v44 = vadd.f32 %v3088_v38, %v569_v42 }
 0x6b2   :  { %2672 = vpow2.f32 %v653_v43 }
 0x6b3   :  { %v3092_v45 = vadd.f32 %v868_v44, %v2904_v0 }
 0x6b5   :  { %v874_v34 = vsel %vm80_vm0, %v3092_v45, 0.0  ;;  %v882_v62 = vmul.f32 %v3092_v45, %v3092_v45 }
 0x6b6   :  { %v567_v41 = vpop.f32.mrf.mxu2  ;;  %875 = vadd.xlane.f32.xlu1 %v874_v34 }
 0x6b7   :  { %v884_v63 = vsel %vm80_vm0, %v882_v62, 0.0 }
 0x6b8   :  { %v2673_v37 = vpop.eup %2672 }
 0x6b9   :  { %v655_v46 = vsel %vm260_vm8, %v2673_v37, 0.0 }
 0x6ba   :  { %656 = vadd.xlane.f32.xlu0 %v655_v46  ;;  %v2585_v46 = vld [vmem:[%s3509_s15 + $0x8] sm:$0xff] }
 0x6bb   :  { %996 = vmatpush.bf16.msra.mxu0 %v2585_v46 }
 0x6bd   :  { %v741_v48 = vpop.xlane.xlu1 %740 }
 0x6be   :  { %v742_v50 = vsub.f32 %v735_v26, %v741_v48 }
 0x6c0   :  { %v743_v51 = vmul.f32 1.442695, %v742_v50  ;;  %v2582_v50 = vld [vmem:[%s3507_s13] sm:$0xff] }
 0x6c2   :  { %2674 = vpow2.f32 %v743_v51  ;;  %v2584_v51 = vld [vmem:[%s3509_s15] sm:$0xff] }
 0x6c3   :  { %997 = vmatpush.bf16.msra.mxu0 %v2584_v51 }
 0x6c8   :  { %v2675_v52 = vpop.eup %2674 }
 0x6c9   :  { %v815_v53 = vpop.xlane.xlu2 %814  ;;  %v745_v54 = vsel %vm260_vm8, %v2675_v52, 0.0 }
 0x6ca   :  { %v816_v55 = vsub.f32 %v809_v31, %v815_v53  ;;  %746 = vadd.xlane.f32.xlu0 %v745_v54 }
 0x6cc   :  { %v817_v0 = vmul.f32 1.442695, %v816_v55 }
 0x6ce   :  { %2676 = vpow2.f32 %v817_v0 }
 0x6d1   :  { %v752_v57 = vpop.permute.xlu2 %751 }
 0x6d2   :  { %v757_v61 = vsel %vm296_vm9, %v752_v57, 0 }
 0x6d4   :  { %v2677_v56 = vpop.eup %2676 }
 0x6d5   :  { %v663_v58 = vpop.permute.xlu1 %662  ;;  %v819_v59 = vsel %vm260_vm8, %v2677_v56, 0.0 }
 0x6d6   :  { %v668_v60 = vsel %vm296_vm9, %v663_v58, 0  ;;  %820 = vadd.xlane.f32.xlu0 %v819_v59 }
 0x6d7   :  { %677 = vmatpush.bf16.msrb.mxu2 %v668_v60 }
 0x6db   :  { %766 = vmatpush.bf16.msra.mxu2 %v757_v61 }
 0x6ea   :  { %825 = vrot.lane.b32.xlu0 %v3034_v30, %s3528_s3 }
 0x714   :  { %885 = vadd.xlane.f32.xlu0 %v884_v63 }
 0x72d   :  { %v657_v2 = vpop.xlane.xlu0 %656 }
 0x72e   :  { %2678 = vrcp.f32 %v657_v2 }
 0x734   :  { %v2679_v3 = vpop.eup %2678 }
 0x735   :  { %v659_v4 = vmul.f32 %v2679_v3, %v2673_v37  ;;  %v2583_v37 = vld [vmem:[%s3507_s13 + $0x8] sm:$0xff] }
 0x737   :  { %v660_v5 = vpack.c.bf16 %v659_v4, %v659_v4 }
 0x739   :  { %2352 = vmatmul.msk.bf16.vlgmr.msrb.gmra.mxu2 %vm260_vm8, %v660_v5 }
 0x73a   :  { %857 = vmatpush.bf16.msrb.mxu2 %v3069_v18 }
 0x73d   :  { %v747_v6 = vpop.xlane.xlu0 %746 }
 0x73e   :  { %2680 = vrcp.f32 %v747_v6 }
 0x744   :  { %v2681_v49 = vpop.eup %2680 }
 0x745   :  { %v749_v7 = vmul.f32 %v2681_v49, %v2675_v52 }
 0x747   :  { %v750_v30 = vpack.c.bf16 %v749_v7, %v749_v7  ;;  %v2627_v7 = vld [vmem:[%s3505_s11] ss:$0 sm:$0xff] }
 0x749   :  { %2356 = vmatmul.msk.bf16.vlgmr.msra.gmra.mxu2 %vm260_vm8, %v750_v30  ;;  %v821_v8 = vpop.xlane.xlu0 %820 }
 0x74a   :  { %2682 = vrcp.f32 %v821_v8 }
 0x750   :  { %v2683_v10 = vpop.eup %2682 }
 0x751   :  { %v823_v11 = vmul.f32 %v2683_v10, %v2677_v56 }
 0x753   :  { %v824_v13 = vpack.c.bf16 %v823_v11, %v823_v11 }
 0x75c   :  { %v826_v47 = vpop.permute.xlu0 %825 }
 0x75d   :  { %v831_v12 = vsel %vm296_vm9, %v826_v47, 0 }
 0x75e   :  { %840 = vmatpush.bf16.msra.mxu1 %v831_v12 }
 0x761   :  { %2359 = vmatmul.msk.bf16.vlgmr.msra.gmra.mxu1 %vm260_vm8, %v824_v13  ;;  %v2628_v13 = vld [vmem:[%s3506_s12] ss:$0 sm:$0xff] }
 0x787   :  { %v886_v43 = vpop.xlane.xlu0 %885 }
 0x7bc   :  { %v679_v15 = vpop.f32.mrf.mxu2 }
 0x7bd   :  { %v683_v16 = vpack.c.bf16 %v679_v15, %v679_v15 }
 0x7bf   :  { %2353 = vmatmul.msk.bf16.vlgmr.msra.gmra.mxu3 %vm260_vm8, %v683_v16 }
 0x7c0   :  { %962 = vmatpush.bf16.msra.mxu3 %v2583_v37 }
 0x7c4   :  { %v681_v17 = vpop.f32.mrf.mxu2  ;;  %963 = vmatpush.bf16.msra.mxu3 %v2582_v50 }
 0x7cc   :  { %v768_v18 = vpop.f32.mrf.mxu2 }
 0x7cd   :  { %v772_v19 = vpack.c.bf16 %v768_v18, %v768_v18 }
 0x7cf   :  { %2357 = vmatmul.msk.bf16.vlgmr.msrb.gmra.mxu3 %vm260_vm8, %v772_v19  ;;  %v2593_v19 = vld [vmem:[%s3511_s17 + $0x38] sm:$0xff] }
 0x7d0   :  { %1115 = vmatpush.bf16.msrb.mxu1 %v2593_v19 }
 0x7d4   :  { %v770_v20 = vpop.f32.mrf.mxu2 }
 0x7d5   :  { %v2592_v20 = vld [vmem:[%s3511_s17 + $0x30] sm:$0xff] }
 0x7d6   :  { %1116 = vmatpush.bf16.msrb.mxu1 %v2592_v20  ;;  %v2595_v20 = vld [vmem:[%s3544_s2 + $0x18] sm:$0xff] }
 0x7d7   :  { %1225 = vmatpush.bf16.msra.mxu2 %v2595_v20 }
 0x7de   :  { %v842_v21 = vpop.f32.mrf.mxu1 }
 0x7df   :  { %v846_v22 = vpack.c.bf16 %v842_v21, %v842_v21  ;;  %v2591_v21 = vld [vmem:[%s3511_s17 + $0x28] sm:$0xff] }
 0x7e0   :  { %1117 = vmatpush.bf16.msrb.mxu1 %v2591_v21  ;;  %v2599_v21 = vld [vmem:[%s3546_s24 + $0x18] sm:$0xff] }
 0x7e1   :  { %2360 = vmatmul.msk.bf16.vlgmr.msrb.gmra.mxu2 %vm260_vm8, %v846_v22  ;;  %v2590_v22 = vld [vmem:[%s3511_s17 + $0x20] sm:$0xff]  ;;  %1299 = vmatpush.bf16.msrb.mxu0 %v2599_v21 }
 0x7e4   :  { %1118 = vmatpush.bf16.msrb.mxu1 %v2590_v22 }
 0x7e6   :  { %v844_v23 = vpop.f32.mrf.mxu1 }
 0x7e7   :  { %v2629_v23 = vld [vmem:[%s3510_s16] ss:$0 sm:$0xff] }
 0x842   :  { %v696_v24 = vpop.f32.mrf.mxu3 }
 0x843   :  { %v713_v29 = vadd.f32 %v3074_v25, %v696_v24  ;;  %v876_v25 = vpop.xlane.xlu1 %875  ;;  %v2589_v24 = vld [vmem:[%s3511_s17 + $0x18] sm:$0xff] }
 0x844   :  { %v880_v44 = vmul.f32 %v876_v25, %v2921_v14  ;;  %1119 = vmatpush.bf16.msrb.mxu1 %v2589_v24  ;;  %v2596_v24 = vld [vmem:[%s3545_s7 + $0x10] sm:$0xff] }
 0x846   :  { %v892_v34 = vmul.f32 %v880_v44, %v880_v44  ;;  %v896_v6 = vsub.f32 %v3092_v45, %v880_v44 }
 0x84a   :  { %v698_v26 = vpop.f32.mrf.mxu3 }
 0x852   :  { %v785_v27 = vpop.f32.mrf.mxu3 }
 0x853   :  { %v789_v31 = vadd.f32 %v785_v27, %v713_v29 }
 0x85a   :  { %v787_v28 = vpop.f32.mrf.mxu3 }
 0x85b   :  { %v2588_v28 = vld [vmem:[%s3511_s17 + $0x10] sm:$0xff] }
 0x85c   :  { %1120 = vmatpush.bf16.msrb.mxu1 %v2588_v28 }
 0x864   :  { %v859_v32 = vpop.f32.mrf.mxu2 }
 0x865   :  { %v863_v33 = vadd.f32 %v859_v32, %v789_v31  ;;  %v2587_v31 = vld [vmem:[%s3511_s17 + $0x8] sm:$0xff] }
 0x866   :  { %1121 = vmatpush.bf16.msrb.mxu1 %v2587_v31 }
 0x867   :  { %v869_v35 = vadd.f32 %v3088_v38, %v863_v33  ;;  %v890_v38 = vmul.f32 %v886_v43, %v2921_v14 }
 0x869   :  { %v3117_v36 = vadd.f32 %v869_v35, %v2909_v1  ;;  %v894_v1 = vsub.f32 %v890_v38, %v892_v34  ;;  %v2586_v35 = vld [vmem:[%s3511_s17] sm:$0xff] }
 0x86a   :  { %1122 = vmatpush.bf16.msrb.mxu1 %v2586_v35 }
 0x86b   :  { %v877_v9 = vsel %vm80_vm0, %v3117_v36, 0.0  ;;  %v883_v39 = vmul.f32 %v3117_v36, %v3117_v36  ;;  %v898_v41 = vadd.f32 1e-05, %v894_v1 }
 0x86c   :  { %v861_v40 = vpop.f32.mrf.mxu2  ;;  %878 = vadd.xlane.f32.xlu2 %v877_v9 }
 0x86d   :  { %v887_v42 = vsel %vm80_vm0, %v883_v39, 0.0  ;;  %2684 = vrsqrt.f32 %v898_v41  ;;  %vm906_vm11 = vweird.f32 %v898_v41 }
 0x86e   :  { %888 = vadd.xlane.f32.xlu1 %v887_v42 }
 0x873   :  { %v2685_v48 = vpop.eup %2684 }
 0x874   :  { %v901_v52 = vmul.f32 %v2685_v48, %v898_v41  ;;  %vm907_vm10 = vweird.f32 %v2685_v48 }
 0x875   :  { %vm908_vm12 = vmor %vm906_vm11, %vm907_vm10 }
 0x876   :  { %v902_v57 = vmul.f32 %v2685_v48, %v901_v52 }
 0x878   :  { %v903_v60 = vmul.f32 0.5, %v902_v57  ;;  %v2630_v57 = vld [vmem:[%s3508_s14] ss:$0 sm:$0xff] }
 0x87a   :  { %v904_v61 = vsub.f32 1.5, %v903_v60 }
 0x87c   :  { %v905_v63 = vmul.f32 %v2685_v48, %v904_v61 }
 0x87e   :  { %v909_v4 = vsel %vm908_vm12, %v2685_v48, %v905_v63 }
 0x87f   :  { %v920_v30 = vmul.f32 %v909_v4, %v896_v6 }
 0x881   :  { %v925_v47 = vmul.f32 %v2627_v7, %v920_v30 }
 0x883   :  { %v930_v16 = vadd.f32 %v2628_v13, %v925_v47 }
 0x8df   :  { %v879_v53 = vpop.xlane.xlu2 %878 }
 0x8e0   :  { %v881_v54 = vmul.f32 %v879_v53, %v2921_v14 }
 0x8e1   :  { %v889_v55 = vpop.xlane.xlu1 %888 }
 0x8e2   :  { %v893_v0 = vmul.f32 %v881_v54, %v881_v54  ;;  %v891_v56 = vmul.f32 %v889_v55, %v2921_v14  ;;  %v897_v10 = vsub.f32 %v3117_v36, %v881_v54 }
 0x8e4   :  { %v895_v58 = vsub.f32 %v891_v56, %v893_v0 }
 0x8e6   :  { %v899_v59 = vadd.f32 1e-05, %v895_v58 }
 0x8e8   :  { %2686 = vrsqrt.f32 %v899_v59  ;;  %vm916_vm14 = vweird.f32 %v899_v59 }
 0x8ee   :  { %v2687_v62 = vpop.eup %2686 }
 0x8ef   :  { %v911_v2 = vmul.f32 %v2687_v62, %v899_v59  ;;  %vm917_vm13 = vweird.f32 %v2687_v62 }
 0x8f0   :  { %vm918_vm15 = vmor %vm916_vm14, %vm917_vm13 }
 0x8f1   :  { %v912_v3 = vmul.f32 %v2687_v62, %v911_v2 }
 0x8f3   :  { %v913_v5 = vmul.f32 0.5, %v912_v3 }
 0x8f5   :  { %v914_v49 = vsub.f32 1.5, %v913_v5 }
 0x8f7   :  { %v915_v8 = vmul.f32 %v2687_v62, %v914_v49 }
 0x8f9   :  { %v919_v11 = vsel %vm918_vm15, %v2687_v62, %v915_v8 }
 0x8fa   :  { %v921_v12 = vmul.f32 %v919_v11, %v897_v10 }
 0x8fc   :  { %v926_v15 = vmul.f32 %v2627_v7, %v921_v12  ;;  %v2631_v7 = vld [vmem:[%s3512_s18] ss:$0 sm:$0xff] }
 0x8fe   :  { %v931_v17 = vadd.f32 %v2628_v13, %v926_v15 }
 0x900   :  { %v932_v18 = vpack.c.bf16 %v931_v17, %v930_v16 }
 0x902   :  { %2369 = vmatmul.msk.bf16.vlgmr.msra.gmra.mxu3 %vm80_vm0, %v932_v18  ;;  %2378 = vmatmul.msk.bf16.vlgmr.msra.gmra.mxu0 %vm80_vm0, %v932_v18 }
 0x97f   :  { %v999_v26 = vpop.f32.mrf.mxu0 }
 0x980   :  { %v1000_v27 = vadd.f32 %v2629_v23, %v999_v26  ;;  %v2598_v26 = vld [vmem:[%s3546_s24 + $0x10] sm:$0xff] }
 0x981   :  { %1300 = vmatpush.bf16.msrb.mxu0 %v2598_v26 }
 0x982   :  { %v2379_v29 = vmul.f32 -1.442695, %v1000_v27 }
 0x984   :  { %2688 = vpow2.f32 %v2379_v29 }
 0x985   :  { %v965_v1 = vpop.f32.mrf.mxu3 }
 0x986   :  { %v966_v2 = vadd.f32 %v2630_v57, %v965_v1 }
 0x987   :  { %v1001_v32 = vpop.f32.mrf.mxu0 }
 0x988   :  { %v1002_v33 = vadd.f32 %v2629_v23, %v1001_v32  ;;  %v2594_v23 = vld [vmem:[%s3544_s2 + $0x10] sm:$0xff]  ;;  %s2779_s2 = smov 128  }
 0x989   :  { %1226 = vmatpush.bf16.msra.mxu2 %v2594_v23 }
 0x98a   :  { %v2689_v9 = vpop.eup %2688  ;;  %v2380_v39 = vmul.f32 -1.442695, %v1002_v33 }
 0x98b   :  { %v1010_v40 = vadd.f32 1.0, %v2689_v9 }
 0x98c   :  { %2690 = vpow2.f32 %v2380_v39 }
 0x98d   :  { %2692 = vrcp.f32 %v1010_v40  ;;  %v1023_v46 = vand.u32 2147483648, %v1010_v40  ;;  %vm1017_vm2 = vweird.f32 %v1010_v40  ;;  %v1021_v48 = vand.u32 2147483647, %v1010_v40  ;;  %v967_v60 = vpop.f32.mrf.mxu3 }
 0x98e   :  { %v968_v4 = vadd.f32 %v2630_v57, %v967_v60  ;;  %v2633_v60 = vld [vmem:[%s3548_s29 + $0x1] ss:$0 sm:$0xff] }
 0x98f   :  { %v1024_v53 = vor.u32 1.1754944e-38, %v1023_v46  ;;  %vm1022_vm4 = vcmp.eq.f32.partialorder %v1021_v48, 8.507059e+37 }
 0x992   :  { %v2691_v42 = vpop.eup %2690 }
 0x993   :  { %v2693_v25 = vpop.eup %2692  ;;  %v1011_v43 = vadd.f32 1.0, %v2691_v42 }
 0x994   :  { %v1013_v44 = vmul.f32 %v2693_v25, %v1010_v40  ;;  %vm1018_vm1 = vweird.f32 %v2693_v25 }
 0x995   :  { %2694 = vrcp.f32 %v1011_v43  ;;  %vm1019_vm3 = vmor %vm1017_vm2, %vm1018_vm1  ;;  %v1038_v54 = vand.u32 2147483648, %v1011_v43  ;;  %v1036_v0 = vand.u32 2147483647, %v1011_v43  ;;  %vm1032_vm6 = vweird.f32 %v1011_v43 }
 0x996   :  { %v1014_v38 = vsub.f32 1.0, %v1013_v44 }
 0x997   :  { %v1039_v59 = vor.u32 1.1754944e-38, %v1038_v54  ;;  %vm1037_vm10 = vcmp.eq.f32.partialorder %v1036_v0, 8.507059e+37 }
 0x998   :  { %v1015_v34 = vmul.f32 %v2693_v25, %v1014_v38 }
 0x99a   :  { %v1016_v41 = vadd.f32 %v2693_v25, %v1015_v34 }
 0x99b   :  { %v2695_v37 = vpop.eup %2694 }
 0x99c   :  { %v1028_v50 = vmul.f32 %v2695_v37, %v1011_v43  ;;  %v1020_v51 = vsel %vm1019_vm3, %v2693_v25, %v1016_v41  ;;  %vm1033_vm5 = vweird.f32 %v2695_v37 }
 0x99d   :  { %v1025_v56 = vsel %vm1022_vm4, %v1024_v53, %v1020_v51  ;;  %vm1034_vm7 = vmor %vm1032_vm6, %vm1033_vm5  ;;  %v2632_v53 = vld [vmem:[%s3547_s6 + $0x1] ss:$0 sm:$0xff] }
 0x99e   :  { %v1029_v52 = vsub.f32 1.0, %v1028_v50  ;;  %v1042_v61 = vmul.f32 %v1025_v56, %v1000_v27 }
 0x9a0   :  { %v1030_v55 = vmul.f32 %v2695_v37, %v1029_v52  ;;  %v1044_v5 = vmul.f32 %v1042_v61, %v966_v2 }
 0x9a2   :  { %v1031_v58 = vadd.f32 %v2695_v37, %v1030_v55 }
 0x9a4   :  { %v1035_v62 = vsel %vm1034_vm7, %v2695_v37, %v1031_v58 }
 0x9a5   :  { %v1040_v63 = vsel %vm1037_vm10, %v1039_v59, %v1035_v62 }
 0x9a6   :  { %v1043_v3 = vmul.f32 %v1040_v63, %v1002_v33 }
 0x9a8   :  { %v1045_v6 = vmul.f32 %v1043_v3, %v968_v4  ;;  %v3235_v3 = vld [vmem:[%s3502_s8 + $0x1] ss:$0 sm:$0xff]  ;;  %s3552_s8 = smov 120  }
 0x9aa   :  { %v1062_v49 = vpack.c.bf16 %v1045_v6, %v1044_v5  ;;  %v3241_v6 = vld [vmem:[%s3550_s5 + $0x1] ss:$0 sm:$0xff]  ;;  %s3555_s5 = sld [smem:[#allocation14_spill]] }
 0x9ac   :  { %1123 = vmatmul.bf16.vlgmr.msrb.gmra.mxu1 %v1062_v49  ;;  %v3246_v49 = vld [vmem:[%s3549_s4 + $0x1] ss:$0 sm:$0xff]  ;;  %s3553_s4 = smov 104  }
 0xa29   :  { %v1124_v30 = vpop.f32.mrf.mxu1 }
 0xa2a   :  { %v1125_v8 = vadd.f32 %v2631_v7, %v1124_v30 }
 0xa2c   :  { %v3184_v10 = vadd.f32 %v1125_v8, %v3092_v45 }
 0xa2e   :  { %v1135_v11 = vsel %vm80_vm0, %v3184_v10, 0.0  ;;  %v1143_v13 = vmul.f32 %v3184_v10, %v3184_v10 }
 0xa2f   :  { %1136 = vadd.xlane.f32.xlu1 %v1135_v11 }
 0xa30   :  { %v1145_v17 = vsel %vm80_vm0, %v1143_v13, 0.0 }
 0xa31   :  { %v1126_v47 = vpop.f32.mrf.mxu1 }
 0xa32   :  { %v1127_v12 = vadd.f32 %v2631_v7, %v1126_v47 }
 0xa34   :  { %v3191_v15 = vadd.f32 %v1127_v12, %v3117_v36  ;;  %v2597_v36 = vld [vmem:[%s3545_s7 + $0x18] sm:$0xff]  ;;  %s2780_s7 = smov 8  }
 0xa35   :  { %1263 = vmatpush.bf16.msrb.mxu3 %v2597_v36 }
 0xa36   :  { %v1138_v16 = vsel %vm80_vm0, %v3191_v15, 0.0  ;;  %v1144_v45 = vmul.f32 %v3191_v15, %v3191_v15 }
 0xa37   :  { %1139 = vadd.xlane.f32.xlu2 %v1138_v16  ;;  %1146 = vadd.xlane.f32.xlu1 %v1145_v17 }
 0xa38   :  { %v1148_v18 = vsel %vm80_vm0, %v1144_v45, 0.0 }
 0xa39   :  { %1149 = vadd.xlane.f32.xlu0 %v1148_v18  ;;  %1264 = vmatpush.bf16.msrb.mxu3 %v2596_v24 }
 0xaa2   :  { %v1137_v19 = vpop.xlane.xlu1 %1136 }
 0xaa3   :  { %v1141_v22 = vmul.f32 %v1137_v19, %v2921_v14 }
 0xaa5   :  { %v1153_v29 = vmul.f32 %v1141_v22, %v1141_v22  ;;  %v1157_v52 = vsub.f32 %v3184_v10, %v1141_v22 }
 0xaaa   :  { %v1140_v27 = vpop.xlane.xlu2 %1139  ;;  %v1147_v28 = vpop.xlane.xlu1 %1146 }
 0xaab   :  { %v1142_v31 = vmul.f32 %v1140_v27, %v2921_v14  ;;  %v1151_v32 = vmul.f32 %v1147_v28, %v2921_v14 }
 0xaac   :  { %v1150_v33 = vpop.xlane.xlu0 %1149 }
 0xaad   :  { %v1154_v35 = vmul.f32 %v1142_v31, %v1142_v31  ;;  %v1155_v9 = vsub.f32 %v1151_v32, %v1153_v29  ;;  %v1152_v39 = vmul.f32 %v1150_v33, %v2921_v14  ;;  %v1158_v0 = vsub.f32 %v3191_v15, %v1142_v31 }
 0xaaf   :  { %v1159_v40 = vadd.f32 1e-05, %v1155_v9  ;;  %v1156_v42 = vsub.f32 %v1152_v39, %v1154_v35 }
 0xab1   :  { %2696 = vrsqrt.f32 %v1159_v40  ;;  %v1160_v25 = vadd.f32 1e-05, %v1156_v42  ;;  %vm1167_vm12 = vweird.f32 %v1159_v40 }
 0xab3   :  { %2698 = vrsqrt.f32 %v1160_v25  ;;  %vm1177_vm15 = vweird.f32 %v1160_v25 }
 0xab7   :  { %v2697_v43 = vpop.eup %2696 }
 0xab8   :  { %v1162_v44 = vmul.f32 %v2697_v43, %v1159_v40  ;;  %vm1168_vm11 = vweird.f32 %v2697_v43 }
 0xab9   :  { %v2699_v38 = vpop.eup %2698  ;;  %vm1169_vm14 = vmor %vm1167_vm12, %vm1168_vm11 }
 0xaba   :  { %v1163_v34 = vmul.f32 %v2697_v43, %v1162_v44  ;;  %v1172_v1 = vmul.f32 %v2699_v38, %v1160_v25  ;;  %vm1178_vm13 = vweird.f32 %v2699_v38 }
 0xabb   :  { %vm1179_vm1 = vmor %vm1177_vm15, %vm1178_vm13 }
 0xabc   :  { %v1164_v41 = vmul.f32 0.5, %v1163_v34  ;;  %v1173_v37 = vmul.f32 %v2699_v38, %v1172_v1 }
 0xabe   :  { %v1165_v46 = vsub.f32 1.5, %v1164_v41  ;;  %v1174_v48 = vmul.f32 0.5, %v1173_v37 }
 0xac0   :  { %v1166_v50 = vmul.f32 %v2697_v43, %v1165_v46  ;;  %v1175_v51 = vsub.f32 1.5, %v1174_v48 }
 0xac2   :  { %v1170_v54 = vsel %vm1169_vm14, %v2697_v43, %v1166_v50  ;;  %v1176_v55 = vmul.f32 %v2699_v38, %v1175_v51 }
 0xac3   :  { %v1181_v56 = vmul.f32 %v1170_v54, %v1157_v52 }
 0xac4   :  { %v1180_v57 = vsel %vm1179_vm1, %v2699_v38, %v1176_v55 }
 0xac5   :  { %v1186_v58 = vmul.f32 %v2632_v53, %v1181_v56  ;;  %v1182_v59 = vmul.f32 %v1180_v57, %v1158_v0  ;;  %v2458_v0 = vld [vmem:[%s3503_s9 + $0x28] sm:$0xff] }
 0xac6   :  { %v1427_v56 = vpack.c.bf16 %v2458_v0, %v2458_v0 }
 0xac7   :  { %v1187_v61 = vmul.f32 %v2632_v53, %v1182_v59  ;;  %v1191_v62 = vadd.f32 %v2633_v60, %v1186_v58 }
 0xac8   :  { %v1432_v57 = vsel %vm296_vm9, %v1427_v56, 0 }
 0xac9   :  { %v1192_v63 = vadd.f32 %v2633_v60, %v1187_v61 }
 0xacb   :  { %v1193_v2 = vpack.c.bf16 %v1192_v63, %v1191_v62 }
 0xacd   :  { %2428 = vmatmul.msk.bf16.vlgmr.msra.gmra.mxu2 %vm80_vm0, %v1193_v2  ;;  %2442 = vmatmul.msk.bf16.vlgmr.msrb.gmra.mxu3 %vm80_vm0, %v1193_v2 }
 0xace   :  { %2456 = vmatmul.msk.bf16.vlgmr.msrb.gmra.mxu0 %vm80_vm0, %v1193_v2 }
 0xb4b   :  { %v1302_v4 = vpop.f32.mrf.mxu0 }
 0xb4c   :  { %v1303_v5 = vadd.f32 %v3235_v3, %v1302_v4 }
 0xb4e   :  { %v3248_v7 = vpack.c.bf16 %v1303_v5, %v1303_v5  ;;  %v2459_v5 = vld [vmem:[%s3503_s9 + $0x30] sm:$0xff] }
 0xb50   :  { %v1228_v30 = vpop.f32.mrf.mxu2  ;;  %v1266_v8 = vpop.f32.mrf.mxu3  ;;  %v1350_v11 = vsel %vm296_vm9, %v3248_v7, 0 }
 0xb51   :  { %v1229_v47 = vadd.f32 %v3241_v6, %v1228_v30  ;;  %v1267_v12 = vadd.f32 %v3246_v49, %v1266_v8  ;;  %1359 = vmatpush.bf16.msra.mxu3 %v1350_v11  ;;  %v1523_v30 = vpack.c.bf16 %v2459_v5, %v2459_v5  ;;  %v2457_v11 = vld [vmem:[%s3503_s9 + $0x20] sm:$0xff] }
 0xb53   :  { %v1233_v13 = vmul.f32 0.35355338, %v1229_v47  ;;  %v1313_v16 = vpack.c.bf16 %v1267_v12, %v1267_v12  ;;  %v3266_v27 = vpop.f32.mrf.mxu0  ;;  %v1528_v8 = vsel %vm296_vm9, %v1523_v30, 0  ;;  %v1366_v12 = vpack.c.bf16 %v2457_v11, %v2457_v11 }
 0xb55   :  { %v1312_v17 = vpack.c.bf16 %v1233_v13, %v1233_v13  ;;  %1468 = vrot.lane.b32.xlu0 %v1313_v16, %s3551_s1  ;;  %1371 = vrot.lane.b32.xlu2 %v1313_v16, %s3552_s8  ;;  %v1318_v45 = vsel %vm260_vm8, %v1313_v16, 0  ;;  %v1451_v13 = vsel %vm296_vm9, %v1366_v12, 0 }
 0xb56   :  { %1327 = vmatpush.bf16.xpose.msrb.mxu2 %v1318_v45  ;;  %1460 = vmatpush.bf16.msrb.mxu3 %v1451_v13 }
 0xb57   :  { %1368 = vrot.lane.b32.xlu1 %v1312_v17, %s3552_s8 }
 0xb58   :  { %v3263_v22 = vpop.f32.mrf.mxu2  ;;  %v1268_v47 = vpop.f32.mrf.mxu3 }
 0xb5d   :  { %1466 = vrot.lane.b32.xlu2 %v1312_v17, %s3551_s1  ;;  %2461 = vmatmul.msk.bf16.vlgmr.msrb.gmra.mxu2 %vm260_vm8, %v1312_v17 }
 0xb5e   :  { %1441 = vmatpush.bf16.msra.mxu2 %v1432_v57 }
 0xb62   :  { %1537 = vmatpush.bf16.msrb.mxu2 %v1528_v8 }
 0xbaf   :  { %v1372_v18 = vpop.permute.xlu2 %1371 }
 0xbb0   :  { %v1377_v19 = vsel %vm260_vm8, %v1372_v18, 0 }
 0xbb1   :  { %1386 = vmatpush.bf16.xpose.msra.mxu0 %v1377_v19 }
 0xbb7   :  { %v1467_v23 = vpop.permute.xlu2 %1466 }
 0xbc7   :  { %v1469_v20 = vpop.permute.xlu0 %1468 }
 0xbc8   :  { %v1474_v36 = vsel %vm260_vm8, %v1469_v20, 0 }
 0xbc9   :  { %1483 = vmatpush.bf16.xpose.msrb.mxu0 %v1474_v36  ;;  %v1369_v21 = vpop.permute.xlu1 %1368 }
 0xbca   :  { %2463 = vmatmul.msk.bf16.vlgmr.msra.gmra.mxu0 %vm260_vm8, %v1369_v21 }
 0xbda   :  { %2467 = vmatmul.msk.bf16.vlgmr.msrb.gmra.mxu0 %vm260_vm8, %v1467_v23 }
 0xbe0   :  { %v1329_v24 = vpop.f32.mrf.mxu2 }
 0xbe1   :  { %v1333_v46 = vsel %vm260_vm8, %v1329_v24, -inf }
 0xbe8   :  { %v1331_v26 = vpop.f32.mrf.mxu2 }
 0xc47   :  { %v1388_v28 = vpop.f32.mrf.mxu0 }
 0xc48   :  { %v1392_v29 = vsel %vm260_vm8, %v1388_v28, -inf }
 0xc49   :  { %1393 = vmax.xlane.f32.xlu0 %v1392_v29  ;;  %v1231_v29 = vadd.f32 %v3241_v6, %v3263_v22 }
 0xc4f   :  { %v1390_v31 = vpop.f32.mrf.mxu0 }
 0xc57   :  { %v1485_v32 = vpop.f32.mrf.mxu0 }
 0xc58   :  { %v1489_v33 = vsel %vm260_vm8, %v1485_v32, -inf }
 0xc59   :  { %1490 = vmax.xlane.f32.xlu1 %v1489_v33  ;;  %v1234_v33 = vmul.f32 0.35355338, %v1231_v29 }
 0xc5d   :  { %1405 = vrot.lane.b32.xlu0 %v3248_v7, %s3552_s8 }
 0xc5f   :  { %v1487_v35 = vpop.f32.mrf.mxu0 }
 0xc60   :  { %v1622_v35 = vpack.c.bf16 %v1234_v33, %v1234_v33 }
 0xcbc   :  { %v1394_v9 = vpop.xlane.xlu0 %1393 }
 0xcbd   :  { %v1395_v39 = vsub.f32 %v1388_v28, %v1394_v9 }
 0xcbf   :  { %v1396_v40 = vmul.f32 1.442695, %v1395_v39 }
 0xcc1   :  { %2700 = vpow2.f32 %v1396_v40 }
 0xcc7   :  { %v2701_v42 = vpop.eup %2700 }
 0xcc8   :  { %v1398_v25 = vsel %vm260_vm8, %v2701_v42, 0.0 }
 0xcc9   :  { %1399 = vadd.xlane.f32.xlu2 %v1398_v25 }
 0xccc   :  { %v1491_v43 = vpop.xlane.xlu1 %1490 }
 0xccd   :  { %v1492_v44 = vsub.f32 %v1485_v32, %v1491_v43 }
 0xccf   :  { %v1493_v38 = vmul.f32 1.442695, %v1492_v44  ;;  %v1406_v34 = vpop.permute.xlu0 %1405 }
 0xcd0   :  { %v1411_v1 = vsel %vm296_vm9, %v1406_v34, 0 }
 0xcd1   :  { %2702 = vpow2.f32 %v1493_v38  ;;  %1420 = vmatpush.bf16.msra.mxu1 %v1411_v1 }
 0xcd7   :  { %v2703_v41 = vpop.eup %2702 }
 0xcd8   :  { %v1495_v37 = vsel %vm260_vm8, %v2703_v41, 0.0 }
 0xcd9   :  { %1496 = vadd.xlane.f32.xlu1 %v1495_v37 }
 0xce1   :  { %1501 = vrot.lane.b32.xlu2 %v3248_v7, %s3551_s1  ;;  %1334 = vmax.xlane.f32.xlu1 %v1333_v46 }
 0xce9   :  { %1544 = vrot.lane.b32.xlu2 %v1312_v17, %s3553_s4 }
 0xcfa   :  { %1546 = vrot.lane.b32.xlu1 %v1313_v16, %s3553_s4  ;;  %v1269_v16 = vadd.f32 %v3246_v49, %v1268_v47 }
 0xcfc   :  { %v3297_v17 = vpack.c.bf16 %v1269_v16, %v1269_v16 }
 0xcfe   :  { %v1628_v19 = vsel %vm260_vm8, %v3297_v17, 0 }
 0xd3c   :  { %v1400_v48 = vpop.xlane.xlu2 %1399 }
 0xd3d   :  { %2704 = vrcp.f32 %v1400_v48 }
 0xd43   :  { %v2705_v50 = vpop.eup %2704 }
 0xd44   :  { %v1402_v51 = vmul.f32 %v2705_v50, %v2701_v42  ;;  %v1502_v52 = vpop.permute.xlu2 %1501  ;;  %v1305_v42 = vadd.f32 %v3235_v3, %v3266_v27 }
 0xd45   :  { %v1507_v53 = vsel %vm296_vm9, %v1502_v52, 0 }
 0xd46   :  { %v1403_v54 = vpack.c.bf16 %v1402_v51, %v1402_v51  ;;  %1516 = vmatpush.bf16.msrb.mxu1 %v1507_v53  ;;  %v3314_v6 = vpack.c.bf16 %v1305_v42, %v1305_v42 }
 0xd48   :  { %2464 = vmatmul.msk.bf16.vlgmr.msra.gmra.mxu1 %vm260_vm8, %v1403_v54  ;;  %v1660_v44 = vsel %vm296_vm9, %v3314_v6, 0 }
 0xd4c   :  { %v1497_v55 = vpop.xlane.xlu1 %1496  ;;  %v1545_v37 = vpop.permute.xlu2 %1544 }
 0xd4d   :  { %2706 = vrcp.f32 %v1497_v55 }
 0xd53   :  { %v2707_v58 = vpop.eup %2706 }
 0xd54   :  { %v1499_v59 = vmul.f32 %v2707_v58, %v2703_v41  ;;  %v1335_v60 = vpop.xlane.xlu1 %1334 }
 0xd55   :  { %v1336_v61 = vsub.f32 %v1329_v24, %v1335_v60 }
 0xd56   :  { %v1500_v62 = vpack.c.bf16 %v1499_v59, %v1499_v59 }
 0xd57   :  { %v1337_v63 = vmul.f32 1.442695, %v1336_v61 }
 0xd58   :  { %2468 = vmatmul.msk.bf16.vlgmr.msrb.gmra.mxu1 %vm260_vm8, %v1500_v62 }
 0xd59   :  { %2708 = vpow2.f32 %v1337_v63 }
 0xd5f   :  { %v2709_v2 = vpop.eup %2708 }
 0xd60   :  { %v1339_v4 = vsel %vm260_vm8, %v2709_v2, 0.0 }
 0xd61   :  { %1340 = vadd.xlane.f32.xlu0 %v1339_v4 }
 0xd6c   :  { %v1547_v26 = vpop.permute.xlu1 %1546 }
 0xd6d   :  { %v1552_v32 = vsel %vm260_vm8, %v1547_v26, 0 }
 0xdc5   :  { %v1422_v45 = vpop.f32.mrf.mxu1 }
 0xdc6   :  { %v1426_v18 = vpack.c.bf16 %v1422_v45, %v1422_v45 }
 0xdc8   :  { %2465 = vmatmul.msk.bf16.vlgmr.msra.gmra.mxu2 %vm260_vm8, %v1426_v18 }
 0xdc9   :  { %1637 = vmatpush.bf16.xpose.msra.mxu2 %v1628_v19 }
 0xdcd   :  { %v1424_v20 = vpop.f32.mrf.mxu1 }
 0xdd4   :  { %v1341_v36 = vpop.xlane.xlu0 %1340 }
 0xdd5   :  { %2710 = vrcp.f32 %v1341_v36  ;;  %v1518_v21 = vpop.f32.mrf.mxu1 }
 0xdd6   :  { %v1522_v23 = vpack.c.bf16 %v1518_v21, %v1518_v21 }
 0xdd8   :  { %2469 = vmatmul.msk.bf16.vlgmr.msrb.gmra.mxu2 %vm260_vm8, %v1522_v23  ;;  %v2460_v23 = vld [vmem:[%s3503_s9 + $0x38] sm:$0xff] }
 0xdd9   :  { %1746 = vmatpush.bf16.msrb.mxu2 %v1432_v57 }
 0xddb   :  { %v2711_v49 = vpop.eup %2710 }
 0xddc   :  { %v1343_v24 = vmul.f32 %v2711_v49, %v2709_v2  ;;  %v1601_v49 = vpack.c.bf16 %v2460_v23, %v2460_v23 }
 0xddd   :  { %v1520_v28 = vpop.f32.mrf.mxu1 }
 0xdde   :  { %v1344_v31 = vpack.c.bf16 %v1343_v24, %v1343_v24  ;;  %v3351_v24 = vsel %vm296_vm9, %v1601_v49, 0 }
 0xddf   :  { %1615 = vmatpush.bf16.msra.mxu1 %v3351_v24 }
 0xde0   :  { %2462 = vmatmul.msk.bf16.vlgmr.msra.gmra.mxu3 %vm260_vm8, %v1344_v31 }
 0xde1   :  { %1561 = vmatpush.bf16.xpose.msra.mxu3 %v1552_v32 }
 0xde8   :  { %2473 = vmatmul.msk.bf16.vlgmr.msra.gmra.mxu2 %vm260_vm8, %v1622_v35 }
 0xde9   :  { %1835 = vmatpush.bf16.msra.mxu2 %v1528_v8 }
 0xe4b   :  { %v3308_v9 = vpop.f32.mrf.mxu2 }
 0xe53   :  { %v1445_v39 = vpop.f32.mrf.mxu2 }
 0xe5b   :  { %v3310_v40 = vpop.f32.mrf.mxu2 }
 0xe63   :  { %v1361_v22 = vpop.f32.mrf.mxu3  ;;  %v1541_v25 = vpop.f32.mrf.mxu2 }
 0xe64   :  { %v1365_v43 = vpack.c.bf16 %v1361_v22, %v1361_v22 }
 0xe66   :  { %2466 = vmatmul.msk.bf16.vlgmr.msrb.gmra.mxu3 %vm260_vm8, %v1365_v43 }
 0xe67   :  { %1669 = vmatpush.bf16.msrb.mxu3 %v1660_v44 }
 0xe6b   :  { %v1363_v38 = vpop.f32.mrf.mxu3  ;;  %v1639_v34 = vpop.f32.mrf.mxu2 }
 0xe6c   :  { %v1643_v1 = vsel %vm260_vm8, %v1639_v34, -inf }
 0xe6d   :  { %1644 = vmax.xlane.f32.xlu2 %v1643_v1 }
 0xe73   :  { %v1641_v41 = vpop.f32.mrf.mxu2 }
 0xe74   :  { %v3368_v41 = vld [vmem:[%s3504_s10 + $0x1] ss:$0 sm:$0xff] }
 0xe76   :  { %2470 = vmatmul.msk.bf16.vlgmr.msra.gmra.mxu3 %vm260_vm8, %v1545_v37 }
 0xe77   :  { %1762 = vmatpush.bf16.msra.mxu3 %v1451_v13 }
 0xe85   :  { %1680 = vrot.lane.b32.xlu2 %v3297_v17, %s3552_s8 }
 0xe8d   :  { %1844 = vrot.lane.b32.xlu2 %v3297_v17, %s3553_s4 }
 0xe95   :  { %1842 = vrot.lane.b32.xlu2 %v1622_v35, %s3553_s4 }
 0xee0   :  { %v1645_v3 = vpop.xlane.xlu2 %1644 }
 0xee1   :  { %v1646_v27 = vsub.f32 %v1639_v34, %v1645_v3 }
 0xee3   :  { %v1647_v46 = vmul.f32 1.442695, %v1646_v27 }
 0xee5   :  { %2712 = vpow2.f32 %v1647_v46 }
 0xee8   :  { %v1681_v0 = vpop.permute.xlu2 %1680 }
 0xee9   :  { %v3326_v48 = vpop.f32.mrf.mxu3 }
 0xeea   :  { %v1463_v34 = vadd.f32 %v3326_v48, %v3308_v9 }
 0xeeb   :  { %v2713_v50 = vpop.eup %2712 }
 0xeec   :  { %v1649_v51 = vsel %vm260_vm8, %v2713_v50, 0.0  ;;  %v1543_v1 = vadd.f32 %v3310_v40, %v1463_v34 }
 0xeed   :  { %1650 = vadd.xlane.f32.xlu1 %v1649_v51 }
 0xef0   :  { %v1845_v59 = vpop.permute.xlu2 %1844 }
 0xef1   :  { %v1464_v52 = vpop.f32.mrf.mxu3  ;;  %v1850_v61 = vsel %vm260_vm8, %v1845_v59, 0 }
 0xef8   :  { %v1843_v16 = vpop.permute.xlu2 %1842 }
 0xef9   :  { %v1563_v53 = vpop.f32.mrf.mxu3 }
 0xefa   :  { %v1567_v54 = vsel %vm260_vm8, %v1563_v53, -inf }
 0xefb   :  { %1568 = vmax.xlane.f32.xlu0 %v1567_v54 }
 0xf01   :  { %v1565_v55 = vpop.f32.mrf.mxu3 }
 0xf06   :  { %1677 = vrot.lane.b32.xlu1 %v1622_v35, %s3552_s8 }
 0xf60   :  { %v1651_v56 = vpop.xlane.xlu1 %1650 }
 0xf61   :  { %2714 = vrcp.f32 %v1651_v56 }
 0xf67   :  { %v2715_v57 = vpop.eup %2714 }
 0xf68   :  { %v1653_v58 = vmul.f32 %v2715_v57, %v2713_v50 }
 0xf6a   :  { %v1654_v60 = vpack.c.bf16 %v1653_v58, %v1653_v58 }
 0xf6c   :  { %2474 = vmatmul.msk.bf16.vlgmr.msrb.gmra.mxu3 %vm260_vm8, %v1654_v60 }
 0xf6d   :  { %1859 = vmatpush.bf16.xpose.msrb.mxu3 %v1850_v61 }
 0xf6e   :  { %v1569_v62 = vpop.xlane.xlu0 %1568 }
 0xf6f   :  { %v1570_v63 = vsub.f32 %v1563_v53, %v1569_v62 }
 0xf71   :  { %v1571_v2 = vmul.f32 1.442695, %v1570_v63 }
 0xf73   :  { %2716 = vpow2.f32 %v1571_v2 }
 0xf78   :  { %v1678_v36 = vpop.permute.xlu1 %1677 }
 0xf79   :  { %v2717_v4 = vpop.eup %2716 }
 0xf7a   :  { %v1573_v5 = vsel %vm260_vm8, %v2717_v4, 0.0 }
 0xf7b   :  { %1574 = vadd.xlane.f32.xlu0 %v1573_v5 }
 0xf8f   :  { %1579 = vrot.lane.b32.xlu0 %v3248_v7, %s3553_s4  ;;  %v1686_v7 = vsel %vm260_vm8, %v1681_v0, 0 }
 0xf97   :  { %1770 = vrot.lane.b32.xlu0 %v3297_v17, %s3551_s1 }
 0xf9f   :  { %1768 = vrot.lane.b32.xlu0 %v1622_v35, %s3551_s1 }
 0xfee   :  { %v1575_v11 = vpop.xlane.xlu0 %1574 }
 0xfef   :  { %v1671_v30 = vpop.f32.mrf.mxu3  ;;  %2718 = vrcp.f32 %v1575_v11 }
 0xff0   :  { %v1675_v8 = vpack.c.bf16 %v1671_v30, %v1671_v30 }
 0xff2   :  { %2478 = vmatmul.msk.bf16.vlgmr.msra.gmra.mxu3 %vm260_vm8, %v1675_v8 }
 0xff5   :  { %v2719_v12 = vpop.eup %2718 }
 0xff6   :  { %v1577_v13 = vmul.f32 %v2719_v12, %v2717_v4 }
 0xff7   :  { %v1673_v47 = vpop.f32.mrf.mxu3 }
 0xff8   :  { %v1578_v17 = vpack.c.bf16 %v1577_v13, %v1577_v13 }
0x1001   :  { %v1580_v45 = vpop.permute.xlu0 %1579 }
0x1002   :  { %v1585_v18 = vsel %vm296_vm9, %v1580_v45, 0  ;;  %2482 = vmatmul.msk.bf16.vlgmr.msrb.gmra.mxu3 %vm260_vm8, %v1843_v16 }
0x1003   :  { %1594 = vmatpush.bf16.msra.mxu0 %v1585_v18 }
0x1006   :  { %2471 = vmatmul.msk.bf16.vlgmr.msra.gmra.mxu0 %vm260_vm8, %v1578_v17 }
0x1007   :  { %1695 = vmatpush.bf16.xpose.msrb.mxu0 %v1686_v7 }
0x1009   :  { %v1771_v19 = vpop.permute.xlu0 %1770 }
0x100a   :  { %v1776_v20 = vsel %vm260_vm8, %v1771_v19, 0 }
0x100f   :  { %1785 = vmatpush.bf16.xpose.msra.mxu0 %v1776_v20 }
0x1011   :  { %v1769_v21 = vpop.permute.xlu0 %1768 }
0x1016   :  { %2475 = vmatmul.msk.bf16.vlgmr.msrb.gmra.mxu0 %vm260_vm8, %v1678_v36 }
0x1026   :  { %2479 = vmatmul.msk.bf16.vlgmr.msra.gmra.mxu0 %vm260_vm8, %v1769_v21 }
0x1075   :  { %v3354_v26 = vpop.f32.mrf.mxu3 }
0x107d   :  { %v1766_v28 = vpop.f32.mrf.mxu3 }
0x1083   :  { %v1596_v29 = vpop.f32.mrf.mxu0 }
0x1084   :  { %v1600_v31 = vpack.c.bf16 %v1596_v29, %v1596_v29 }
0x1085   :  { %v1861_v32 = vpop.f32.mrf.mxu3 }
0x1086   :  { %2472 = vmatmul.msk.bf16.vlgmr.msra.gmra.mxu1 %vm260_vm8, %v1600_v31  ;;  %v1865_v33 = vsel %vm260_vm8, %v1861_v32, -inf }
0x1087   :  { %1866 = vmax.xlane.f32.xlu2 %v1865_v33 }
0x108b   :  { %v1598_v35 = vpop.f32.mrf.mxu0 }
0x108d   :  { %v1863_v39 = vpop.f32.mrf.mxu3 }
0x1093   :  { %v1697_v42 = vpop.f32.mrf.mxu0 }
0x1094   :  { %v1701_v22 = vsel %vm260_vm8, %v1697_v42, -inf }
0x1095   :  { %1702 = vmax.xlane.f32.xlu1 %v1701_v22 }
0x109b   :  { %v1699_v25 = vpop.f32.mrf.mxu0 }
0x10a3   :  { %v1787_v43 = vpop.f32.mrf.mxu0 }
0x10a4   :  { %v1791_v44 = vsel %vm260_vm8, %v1787_v43, -inf }
0x10a5   :  { %1792 = vmax.xlane.f32.xlu0 %v1791_v44 }
0x10ab   :  { %v1789_v38 = vpop.f32.mrf.mxu0 }
0x10b9   :  { %1714 = vrot.lane.b32.xlu0 %v3314_v6, %s3552_s8 }
0x10fa   :  { %v1867_v54 = vpop.xlane.xlu2 %1866 }
0x10fb   :  { %v1868_v56 = vsub.f32 %v1861_v32, %v1867_v54 }
0x1103   :  { %v1617_v37 = vpop.f32.mrf.mxu1 }
0x1104   :  { %v1621_v3 = vadd.f32 %v1617_v37, %v1543_v1 }
0x1106   :  { %v1921_v27 = vadd.f32 %v3368_v41, %v1621_v3 }
0x1108   :  { %v3372_v46 = vadd.f32 %v1921_v27, %v3184_v10  ;;  %v1703_v50 = vpop.xlane.xlu1 %1702  ;;  %v1869_v10 = vmul.f32 1.442695, %v1868_v56 }
0x1109   :  { %v1704_v51 = vsub.f32 %v1697_v42, %v1703_v50 }
0x110a   :  { %v1929_v52 = vsel %vm80_vm0, %v3372_v46, 0.0  ;;  %v1937_v2 = vmul.f32 %v3372_v46, %v3372_v46 }
0x110b   :  { %v1705_v9 = vmul.f32 1.442695, %v1704_v51  ;;  %v1619_v48 = vpop.f32.mrf.mxu1  ;;  %1930 = vadd.xlane.f32.xlu0 %v1929_v52 }
0x110c   :  { %v1939_v4 = vsel %vm80_vm0, %v1937_v2, 0.0 }
0x110d   :  { %2720 = vpow2.f32 %v1705_v9 }
0x1113   :  { %v2721_v40 = vpop.eup %2720 }
0x1114   :  { %v1707_v53 = vsel %vm260_vm8, %v2721_v40, 0.0 }
0x1115   :  { %1708 = vadd.xlane.f32.xlu1 %v1707_v53  ;;  %v2603_v53 = vld [vmem:[%s3509_s15 + $0x18] sm:$0xff] }
0x1116   :  { %2055 = vmatpush.bf16.msra.mxu3 %v2603_v53 }
0x1118   :  { %v1793_v55 = vpop.xlane.xlu0 %1792 }
0x1119   :  { %v1794_v0 = vsub.f32 %v1787_v43, %v1793_v55  ;;  %v2600_v55 = vld [vmem:[%s3507_s13 + $0x10] sm:$0xff] }
0x111b   :  { %v1795_v57 = vmul.f32 1.442695, %v1794_v0  ;;  %v2602_v0 = vld [vmem:[%s3509_s15 + $0x10] sm:$0xff] }
0x111c   :  { %2056 = vmatpush.bf16.msra.mxu3 %v2602_v0 }
0x111d   :  { %2722 = vpow2.f32 %v1795_v57 }
0x111e   :  { %2724 = vpow2.f32 %v1869_v10 }
0x1123   :  { %v2723_v58 = vpop.eup %2722 }
0x1124   :  { %v1797_v59 = vsel %vm260_vm8, %v2723_v58, 0.0  ;;  %v2725_v60 = vpop.eup %2724 }
0x1125   :  { %1798 = vadd.xlane.f32.xlu2 %v1797_v59  ;;  %v1871_v63 = vsel %vm260_vm8, %v2725_v60, 0.0 }
0x112b   :  { %v1715_v61 = vpop.permute.xlu0 %1714 }
0x112c   :  { %v1720_v62 = vsel %vm296_vm9, %v1715_v61, 0 }
0x112d   :  { %1729 = vmatpush.bf16.msrb.mxu1 %v1720_v62  ;;  %1872 = vadd.xlane.f32.xlu2 %v1871_v63 }
0x112e   :  { %1803 = vrot.lane.b32.xlu1 %v3314_v6, %s3551_s1 }
0x1145   :  { %1877 = vrot.lane.b32.xlu2 %v3314_v6, %s3553_s4 }
0x116e   :  { %1940 = vadd.xlane.f32.xlu2 %v1939_v4 }
0x117e   :  { %v1931_v50 = vpop.xlane.xlu0 %1930 }
0x117f   :  { %v1935_v52 = vmul.f32 %v1931_v50, %v2921_v14 }
0x1188   :  { %v1709_v5 = vpop.xlane.xlu1 %1708 }
0x1189   :  { %2726 = vrcp.f32 %v1709_v5 }
0x118f   :  { %v2727_v30 = vpop.eup %2726 }
0x1190   :  { %v1711_v8 = vmul.f32 %v2727_v30, %v2721_v40  ;;  %v2601_v40 = vld [vmem:[%s3507_s13 + $0x18] sm:$0xff] }
0x1192   :  { %v1712_v11 = vpack.c.bf16 %v1711_v8, %v1711_v8 }
0x1194   :  { %2476 = vmatmul.msk.bf16.vlgmr.msrb.gmra.mxu1 %vm260_vm8, %v1712_v11 }
0x1198   :  { %v1799_v47 = vpop.xlane.xlu2 %1798 }
0x1199   :  { %2728 = vrcp.f32 %v1799_v47 }
0x119f   :  { %v2729_v12 = vpop.eup %2728 }
0x11a0   :  { %v1801_v13 = vmul.f32 %v2729_v12, %v2723_v58  ;;  %v1804_v16 = vpop.permute.xlu1 %1803  ;;  %v1873_v45 = vpop.xlane.xlu2 %1872 }
0x11a1   :  { %v1809_v6 = vsel %vm296_vm9, %v1804_v16, 0  ;;  %2730 = vrcp.f32 %v1873_v45  ;;  %v2638_v45 = vld [vmem:[%s3505_s11 + $0x1] ss:$0 sm:$0xff]  ;;  %s3554_s11 = sld [smem:[#allocation13_spill]] }
0x11a2   :  { %v1802_v18 = vpack.c.bf16 %v1801_v13, %v1801_v13  ;;  %1818 = vmatpush.bf16.msra.mxu1 %v1809_v6  ;;  %v1951_v13 = vsub.f32 %v3372_v46, %v1935_v52 }
0x11a5   :  { %2480 = vmatmul.msk.bf16.vlgmr.msra.gmra.mxu1 %vm260_vm8, %v1802_v18 }
0x11a6   :  { %1909 = vmatpush.bf16.msrb.mxu1 %v3351_v24 }
0x11a7   :  { %v2731_v7 = vpop.eup %2730 }
0x11a8   :  { %v1875_v17 = vmul.f32 %v2731_v7, %v2725_v60  ;;  %v1878_v19 = vpop.permute.xlu2 %1877 }
0x11a9   :  { %v1883_v20 = vsel %vm296_vm9, %v1878_v19, 0  ;;  %v2639_v19 = vld [vmem:[%s3506_s12 + $0x1] ss:$0 sm:$0xff]  ;;  %s2296_s12 = sshll.u32 %s2778_s28, 4  ;;  %s2297_s12 = int_to_ptr.vmem [resolvable:$true] %s2296_s12 }
0x11aa   :  { %v1876_v36 = vpack.c.bf16 %v1875_v17, %v1875_v17  ;;  %1892 = vmatpush.bf16.msrb.mxu0 %v1883_v20 }
0x11ad   :  { %2483 = vmatmul.msk.bf16.vlgmr.msrb.gmra.mxu0 %vm260_vm8, %v1876_v36 }
0x11e1   :  { %v1941_v51 = vpop.xlane.xlu2 %1940 }
0x1211   :  { %v1731_v21 = vpop.f32.mrf.mxu1 }
0x1212   :  { %v1735_v23 = vpack.c.bf16 %v1731_v21, %v1731_v21 }
0x1214   :  { %2477 = vmatmul.msk.bf16.vlgmr.msrb.gmra.mxu2 %vm260_vm8, %v1735_v23 }
0x1215   :  { %2019 = vmatpush.bf16.msrb.mxu2 %v2601_v40 }
0x1219   :  { %v1733_v49 = vpop.f32.mrf.mxu1  ;;  %2020 = vmatpush.bf16.msrb.mxu2 %v2600_v55 }
0x1222   :  { %v1820_v28 = vpop.f32.mrf.mxu1 }
0x1223   :  { %v1824_v29 = vpack.c.bf16 %v1820_v28, %v1820_v28 }
0x1225   :  { %2481 = vmatmul.msk.bf16.vlgmr.msra.gmra.mxu2 %vm260_vm8, %v1824_v29  ;;  %v2611_v29 = vld [vmem:[%s3511_s17 + $0x78] sm:$0xff] }
0x1226   :  { %2176 = vmatpush.bf16.msra.mxu0 %v2611_v29 }
0x122a   :  { %v1822_v24 = vpop.f32.mrf.mxu1  ;;  %v1894_v31 = vpop.f32.mrf.mxu0 }
0x122b   :  { %v1898_v32 = vpack.c.bf16 %v1894_v31, %v1894_v31  ;;  %v2610_v24 = vld [vmem:[%s3511_s17 + $0x70] sm:$0xff]  ;;  %v2609_v31 = vld [vmem:[%s3511_s17 + $0x68] sm:$0xff] }
0x122c   :  { %2177 = vmatpush.bf16.msra.mxu0 %v2610_v24 }
0x122d   :  { %2484 = vmatmul.msk.bf16.vlgmr.msrb.gmra.mxu1 %vm260_vm8, %v1898_v32  ;;  %v2608_v32 = vld [vmem:[%s3511_s17 + $0x60] sm:$0xff] }
0x1230   :  { %2178 = vmatpush.bf16.msra.mxu0 %v2609_v31 }
0x1232   :  { %v1896_v33 = vpop.f32.mrf.mxu0 }
0x1233   :  { %v2641_v33 = vld [vmem:[%s3510_s16 + $0x1] ss:$0 sm:$0xff] }
0x1234   :  { %2179 = vmatpush.bf16.msra.mxu0 %v2608_v32 }
0x1297   :  { %v1748_v35 = vpop.f32.mrf.mxu2 }
0x1298   :  { %v1765_v42 = vadd.f32 %v3354_v26, %v1748_v35  ;;  %v2607_v35 = vld [vmem:[%s3511_s17 + $0x58] sm:$0xff] }
0x1299   :  { %2180 = vmatpush.bf16.msra.mxu0 %v2607_v35 }
0x129f   :  { %v1750_v39 = vpop.f32.mrf.mxu2 }
0x12a8   :  { %v1837_v22 = vpop.f32.mrf.mxu2 }
0x12a9   :  { %v1841_v25 = vadd.f32 %v1837_v22, %v1765_v42  ;;  %v2606_v22 = vld [vmem:[%s3511_s17 + $0x50] sm:$0xff] }
0x12aa   :  { %v1911_v43 = vpop.f32.mrf.mxu1  ;;  %2181 = vmatpush.bf16.msra.mxu0 %v2606_v22 }
0x12ab   :  { %v1915_v44 = vadd.f32 %v1911_v43, %v1841_v25  ;;  %v2605_v43 = vld [vmem:[%s3511_s17 + $0x48] sm:$0xff] }
0x12ad   :  { %v1922_v38 = vadd.f32 %v3368_v41, %v1915_v44  ;;  %v1945_v41 = vmul.f32 %v1941_v51, %v2921_v14 }
0x12ae   :  { %2182 = vmatpush.bf16.msra.mxu0 %v2605_v43 }
0x12af   :  { %v3399_v34 = vadd.f32 %v1922_v38, %v3191_v15  ;;  %v1947_v15 = vmul.f32 %v1935_v52, %v1935_v52 }
0x12b0   :  { %v1839_v1 = vpop.f32.mrf.mxu2 }
0x12b1   :  { %v1932_v37 = vsel %vm80_vm0, %v3399_v34, 0.0  ;;  %v1938_v3 = vmul.f32 %v3399_v34, %v3399_v34  ;;  %v1949_v9 = vsub.f32 %v1945_v41, %v1947_v15  ;;  %v2604_v1 = vld [vmem:[%s3511_s17 + $0x40] sm:$0xff] }
0x12b2   :  { %v1913_v27 = vpop.f32.mrf.mxu1  ;;  %1933 = vadd.xlane.f32.xlu1 %v1932_v37  ;;  %2183 = vmatpush.bf16.msra.mxu0 %v2604_v1 }
0x12b3   :  { %v1942_v26 = vsel %vm80_vm0, %v1938_v3, 0.0  ;;  %v1953_v48 = vadd.f32 1e-05, %v1949_v9 }
0x12b4   :  { %1943 = vadd.xlane.f32.xlu0 %v1942_v26 }
0x12b5   :  { %2732 = vrsqrt.f32 %v1953_v48  ;;  %vm1961_vm9 = vweird.f32 %v1953_v48 }
0x12bb   :  { %v2733_v54 = vpop.eup %2732 }
0x12bc   :  { %v1956_v56 = vmul.f32 %v2733_v54, %v1953_v48  ;;  %vm1962_vm8 = vweird.f32 %v2733_v54 }
0x12bd   :  { %vm1963_vm2 = vmor %vm1961_vm9, %vm1962_vm8 }
0x12be   :  { %v1957_v61 = vmul.f32 %v2733_v54, %v1956_v56 }
0x12c0   :  { %v1958_v2 = vmul.f32 0.5, %v1957_v61  ;;  %v2640_v61 = vld [vmem:[%s3508_s14 + $0x1] ss:$0 sm:$0xff] }
0x12c2   :  { %v1959_v4 = vsub.f32 1.5, %v1958_v2 }
0x12c4   :  { %v1960_v30 = vmul.f32 %v2733_v54, %v1959_v4 }
0x12c6   :  { %v1964_v47 = vsel %vm1963_vm2, %v2733_v54, %v1960_v30 }
0x12c7   :  { %v1975_v6 = vmul.f32 %v1964_v47, %v1951_v13 }
0x12c9   :  { %v1980_v20 = vmul.f32 %v2638_v45, %v1975_v6 }
0x12cb   :  { %v1985_v23 = vadd.f32 %v2639_v19, %v1980_v20 }
0x1325   :  { %v1934_v57 = vpop.xlane.xlu1 %1933 }
0x1326   :  { %v1936_v10 = vmul.f32 %v1934_v57, %v2921_v14 }
0x1327   :  { %v1944_v58 = vpop.xlane.xlu0 %1943 }
0x1328   :  { %v1948_v59 = vmul.f32 %v1936_v10, %v1936_v10  ;;  %v1946_v60 = vmul.f32 %v1944_v58, %v2921_v14  ;;  %v1952_v7 = vsub.f32 %v3399_v34, %v1936_v10 }
0x132a   :  { %v1950_v62 = vsub.f32 %v1946_v60, %v1948_v59 }
0x132c   :  { %v1954_v63 = vadd.f32 1e-05, %v1950_v62 }
0x132e   :  { %2734 = vrsqrt.f32 %v1954_v63  ;;  %vm1971_vm4 = vweird.f32 %v1954_v63 }
0x1334   :  { %v2735_v5 = vpop.eup %2734 }
0x1335   :  { %v1966_v8 = vmul.f32 %v2735_v5, %v1954_v63  ;;  %vm1972_vm3 = vweird.f32 %v2735_v5 }
0x1336   :  { %vm1973_vm5 = vmor %vm1971_vm4, %vm1972_vm3 }
0x1337   :  { %v1967_v11 = vmul.f32 %v2735_v5, %v1966_v8 }
0x1339   :  { %v1968_v12 = vmul.f32 0.5, %v1967_v11 }
0x133b   :  { %v1969_v16 = vsub.f32 1.5, %v1968_v12 }
0x133d   :  { %v1970_v18 = vmul.f32 %v2735_v5, %v1969_v16 }
0x133f   :  { %v1974_v17 = vsel %vm1973_vm5, %v2735_v5, %v1970_v18 }
0x1340   :  { %v1976_v36 = vmul.f32 %v1974_v17, %v1952_v7 }
0x1342   :  { %v1981_v21 = vmul.f32 %v2638_v45, %v1976_v36  ;;  %v2642_v45 = vld [vmem:[%s3512_s18 + $0x1] ss:$0 sm:$0xff] }
0x1344   :  { %v1986_v49 = vadd.f32 %v2639_v19, %v1981_v21 }
0x1346   :  { %v1987_v28 = vpack.c.bf16 %v1986_v49, %v1985_v23 }
0x1348   :  { %2501 = vmatmul.msk.bf16.vlgmr.msrb.gmra.mxu2 %vm80_vm0, %v1987_v28  ;;  %2515 = vmatmul.msk.bf16.vlgmr.msra.gmra.mxu3 %vm80_vm0, %v1987_v28 }
0x13cb   :  { %v2058_v39 = vpop.f32.mrf.mxu3  ;;  %v2022_v9 = vpop.f32.mrf.mxu2 }
0x13cc   :  { %v2059_v42 = vadd.f32 %v2641_v33, %v2058_v39  ;;  %v2023_v8 = vadd.f32 %v2640_v61, %v2022_v9 }
0x13ce   :  { %v2516_v25 = vmul.f32 -1.442695, %v2059_v42 }
0x13d0   :  { %2736 = vpow2.f32 %v2516_v25  ;;  %v2612_v25 = vld [vmem:[%s3515_s21] sm:$0xff] }
0x13d3   :  { %v2060_v44 = vpop.f32.mrf.mxu3  ;;  %v2024_v63 = vpop.f32.mrf.mxu2 }
0x13d4   :  { %v2061_v38 = vadd.f32 %v2641_v33, %v2060_v44  ;;  %v2025_v11 = vadd.f32 %v2640_v61, %v2024_v63 }
0x13d6   :  { %v2737_v37 = vpop.eup %2736  ;;  %v2517_v3 = vmul.f32 -1.442695, %v2061_v38 }
0x13d7   :  { %v2069_v27 = vadd.f32 1.0, %v2737_v37 }
0x13d8   :  { %2738 = vpow2.f32 %v2517_v3 }
0x13d9   :  { %2740 = vrcp.f32 %v2069_v27  ;;  %v2082_v53 = vand.u32 2147483648, %v2069_v27  ;;  %vm2076_vm7 = vweird.f32 %v2069_v27  ;;  %v2080_v54 = vand.u32 2147483647, %v2069_v27 }
0x13db   :  { %v2083_v57 = vor.u32 1.1754944e-38, %v2082_v53  ;;  %vm2081_vm11 = vcmp.eq.f32.partialorder %v2080_v54, 8.507059e+37 }
0x13de   :  { %v2739_v26 = vpop.eup %2738 }
0x13df   :  { %v2741_v50 = vpop.eup %2740  ;;  %v2070_v51 = vadd.f32 1.0, %v2739_v26 }
0x13e0   :  { %v2072_v52 = vmul.f32 %v2741_v50, %v2069_v27  ;;  %vm2077_vm6 = vweird.f32 %v2741_v50 }
0x13e1   :  { %2742 = vrcp.f32 %v2070_v51  ;;  %vm2078_vm10 = vmor %vm2076_vm7, %vm2077_vm6  ;;  %v2097_v10 = vand.u32 2147483648, %v2070_v51  ;;  %v2095_v59 = vand.u32 2147483647, %v2070_v51  ;;  %vm2091_vm13 = vweird.f32 %v2070_v51 }
0x13e2   :  { %v2073_v41 = vsub.f32 1.0, %v2072_v52 }
0x13e3   :  { %v2098_v2 = vor.u32 1.1754944e-38, %v2097_v10  ;;  %vm2096_vm15 = vcmp.eq.f32.partialorder %v2095_v59, 8.507059e+37  ;;  %v2644_v10 = vld [vmem:[%s3554_s11] ss:$0 sm:$0xff] }
0x13e4   :  { %v2074_v15 = vmul.f32 %v2741_v50, %v2073_v41 }
0x13e6   :  { %v2075_v48 = vadd.f32 %v2741_v50, %v2074_v15 }
0x13e7   :  { %v2743_v40 = vpop.eup %2742 }
0x13e8   :  { %v2087_v55 = vmul.f32 %v2743_v40, %v2070_v51  ;;  %v2079_v0 = vsel %vm2078_vm10, %v2741_v50, %v2075_v48  ;;  %vm2092_vm12 = vweird.f32 %v2743_v40 }
0x13e9   :  { %v2084_v60 = vsel %vm2081_vm11, %v2083_v57, %v2079_v0  ;;  %vm2093_vm14 = vmor %vm2091_vm13, %vm2092_vm12 }
0x13ea   :  { %v2088_v56 = vsub.f32 1.0, %v2087_v55  ;;  %v2101_v4 = vmul.f32 %v2084_v60, %v2059_v42 }
0x13ec   :  { %v2089_v58 = vmul.f32 %v2743_v40, %v2088_v56  ;;  %v2103_v12 = vmul.f32 %v2101_v4, %v2023_v8 }
0x13ee   :  { %v2090_v62 = vadd.f32 %v2743_v40, %v2089_v58 }
0x13f0   :  { %v2094_v5 = vsel %vm2093_vm14, %v2743_v40, %v2090_v62 }
0x13f1   :  { %v2099_v30 = vsel %vm2096_vm15, %v2098_v2, %v2094_v5  ;;  %v2645_v2 = vld [vmem:[%s3555_s5] ss:$0 sm:$0xff] }
0x13f2   :  { %v2102_v47 = vmul.f32 %v2099_v30, %v2061_v38 }
0x13f4   :  { %v2104_v13 = vmul.f32 %v2102_v47, %v2025_v11 }
0x13f6   :  { %v2122_v16 = vpack.c.bf16 %v2104_v13, %v2103_v12 }
0x13f8   :  { %2184 = vmatmul.bf16.vlgmr.msra.gmra.mxu0 %v2122_v16 }
0x1475   :  { %v2185_v6 = vpop.f32.mrf.mxu0 }
0x1476   :  { %v2186_v18 = vadd.f32 %v2642_v45, %v2185_v6 }
0x1478   :  { %v2190_v7 = vadd.f32 %v2186_v18, %v3372_v46 }
0x147a   :  { %v2194_v17 = vsel %vm80_vm0, %v2190_v7, 0.0  ;;  %v2202_v36 = vmul.f32 %v2190_v7, %v2190_v7 }
0x147b   :  { %2195 = vadd.xlane.f32.xlu0 %v2194_v17 }
0x147c   :  { %v2204_v49 = vsel %vm80_vm0, %v2202_v36, 0.0 }
0x147d   :  { %v2187_v19 = vpop.f32.mrf.mxu0 }
0x147e   :  { %v2188_v20 = vadd.f32 %v2642_v45, %v2187_v19 }
0x1480   :  { %v2191_v21 = vadd.f32 %v2188_v20, %v3399_v34  ;;  %v2613_v34 = vld [vmem:[%s3515_s21 + $0x8] sm:$0xff] }
0x1481   :  { %2282 = vmatpush.bf16.msra.mxu1 %v2613_v34 }
0x1482   :  { %v2197_v23 = vsel %vm80_vm0, %v2191_v21, 0.0  ;;  %v2203_v28 = vmul.f32 %v2191_v21, %v2191_v21 }
0x1483   :  { %2198 = vadd.xlane.f32.xlu1 %v2197_v23  ;;  %2205 = vadd.xlane.f32.xlu0 %v2204_v49 }
0x1484   :  { %v2207_v29 = vsel %vm80_vm0, %v2203_v28, 0.0 }
0x1485   :  { %2283 = vmatpush.bf16.msra.mxu1 %v2612_v25 }
0x148b   :  { %2208 = vadd.xlane.f32.xlu1 %v2207_v29 }
0x14ee   :  { %v2196_v24 = vpop.xlane.xlu0 %2195 }
0x14ef   :  { %v2200_v46 = vmul.f32 %v2196_v24, %v2921_v14 }
0x14f1   :  { %v2212_v33 = vmul.f32 %v2200_v46, %v2200_v46  ;;  %v2216_v53 = vsub.f32 %v2190_v7, %v2200_v46 }
0x14f6   :  { %v2199_v31 = vpop.xlane.xlu1 %2198  ;;  %v2206_v32 = vpop.xlane.xlu0 %2205 }
0x14f7   :  { %v2210_v35 = vmul.f32 %v2206_v32, %v2921_v14  ;;  %v2201_v42 = vmul.f32 %v2199_v31, %v2921_v14 }
0x14f9   :  { %v2214_v39 = vsub.f32 %v2210_v35, %v2212_v33  ;;  %v2213_v44 = vmul.f32 %v2201_v42, %v2201_v42  ;;  %v2217_v56 = vsub.f32 %v2191_v21, %v2201_v42 }
0x14fb   :  { %v2218_v22 = vadd.f32 1e-05, %v2214_v39 }
0x14fd   :  { %2744 = vrsqrt.f32 %v2218_v22  ;;  %vm2226_vm8 = vweird.f32 %v2218_v22 }
0x14fe   :  { %v2209_v43 = vpop.xlane.xlu1 %2208 }
0x14ff   :  { %v2211_v38 = vmul.f32 %v2209_v43, %v2921_v14  ;;  %v2643_v14 = vld [vmem:[%s3513_s19] ss:$0 sm:$0xff] }
0x1501   :  { %v2215_v1 = vsub.f32 %v2211_v38, %v2213_v44 }
0x1503   :  { %v2745_v37 = vpop.eup %2744  ;;  %v2219_v3 = vadd.f32 1e-05, %v2215_v1 }
0x1504   :  { %v2221_v27 = vmul.f32 %v2745_v37, %v2218_v22  ;;  %vm2227_vm1 = vweird.f32 %v2745_v37 }
0x1505   :  { %2746 = vrsqrt.f32 %v2219_v3  ;;  %vm2228_vm9 = vmor %vm2226_vm8, %vm2227_vm1  ;;  %vm2236_vm3 = vweird.f32 %v2219_v3 }
0x1506   :  { %v2222_v26 = vmul.f32 %v2745_v37, %v2221_v27 }
0x1508   :  { %v2223_v50 = vmul.f32 0.5, %v2222_v26 }
0x150a   :  { %v2224_v51 = vsub.f32 1.5, %v2223_v50 }
0x150b   :  { %v2747_v52 = vpop.eup %2746 }
0x150c   :  { %v2225_v41 = vmul.f32 %v2745_v37, %v2224_v51  ;;  %v2231_v15 = vmul.f32 %v2747_v52, %v2219_v3  ;;  %vm2237_vm2 = vweird.f32 %v2747_v52 }
0x150d   :  { %vm2238_vm4 = vmor %vm2236_vm3, %vm2237_vm2 }
0x150e   :  { %v2232_v9 = vmul.f32 %v2747_v52, %v2231_v15  ;;  %v2229_v48 = vsel %vm2228_vm9, %v2745_v37, %v2225_v41 }
0x150f   :  { %v2240_v55 = vmul.f32 %v2229_v48, %v2216_v53 }
0x1510   :  { %v2233_v40 = vmul.f32 0.5, %v2232_v9 }
0x1511   :  { %v2245_v58 = vmul.f32 %v2643_v14, %v2240_v55 }
0x1512   :  { %v2234_v54 = vsub.f32 1.5, %v2233_v40 }
0x1513   :  { %v2250_v61 = vadd.f32 %v2644_v10, %v2245_v58 }
0x1514   :  { %v2235_v0 = vmul.f32 %v2747_v52, %v2234_v54 }
0x1516   :  { %v2239_v57 = vsel %vm2238_vm4, %v2747_v52, %v2235_v0 }
0x1517   :  { %v2241_v59 = vmul.f32 %v2239_v57, %v2217_v56 }
0x1519   :  { %v2246_v60 = vmul.f32 %v2643_v14, %v2241_v59 }
0x151b   :  { %v2251_v62 = vadd.f32 %v2644_v10, %v2246_v60 }
0x151d   :  { %v2256_v63 = vpack.c.bf16 %v2251_v62, %v2250_v61 }
0x151f   :  { %2575 = vmatmul.msk.bf16.vlgmr.msra.gmra.mxu1 %vm80_vm0, %v2256_v63 }
0x159c   :  { %v2285_v4 = vpop.f32.mrf.mxu1 }
0x159d   :  { %v2286_v5 = vadd.f32 %v2645_v2, %v2285_v4 }
0x159f   :  { %2290 = vst [vmem:[#allocation2] sm:$0xff] %v2286_v5 }
0x15a4   :  { %v2287_v30 = vpop.f32.mrf.mxu1 }
0x15a5   :  { %v2288_v8 = vadd.f32 %v2645_v2, %v2287_v30 }
0x15a7   :  { %2291 = vst [vmem:[#allocation2 + $0x8] sm:$0xff] %v2288_v8 }
0x15a8   :  { %2304 = dma.vmem_to_hbm [thread:$0]  %s2297_s12, 256, %s2299_s27, [#allocation3], %s2779_s2, %s2779_s2, %s2780_s7  }
0x15a9   :  { %2772 = dma.done.wait [#allocation3], 256  }
0x15aa   :  { %2773 = vsyncadd [#allocation3], 4294967040 }
0x15ab   :  { %2309 = vsyncpa [#allocation3], 1 }

</bundles_post_ra>
